<compile_context>
chip_gen: v7x
topology: tpu7x:2x2x1
jax: 0.10.0
libtpu: 0.0.40
codegen_flags: <defaults>
</compile_context>

<pallas_src>
import math

import numpy as np
import jax
import jax.numpy as jnp
from jax.experimental import pallas as pl
from jax.experimental.pallas import tpu as pltpu


# ----------------------------------------------------------------------------
# Model hyper-parameters (small synthetic config)
# ----------------------------------------------------------------------------
NUM_CLASSES = 16     # head num_classes
C_IN = 4             # clip channels
C_BB = 32            # backbone output width (logical)
T_LEN = 4            # clip temporal length
H_FEAT = 16          # spatial size (kept equal to input spatial size here)
W_FEAT = 16

C_PAD = 128          # lane-padded backbone channel width (zero-padded weights)
NC_PAD = 128         # lane-padded classifier width (sliced back to NUM_CLASSES)


def _round_up(x, m):
    return ((x + m - 1) // m) * m


# ----------------------------------------------------------------------------
# Pallas kernel 1: backbone stem = pointwise conv + ReLU, fused temporal mean
# ----------------------------------------------------------------------------
def _backbone_kernel(x_ref, w_ref, b_ref, o_ref):
    # x: (B, T, H, W, C_IN)   w: (C_IN, C_PAD)   b: (1, C_PAD)
    # o: (B, H, W, C_PAD)  = mean_T( relu(x @ w + b) )
    bsz, t, h, w, cin = x_ref.shape
    cp = w_ref.shape[1]
    x = x_ref[...]
    wmat = w_ref[...]
    bias = b_ref[...]
    acc = jnp.zeros((bsz * h * w, cp), dtype=jnp.float32)
    for ti in range(t):  # static unroll over T: fused temporal mean-pool
        xt = x[:, ti].reshape(bsz * h * w, cin)
        yt = jnp.dot(xt, wmat, preferred_element_type=jnp.float32) + bias
        acc = acc + jnp.maximum(yt, 0.0)
    o_ref[...] = (acc * (1.0 / t)).reshape(bsz, h, w, cp)


def backbone_pallas(x, w, b):
    # Entire problem fits comfortably in VMEM at this scale -> single grid step,
    # one launch for all stacked clips, lane-dense (last dim = 128) output.
    bsz, t, h, ww, cin = x.shape
    cp = w.shape[1]
    return pl.pallas_call(
        _backbone_kernel,
        out_shape=jax.ShapeDtypeStruct((bsz, h, ww, cp), jnp.float32),
        grid_spec=pltpu.PrefetchScalarGridSpec(
            num_scalar_prefetch=0,
            grid=(1,),
            in_specs=[
                pl.BlockSpec((bsz, t, h, ww, cin), lambda i: (0, 0, 0, 0, 0)),
                pl.BlockSpec((cin, cp), lambda i: (0, 0)),
                pl.BlockSpec((1, cp), lambda i: (0, 0)),
            ],
            out_specs=pl.BlockSpec((bsz, h, ww, cp), lambda i: (0, 0, 0, 0)),
        ),
        compiler_params=pltpu.CompilerParams(dimension_semantics=("arbitrary",)),
    )(x, w, b)


def backbone_forward(clips_ncdhw, padded_params):
    # NCDHW -> NTHWC (channels last); pointwise conv + ReLU + temporal mean.
    x = jnp.transpose(clips_ncdhw, (0, 2, 3, 4, 1)).astype(jnp.float32)
    return backbone_pallas(x, padded_params["bb_w"], padded_params["bb_b"])


# ----------------------------------------------------------------------------
# Pallas kernel 2: head = per-ROI masked max-pool -> batched FC at last step
# ----------------------------------------------------------------------------
def _head_kernel(bids_ref, boxes_ref, feat_ref, w_ref, out_ref, pooled_sc):
    del bids_ref  # consumed by the index_map (scalar prefetch batch gather)
    i = pl.program_id(0)
    last = pl.num_programs(0) - 1

    @pl.when(i == 0)
    def _():
        pooled_sc[...] = jnp.zeros_like(pooled_sc)

    _, h, w, c = feat_ref.shape
    fm = feat_ref[0]                                  # (H, W, C) pooled-over-T

    x1 = boxes_ref[i, 0]
    y1 = boxes_ref[i, 1]
    x2 = boxes_ref[i, 2]
    y2 = boxes_ref[i, 3]
    row = boxes_ref[i, 4]                             # original ROI output row

    hh = jax.lax.broadcasted_iota(jnp.int32, (h, w, 1), 0)
    ww = jax.lax.broadcasted_iota(jnp.int32, (h, w, 1), 1)
    inside = (hh >= y1) & (hh < y2) & (ww >= x1) & (ww < x2)

    pooled = jnp.max(jnp.where(inside, fm, -jnp.inf), axis=(0, 1))   # (C,)
    pooled_sc[pl.ds(row, 1), :] = pooled.reshape(1, c)

    @pl.when(i == last)
    def _():
        # one batched matmul + one lane-dense full-block store for all ROIs
        out_ref[...] = jnp.dot(pooled_sc[...], w_ref[...],
                               preferred_element_type=jnp.float32)


def head_pallas(feats, bids, boxes, fc_w):
    _, h, w, c = feats.shape
    r = int(bids.shape[0])
    r_pad = max(8, _round_up(r, 8))
    ncp = fc_w.shape[1]
    return pl.pallas_call(
        _head_kernel,
        out_shape=jax.ShapeDtypeStruct((r_pad, ncp), jnp.float32),
        grid_spec=pltpu.PrefetchScalarGridSpec(
            num_scalar_prefetch=1,               # bids -> SMEM, drives index_map
            grid=(r,),
            in_specs=[
                pl.BlockSpec(memory_space=pltpu.MemorySpace.SMEM),   # pixel boxes
                pl.BlockSpec((1, h, w, c),
                             lambda i, bids: (bids[i], 0, 0, 0)),    # batch gather
                pl.BlockSpec((c, ncp), lambda i, bids: (0, 0)),
            ],
            out_specs=pl.BlockSpec((r_pad, ncp), lambda i, bids: (0, 0)),
            scratch_shapes=[pltpu.VMEM((r_pad, c), jnp.float32)],
        ),
        compiler_params=pltpu.CompilerParams(dimension_semantics=("arbitrary",)),
    )(bids, boxes, feats, fc_w)


def head_forward(feats_all, clip_offset, rois, sizes_before_padding, fc_w_pad):
    _, h, w, _ = feats_all.shape
    rois_np = np.asarray(rois, dtype=np.float32)
    r = rois_np.shape[0]
    bids = rois_np[:, 0].astype(np.int32)
    boxes = np.zeros((r, 5), dtype=np.int32)
    for i in range(r):
        b = int(bids[i])
        eff_w = math.ceil(w * sizes_before_padding[b][0])
        eff_h = math.ceil(h * sizes_before_padding[b][1])
        x1 = int(math.floor(rois_np[i, 1] * eff_w))
        y1 = int(math.floor(rois_np[i, 2] * eff_h))
        x2 = int(math.ceil(rois_np[i, 3] * eff_w))
        y2 = int(math.ceil(rois_np[i, 4] * eff_h))
        x1 = max(0, min(x1, w - 1))
        x2 = max(x1 + 1, min(x2, w))
        y1 = max(0, min(y1, h - 1))
        y2 = max(y1 + 1, min(y2, h))
        boxes[i] = [x1, y1, x2, y2, i]        # last col = original output row

    # Group ROIs by batch id so consecutive grid steps reuse the same feature
    # block index (Pallas then skips the re-DMA of the (1,H,W,C) feature).
    order = np.argsort(bids, kind="stable")
    bids_sorted = (bids[order] + np.int32(clip_offset)).astype(np.int32)
    boxes_sorted = np.ascontiguousarray(boxes[order])

    out_pad = head_pallas(feats_all, jnp.asarray(bids_sorted),
                          jnp.asarray(boxes_sorted), fc_w_pad)
    # padded rows / padded classifier lanes are all-zero; slice them away.
    return out_pad[:r, :NUM_CLASSES]


# ----------------------------------------------------------------------------
# Neck ("basic" neck): pure bookkeeping on aug_info / labels -> ROIs, targets
# ----------------------------------------------------------------------------
def _transform_bbox(bbox, ai):
    cb = ai["crop_box"]
    cw, ch = cb[2] - cb[0], cb[3] - cb[1]
    x1 = (bbox[0] - cb[0]) / cw
    x2 = (bbox[2] - cb[0]) / cw
    y1 = (bbox[1] - cb[1]) / ch
    y2 = (bbox[3] - cb[1]) / ch
    if ai["flip"]:
        x1, x2 = 1.0 - x2, 1.0 - x1
    x1 = min(max(x1, 0.0), 1.0)
    x2 = min(max(x2, 0.0), 1.0)
    y1 = min(max(y1, 0.0), 1.0)
    y2 = min(max(y2, 0.0), 1.0)
    if (x2 - x1) < 1e-3 or (y2 - y1) < 1e-3:
        return None
    return [x1, y1, x2, y2]


def neck_forward(aug_info, labels, filenames, mid_times, num_classes):
    rois, roi_ids, targets, sizes_before_padding = [], [0], [], []
    out_filenames, out_mid_times, bboxes, bbox_ids = [], [], [], []
    cur_bbox_id = -1
    for idx in range(len(labels)):
        ai = aug_info[idx]
        pr = ai["pad_ratio"]
        sizes_before_padding.append([1.0 / pr[0], 1.0 / pr[1]])
        for label in labels[idx]:
            cur_bbox_id += 1
            tb = _transform_bbox(label["bounding_box"], ai)
            if tb is None:
                continue
            out_filenames.append(filenames[idx])
            out_mid_times.append(mid_times[idx])
            bboxes.append(label["bounding_box"])
            bbox_ids.append(cur_bbox_id)
            rois.append([float(idx)] + tb)
            tgt = np.zeros((num_classes,), dtype=np.float32)
            tgt[np.asarray(label["label"], dtype=np.int32)] = 1.0
            targets.append(jnp.asarray(tgt))
        roi_ids.append(len(rois))
    return {
        "rois": rois,
        "num_rois": len(rois),
        "roi_ids": roi_ids,
        "targets": targets,
        "sizes_before_padding": sizes_before_padding,
        "filenames": out_filenames,
        "mid_times": out_mid_times,
        "bboxes": bboxes,
        "bbox_ids": bbox_ids,
    }


# ----------------------------------------------------------------------------
# Parameters (logical widths) + lane-padded kernel views
# ----------------------------------------------------------------------------
def init_params(key):
    k1, k2, k3 = jax.random.split(key, 3)
    return {
        "bb_w": 0.1 * jax.random.normal(k1, (C_IN, C_BB), dtype=jnp.float32),
        "bb_b": 0.01 * jax.random.normal(k2, (C_BB,), dtype=jnp.float32),
        "fc_w": 0.1 * jax.random.normal(k3, (C_BB, NUM_CLASSES), dtype=jnp.float32),
    }


def prepare_padded_params(params):
    # Zero-pad channel / class widths to 128 lanes: padded channels produce
    # zero activations and padded fc rows/cols are zero, so logits[:NUM_CLASSES]
    # are bit-identical in math to the unpadded model.
    bb_w = jnp.zeros((C_IN, C_PAD), jnp.float32).at[:, :C_BB].set(params["bb_w"])
    bb_b = jnp.zeros((1, C_PAD), jnp.float32).at[0, :C_BB].set(params["bb_b"])
    fc_w = jnp.zeros((C_PAD, NC_PAD), jnp.float32).at[:C_BB, :NUM_CLASSES].set(
        params["fc_w"])
    return {"bb_w": bb_w, "bb_b": bb_b, "fc_w": fc_w}


# ----------------------------------------------------------------------------
# AcarNet.forward (orchestration reproduced exactly)
# ----------------------------------------------------------------------------
def acar_net_forward(data, params, num_classes=NUM_CLASSES):
    padded = prepare_padded_params(params)

    noaug_info = [{"crop_box": [0.0, 0.0, 1.0, 1.0], "flip": False,
                   "pad_ratio": [1.0, 1.0]}] * len(data["labels"])
    o = neck_forward(noaug_info, data["labels"], data["filenames"],
                     data["mid_times"], num_classes)

    output_list = [None] * len(o["filenames"])
    cnt_list = [0] * len(o["filenames"])

    num_clips = len(data["clips"])
    n_per_clip = int(data["clips"][0].shape[0])

    # All host-side neck bookkeeping up-front (no host work between launches).
    necks = [neck_forward(data["aug_info"][no], data["labels"],
                          data["filenames"], data["mid_times"], num_classes)
             for no in range(num_clips)]

    # One backbone launch for all clips, with the temporal mean-pool fused in.
    clips_all = jnp.concatenate([jnp.asarray(c) for c in data["clips"]], axis=0)
    feats_all = backbone_forward(clips_all, padded)      # (num_clips*N, H, W, C_PAD)

    for no in range(num_clips):
        o_n = necks[no]
        if o_n["num_rois"] == 0:
            continue
        ids = o_n["bbox_ids"]
        outputs = head_forward(feats_all, no * n_per_clip, o_n["rois"],
                               o_n["sizes_before_padding"], padded["fc_w"])
        for idx in range(o_n["num_rois"]):
            if cnt_list[ids[idx]] == 0:
                output_list[ids[idx]] = outputs[idx]
            else:
                output_list[ids[idx]] = output_list[ids[idx]] + outputs[idx]
            cnt_list[ids[idx]] += 1

    num_rois, filenames, mid_times, bboxes, targets, outputs = 0, [], [], [], [], []
    for idx in range(len(o["filenames"])):
        if cnt_list[idx] == 0:
            continue
        num_rois += 1
        filenames.append(o["filenames"][idx])
        mid_times.append(o["mid_times"][idx])
        bboxes.append(o["bboxes"][idx])
        targets.append(o["targets"][idx])
        outputs.append(output_list[idx] / float(cnt_list[idx]))

    if num_rois == 0:
        return {"outputs": None, "targets": None, "num_rois": 0,
                "filenames": filenames, "mid_times": mid_times, "bboxes": bboxes}

    final_outputs = jnp.stack(outputs, axis=0)
    final_targets = jnp.stack(targets, axis=0)
    return {"outputs": final_outputs, "targets": final_targets,
            "num_rois": num_rois, "filenames": filenames,
            "mid_times": mid_times, "bboxes": bboxes}


# ----------------------------------------------------------------------------
# Main
# ----------------------------------------------------------------------------
if __name__ == "__main__":
    key = jax.random.PRNGKey(0)
    kp, kc0, kc1 = jax.random.split(key, 3)
    params = init_params(kp)

    N = 2
    clips = [
        jax.random.normal(kc0, (N, C_IN, T_LEN, H_FEAT, W_FEAT), dtype=jnp.float32),
        jax.random.normal(kc1, (N, C_IN, T_LEN, H_FEAT, W_FEAT), dtype=jnp.float32),
    ]

    labels = [
        [
            {"bounding_box": [0.20, 0.20, 0.60, 0.70], "label": [1, 3]},
            {"bounding_box": [0.50, 0.10, 0.90, 0.50], "label": [5]},
        ],
        [
            {"bounding_box": [0.30, 0.30, 0.80, 0.80], "label": [2, 7]},
        ],
    ]
    filenames = ["video_0", "video_1"]
    mid_times = ["0902", "0903"]

    aug_info = [
        # view 0: identity augmentation
        [{"crop_box": [0.0, 0.0, 1.0, 1.0], "flip": False, "pad_ratio": [1.0, 1.0]}
         for _ in range(N)],
        # view 1: crop + horizontal flip
        [{"crop_box": [0.1, 0.1, 0.9, 0.9], "flip": True, "pad_ratio": [1.0, 1.0]}
         for _ in range(N)],
    ]

    data = {
        "clips": clips,
        "aug_info": aug_info,
        "labels": labels,
        "filenames": filenames,
        "mid_times": mid_times,
    }

    result = acar_net_forward(data, params)
    jax.block_until_ready(result["outputs"])
    jax.block_until_ready(result["targets"])
    assert result["outputs"].shape == (result["num_rois"], NUM_CLASSES)
    assert result["targets"].shape == (result["num_rois"], NUM_CLASSES)
    assert bool(jnp.all(jnp.isfinite(result["outputs"])))
    print("KERNEL_OK")
</pallas_src>

<mosaic_0001>
module attributes {stable_mosaic.version = 11 : i64} {
  func.func @_backbone_kernel(%arg0: i32, %arg1: memref<4x4x16x16x4xf32, #tpu.memory_space<vmem>>, %arg2: memref<4x128xf32, #tpu.memory_space<vmem>>, %arg3: memref<1x128xf32, #tpu.memory_space<vmem>>, %arg4: memref<4x16x16x128xf32, #tpu.memory_space<vmem>>) attributes {dimension_semantics = [#tpu.dimension_semantics<arbitrary>], iteration_bounds = array<i64: 1>, scalar_prefetch = 0 : i64, scratch_operands = 0 : i64, tpu.core_type = #tpu.core_type<tc>, window_params = [{pipeline_mode = #tpu.pipeline_mode<synchronous>, transform_indices = @transform_0, window_bounds = array<i64: 4, 4, 16, 16, 4>}, {pipeline_mode = #tpu.pipeline_mode<synchronous>, transform_indices = @transform_1, window_bounds = array<i64: 4, 128>}, {pipeline_mode = #tpu.pipeline_mode<synchronous>, transform_indices = @transform_2, window_bounds = array<i64: 1, 128>}, {pipeline_mode = #tpu.pipeline_mode<synchronous>, transform_indices = @transform_3, window_bounds = array<i64: 4, 16, 16, 128>}]} {
    %c0 = arith.constant 0 : index
    %c0_0 = arith.constant 0 : index
    %c0_1 = arith.constant 0 : index
    %c0_2 = arith.constant 0 : index
    %c0_3 = arith.constant 0 : index
    %0 = vector.load %arg1[%c0, %c0_0, %c0_1, %c0_2, %c0_3] : memref<4x4x16x16x4xf32, #tpu.memory_space<vmem>>, vector<4x4x16x16x4xf32>
    %c0_4 = arith.constant 0 : index
    %c0_5 = arith.constant 0 : index
    %1 = vector.load %arg2[%c0_4, %c0_5] : memref<4x128xf32, #tpu.memory_space<vmem>>, vector<4x128xf32>
    %c0_6 = arith.constant 0 : index
    %c0_7 = arith.constant 0 : index
    %2 = vector.load %arg3[%c0_6, %c0_7] : memref<1x128xf32, #tpu.memory_space<vmem>>, vector<1x128xf32>
    %cst = arith.constant 0.000000e+00 : f32
    %3 = vector.broadcast %cst : f32 to vector<1024x128xf32>
    %4 = vector.extract_strided_slice %0 {offsets = [0, 0, 0, 0, 0], sizes = [4, 1, 16, 16, 4], strides = [1, 1, 1, 1, 1]} : vector<4x4x16x16x4xf32> to vector<4x1x16x16x4xf32>
    %5 = vector.shape_cast %4 : vector<4x1x16x16x4xf32> to vector<4x16x16x4xf32>
    %6 = vector.shape_cast %5 : vector<4x16x16x4xf32> to vector<1024x4xf32>
    %cst_8 = arith.constant dense<0.000000e+00> : vector<1024x128xf32>
    %7 = tpu.matmul %6, %1, %cst_8 {dimension_numbers = #tpu.dot_dimension_numbers<[1], [0], [0], [1], [0, 0, 1, 1], [], []>} : vector<1024x4xf32>, vector<4x128xf32>, vector<1024x128xf32> -> vector<1024x128xf32>
    %8 = vector.broadcast %2 : vector<1x128xf32> to vector<1024x128xf32>
    %9 = arith.addf %7, %8 : vector<1024x128xf32>
    %cst_9 = arith.constant 0.000000e+00 : f32
    %10 = vector.broadcast %cst_9 : f32 to vector<1024x128xf32>
    %11 = arith.maximumf %9, %10 : vector<1024x128xf32>
    %12 = arith.addf %3, %11 : vector<1024x128xf32>
    %13 = vector.extract_strided_slice %0 {offsets = [0, 1, 0, 0, 0], sizes = [4, 1, 16, 16, 4], strides = [1, 1, 1, 1, 1]} : vector<4x4x16x16x4xf32> to vector<4x1x16x16x4xf32>
    %14 = vector.shape_cast %13 : vector<4x1x16x16x4xf32> to vector<4x16x16x4xf32>
    %15 = vector.shape_cast %14 : vector<4x16x16x4xf32> to vector<1024x4xf32>
    %cst_10 = arith.constant dense<0.000000e+00> : vector<1024x128xf32>
    %16 = tpu.matmul %15, %1, %cst_10 {dimension_numbers = #tpu.dot_dimension_numbers<[1], [0], [0], [1], [0, 0, 1, 1], [], []>} : vector<1024x4xf32>, vector<4x128xf32>, vector<1024x128xf32> -> vector<1024x128xf32>
    %17 = vector.broadcast %2 : vector<1x128xf32> to vector<1024x128xf32>
    %18 = arith.addf %16, %17 : vector<1024x128xf32>
    %cst_11 = arith.constant 0.000000e+00 : f32
    %19 = vector.broadcast %cst_11 : f32 to vector<1024x128xf32>
    %20 = arith.maximumf %18, %19 : vector<1024x128xf32>
    %21 = arith.addf %12, %20 : vector<1024x128xf32>
    %22 = vector.extract_strided_slice %0 {offsets = [0, 2, 0, 0, 0], sizes = [4, 1, 16, 16, 4], strides = [1, 1, 1, 1, 1]} : vector<4x4x16x16x4xf32> to vector<4x1x16x16x4xf32>
    %23 = vector.shape_cast %22 : vector<4x1x16x16x4xf32> to vector<4x16x16x4xf32>
    %24 = vector.shape_cast %23 : vector<4x16x16x4xf32> to vector<1024x4xf32>
    %cst_12 = arith.constant dense<0.000000e+00> : vector<1024x128xf32>
    %25 = tpu.matmul %24, %1, %cst_12 {dimension_numbers = #tpu.dot_dimension_numbers<[1], [0], [0], [1], [0, 0, 1, 1], [], []>} : vector<1024x4xf32>, vector<4x128xf32>, vector<1024x128xf32> -> vector<1024x128xf32>
    %26 = vector.broadcast %2 : vector<1x128xf32> to vector<1024x128xf32>
    %27 = arith.addf %25, %26 : vector<1024x128xf32>
    %cst_13 = arith.constant 0.000000e+00 : f32
    %28 = vector.broadcast %cst_13 : f32 to vector<1024x128xf32>
    %29 = arith.maximumf %27, %28 : vector<1024x128xf32>
    %30 = arith.addf %21, %29 : vector<1024x128xf32>
    %31 = vector.extract_strided_slice %0 {offsets = [0, 3, 0, 0, 0], sizes = [4, 1, 16, 16, 4], strides = [1, 1, 1, 1, 1]} : vector<4x4x16x16x4xf32> to vector<4x1x16x16x4xf32>
    %32 = vector.shape_cast %31 : vector<4x1x16x16x4xf32> to vector<4x16x16x4xf32>
    %33 = vector.shape_cast %32 : vector<4x16x16x4xf32> to vector<1024x4xf32>
    %cst_14 = arith.constant dense<0.000000e+00> : vector<1024x128xf32>
    %34 = tpu.matmul %33, %1, %cst_14 {dimension_numbers = #tpu.dot_dimension_numbers<[1], [0], [0], [1], [0, 0, 1, 1], [], []>} : vector<1024x4xf32>, vector<4x128xf32>, vector<1024x128xf32> -> vector<1024x128xf32>
    %35 = vector.broadcast %2 : vector<1x128xf32> to vector<1024x128xf32>
    %36 = arith.addf %34, %35 : vector<1024x128xf32>
    %cst_15 = arith.constant 0.000000e+00 : f32
    %37 = vector.broadcast %cst_15 : f32 to vector<1024x128xf32>
    %38 = arith.maximumf %36, %37 : vector<1024x128xf32>
    %39 = arith.addf %30, %38 : vector<1024x128xf32>
    %cst_16 = arith.constant 2.500000e-01 : f32
    %40 = vector.broadcast %cst_16 : f32 to vector<1024x128xf32>
    %41 = arith.mulf %39, %40 : vector<1024x128xf32>
    %42 = vector.shape_cast %41 : vector<1024x128xf32> to vector<4x16x16x128xf32>
    %c0_17 = arith.constant 0 : index
    %c0_18 = arith.constant 0 : index
    %c0_19 = arith.constant 0 : index
    %c0_20 = arith.constant 0 : index
    %43 = vector.load %arg4[%c0_17, %c0_18, %c0_19, %c0_20] : memref<4x16x16x128xf32, #tpu.memory_space<vmem>>, vector<4x16x16x128xf32>
    tpu.vector_store %arg4[%c0_17, %c0_18, %c0_19, %c0_20], %42 {strides = array<i32>} : memref<4x16x16x128xf32, #tpu.memory_space<vmem>>, vector<4x16x16x128xf32>,
    return
  }
  func.func @transform_0(%arg0: i32) -> (i32, i32, i32, i32, i32) {
    %c0_i32 = arith.constant 0 : i32
    %c0_i32_0 = arith.constant 0 : i32
    %c0_i32_1 = arith.constant 0 : i32
    %c0_i32_2 = arith.constant 0 : i32
    %c0_i32_3 = arith.constant 0 : i32
    %c0_i32_4 = arith.constant 0 : i32
    return %c0_i32, %c0_i32_0, %c0_i32_1, %c0_i32_2, %c0_i32_3 : i32, i32, i32, i32, i32
  }
  func.func @transform_1(%arg0: i32) -> (i32, i32) {
    %c0_i32 = arith.constant 0 : i32
    %c0_i32_0 = arith.constant 0 : i32
    %c0_i32_1 = arith.constant 0 : i32
    return %c0_i32, %c0_i32_0 : i32, i32
  }
  func.func @transform_2(%arg0: i32) -> (i32, i32) {
    %c0_i32 = arith.constant 0 : i32
    %c0_i32_0 = arith.constant 0 : i32
    %c0_i32_1 = arith.constant 0 : i32
    return %c0_i32, %c0_i32_0 : i32, i32
  }
  func.func @transform_3(%arg0: i32) -> (i32, i32, i32, i32) {
    %c0_i32 = arith.constant 0 : i32
    %c0_i32_0 = arith.constant 0 : i32
    %c0_i32_1 = arith.constant 0 : i32
    %c0_i32_2 = arith.constant 0 : i32
    %c0_i32_3 = arith.constant 0 : i32
    return %c0_i32, %c0_i32_0, %c0_i32_1, %c0_i32_2 : i32, i32, i32, i32
  }
}

</mosaic_0001>

<bundles_post_ra>
// kernel: tpu_custom_call.1
= control target key start
LH: loop header
LB: loop body
LE: loop exit
PB: predicated region body
PF: predicated region fallthrough
CT: control target
= control target key end

     0   :  { %vm920_vm0 = vcmask 1043456   ;;  %vm535_vm1 = vcmask 31744   ;;  %s11053_s0 = inlined_call_operand.vmem [shape: f32[4,4,16,16,4], index: 0, kind: input, shape index: {}]   ;;  %s11054_s1 = inlined_call_operand.vmem [shape: f32[4,128], index: 1, kind: input, shape index: {}]   ;;  %s11055_s2 = inlined_call_operand.vmem [shape: f32[1,128], index: 2, kind: input, shape index: {}]   ;;  %s11056_s3 = inlined_call_operand.hbm [shape: f32[4,16,16,128], index: 3, kind: output, shape index: {}]  }
   0x1   :  { %v527_v0 = vld [vmem:[%s11054_s1] sm:$0xf]  ;;  %v16_v3 = vld [vmem:[%s11053_s0 + $0x8] sm:$0xff]  ;;  %v17_v5 = vld [vmem:[%s11053_s0 + $0x10] sm:$0xff] }
   0x2   :  { %v15_v1 = vld [vmem:[%s11053_s0] sm:$0xff]  ;;  %7225 = vmatprep.subr.msk.mxu0 %vm920_vm0, %v527_v0  ;;  %7419 = vmatprep.subr.msk.mxu1 %vm920_vm0, %v527_v0  ;;  %v48_v4 = vld [vmem:[%s11053_s0 + $0x108] sm:$0xff]  ;;  %v49_v6 = vld [vmem:[%s11053_s0 + $0x110] sm:$0xff] }
   0x3   :  { %v47_v2 = vld [vmem:[%s11053_s0 + $0x100] sm:$0xff]  ;;  %7226 = vmatpush3.msk.msra.mxu0 %vm920_vm0, %v527_v0  ;;  %7227 = vmatprep.mubr.msk.f32.mxu0 %vm535_vm1, %v15_v1  ;;  %v18_v7 = vld [vmem:[%s11053_s0 + $0x18] sm:$0xff]  ;;  %v20_v11 = vld [vmem:[%s11053_s0 + $0x28] sm:$0xff] }
   0x4   :  { %7420 = vmatpush3.msk.msra.mxu1 %vm920_vm0, %v527_v0  ;;  %7421 = vmatprep.mubr.msk.f32.mxu1 %vm535_vm1, %v47_v2  ;;  %v50_v8 = vld [vmem:[%s11053_s0 + $0x118] sm:$0xff]  ;;  %v19_v9 = vld [vmem:[%s11053_s0 + $0x20] sm:$0xff]  ;;  %v52_v12 = vld [vmem:[%s11053_s0 + $0x128] sm:$0xff] }
   0x5   :  { %7228 = vmatmul.mubr.msk.f32.vlgmr.msra.gmra.mrb[0].mxu0 %vm535_vm1, %v16_v3  ;;  %7422 = vmatmul.mubr.msk.f32.vlgmr.msra.gmra.mrb[0].mxu1 %vm535_vm1, %v48_v4  ;;  %v51_v10 = vld [vmem:[%s11053_s0 + $0x120] sm:$0xff]  ;;  %v21_v13 = vld [vmem:[%s11053_s0 + $0x30] sm:$0xff]  ;;  %v22_v15 = vld [vmem:[%s11053_s0 + $0x38] sm:$0xff] }
   0x6   :  { %7613 = vmatprep.subr.msk.mxu0 %vm920_vm0, %v527_v0  ;;  %7807 = vmatprep.subr.msk.mxu1 %vm920_vm0, %v527_v0  ;;  %v53_v14 = vld [vmem:[%s11053_s0 + $0x130] sm:$0xff]  ;;  %v54_v16 = vld [vmem:[%s11053_s0 + $0x138] sm:$0xff]  ;;  %v23_v17 = vld [vmem:[%s11053_s0 + $0x40] sm:$0xff] }
   0x7   :  { %7614 = vmatpush3.msk.msra.mxu0 %vm920_vm0, %v527_v0  ;;  %7230 = vmatprep.mubr.msk.f32.mxu0 %vm535_vm1, %v17_v5  ;;  %v55_v18 = vld [vmem:[%s11053_s0 + $0x140] sm:$0xff]  ;;  %v24_v19 = vld [vmem:[%s11053_s0 + $0x48] sm:$0xff]  ;;  %v25_v21 = vld [vmem:[%s11053_s0 + $0x50] sm:$0xff] }
   0x8   :  { %7424 = vmatprep.mubr.msk.f32.mxu1 %vm535_vm1, %v49_v6  ;;  %7808 = vmatpush3.msk.msra.mxu1 %vm920_vm0, %v527_v0  ;;  %v56_v20 = vld [vmem:[%s11053_s0 + $0x148] sm:$0xff]  ;;  %v57_v22 = vld [vmem:[%s11053_s0 + $0x150] sm:$0xff]  ;;  %v26_v23 = vld [vmem:[%s11053_s0 + $0x58] sm:$0xff] }
   0x9   :  { %7231 = vmatmul.mubr.msk.f32.gmra.mrb[2].mxu0 %vm535_vm1, %v18_v7  ;;  %7425 = vmatmul.mubr.msk.f32.gmra.mrb[2].mxu1 %vm535_vm1, %v50_v8  ;;  %v58_v24 = vld [vmem:[%s11053_s0 + $0x158] sm:$0xff]  ;;  %v27_v25 = vld [vmem:[%s11053_s0 + $0x60] sm:$0xff]  ;;  %v28_v27 = vld [vmem:[%s11053_s0 + $0x68] sm:$0xff] }
   0xa   :  { %7233 = vmatprep.mubr.msk.f32.mxu0 %vm535_vm1, %v19_v9  ;;  %7427 = vmatprep.mubr.msk.f32.mxu1 %vm535_vm1, %v51_v10  ;;  %v59_v26 = vld [vmem:[%s11053_s0 + $0x160] sm:$0xff]  ;;  %v60_v28 = vld [vmem:[%s11053_s0 + $0x168] sm:$0xff]  ;;  %v29_v29 = vld [vmem:[%s11053_s0 + $0x70] sm:$0xff] }
   0xb   :  { %v61_v30 = vld [vmem:[%s11053_s0 + $0x170] sm:$0xff]  ;;  %v30_v31 = vld [vmem:[%s11053_s0 + $0x78] sm:$0xff]  ;;  %v31_v33 = vld [vmem:[%s11053_s0 + $0x80] sm:$0xff] }
   0xc   :  { %v62_v32 = vld [vmem:[%s11053_s0 + $0x178] sm:$0xff]  ;;  %v63_v34 = vld [vmem:[%s11053_s0 + $0x180] sm:$0xff]  ;;  %v32_v35 = vld [vmem:[%s11053_s0 + $0x88] sm:$0xff] }
   0xd   :  { %7234 = vmatmul.mubr.msk.f32.gmra.mrb[4].mxu0 %vm535_vm1, %v20_v11  ;;  %7428 = vmatmul.mubr.msk.f32.gmra.mrb[4].mxu1 %vm535_vm1, %v52_v12  ;;  %v64_v36 = vld [vmem:[%s11053_s0 + $0x188] sm:$0xff]  ;;  %v33_v37 = vld [vmem:[%s11053_s0 + $0x90] sm:$0xff]  ;;  %v34_v39 = vld [vmem:[%s11053_s0 + $0x98] sm:$0xff] }
   0xe   :  { %7236 = vmatprep.mubr.msk.f32.mxu0 %vm535_vm1, %v21_v13  ;;  %7430 = vmatprep.mubr.msk.f32.mxu1 %vm535_vm1, %v53_v14  ;;  %v65_v38 = vld [vmem:[%s11053_s0 + $0x190] sm:$0xff]  ;;  %v66_v40 = vld [vmem:[%s11053_s0 + $0x198] sm:$0xff]  ;;  %v35_v41 = vld [vmem:[%s11053_s0 + $0xa0] sm:$0xff] }
   0xf   :  { %v67_v42 = vld [vmem:[%s11053_s0 + $0x1a0] sm:$0xff]  ;;  %v36_v43 = vld [vmem:[%s11053_s0 + $0xa8] sm:$0xff]  ;;  %v37_v45 = vld [vmem:[%s11053_s0 + $0xb0] sm:$0xff] }
  0x10   :  { %v68_v44 = vld [vmem:[%s11053_s0 + $0x1a8] sm:$0xff]  ;;  %v69_v46 = vld [vmem:[%s11053_s0 + $0x1b0] sm:$0xff]  ;;  %v38_v47 = vld [vmem:[%s11053_s0 + $0xb8] sm:$0xff] }
  0x11   :  { %7237 = vmatmul.mubr.msk.f32.gmra.mrb[6].mxu0 %vm535_vm1, %v22_v15  ;;  %7431 = vmatmul.mubr.msk.f32.gmra.mrb[6].mxu1 %vm535_vm1, %v54_v16  ;;  %v70_v48 = vld [vmem:[%s11053_s0 + $0x1b8] sm:$0xff]  ;;  %v39_v49 = vld [vmem:[%s11053_s0 + $0xc0] sm:$0xff]  ;;  %v40_v51 = vld [vmem:[%s11053_s0 + $0xc8] sm:$0xff] }
  0x12   :  { %7239 = vmatprep.mubr.msk.f32.mxu0 %vm535_vm1, %v23_v17  ;;  %7433 = vmatprep.mubr.msk.f32.mxu1 %vm535_vm1, %v55_v18  ;;  %v71_v50 = vld [vmem:[%s11053_s0 + $0x1c0] sm:$0xff]  ;;  %v72_v52 = vld [vmem:[%s11053_s0 + $0x1c8] sm:$0xff]  ;;  %v41_v53 = vld [vmem:[%s11053_s0 + $0xd0] sm:$0xff] }
  0x13   :  { %v73_v54 = vld [vmem:[%s11053_s0 + $0x1d0] sm:$0xff]  ;;  %v42_v55 = vld [vmem:[%s11053_s0 + $0xd8] sm:$0xff]  ;;  %v43_v57 = vld [vmem:[%s11053_s0 + $0xe0] sm:$0xff] }
  0x14   :  { %v74_v56 = vld [vmem:[%s11053_s0 + $0x1d8] sm:$0xff]  ;;  %v75_v58 = vld [vmem:[%s11053_s0 + $0x1e0] sm:$0xff]  ;;  %v44_v59 = vld [vmem:[%s11053_s0 + $0xe8] sm:$0xff] }
  0x15   :  { %7240 = vmatmul.mubr.msk.f32.gmra.mrb[8].mxu0 %vm535_vm1, %v24_v19  ;;  %7434 = vmatmul.mubr.msk.f32.gmra.mrb[8].mxu1 %vm535_vm1, %v56_v20  ;;  %v76_v60 = vld [vmem:[%s11053_s0 + $0x1e8] sm:$0xff]  ;;  %v45_v61 = vld [vmem:[%s11053_s0 + $0xf0] sm:$0xff]  ;;  %v46_v63 = vld [vmem:[%s11053_s0 + $0xf8] sm:$0xff] }
  0x16   :  { %7242 = vmatprep.mubr.msk.f32.mxu0 %vm535_vm1, %v25_v21  ;;  %7436 = vmatprep.mubr.msk.f32.mxu1 %vm535_vm1, %v57_v22  ;;  %v77_v62 = vld [vmem:[%s11053_s0 + $0x1f0] sm:$0xff]  ;;  %v78_v0 = vld [vmem:[%s11053_s0 + $0x1f8] sm:$0xff]  ;;  %v143_v1 = vld [vmem:[%s11053_s0 + $0x400] sm:$0xff] }
  0x17   :  { %v175_v2 = vld [vmem:[%s11053_s0 + $0x500] sm:$0xff] }
  0x19   :  { %7243 = vmatmul.mubr.msk.f32.gmra.mrb[10].mxu0 %vm535_vm1, %v26_v23  ;;  %7437 = vmatmul.mubr.msk.f32.gmra.mrb[10].mxu1 %vm535_vm1, %v58_v24 }
  0x1a   :  { %7245 = vmatprep.mubr.msk.f32.mxu0 %vm535_vm1, %v27_v25  ;;  %7439 = vmatprep.mubr.msk.f32.mxu1 %vm535_vm1, %v59_v26 }
  0x1d   :  { %7246 = vmatmul.mubr.msk.f32.gmra.mrb[12].mxu0 %vm535_vm1, %v28_v27  ;;  %7440 = vmatmul.mubr.msk.f32.gmra.mrb[12].mxu1 %vm535_vm1, %v60_v28 }
  0x1e   :  { %7248 = vmatprep.mubr.msk.f32.mxu0 %vm535_vm1, %v29_v29  ;;  %7442 = vmatprep.mubr.msk.f32.mxu1 %vm535_vm1, %v61_v30 }
  0x21   :  { %7249 = vmatmul.mubr.msk.f32.gmra.mrb[14].mxu0 %vm535_vm1, %v30_v31  ;;  %7443 = vmatmul.mubr.msk.f32.gmra.mrb[14].mxu1 %vm535_vm1, %v62_v32 }
  0x22   :  { %7251 = vmatprep.mubr.msk.f32.mxu0 %vm535_vm1, %v31_v33  ;;  %7445 = vmatprep.mubr.msk.f32.mxu1 %vm535_vm1, %v63_v34 }
  0x25   :  { %7252 = vmatmul.mubr.msk.f32.gmra.mrb[16].mxu0 %vm535_vm1, %v32_v35  ;;  %7446 = vmatmul.mubr.msk.f32.gmra.mrb[16].mxu1 %vm535_vm1, %v64_v36 }
  0x26   :  { %7254 = vmatprep.mubr.msk.f32.mxu0 %vm535_vm1, %v33_v37  ;;  %7448 = vmatprep.mubr.msk.f32.mxu1 %vm535_vm1, %v65_v38 }
  0x29   :  { %7255 = vmatmul.mubr.msk.f32.gmra.mrb[18].mxu0 %vm535_vm1, %v34_v39  ;;  %7449 = vmatmul.mubr.msk.f32.gmra.mrb[18].mxu1 %vm535_vm1, %v66_v40 }
  0x2a   :  { %7257 = vmatprep.mubr.msk.f32.mxu0 %vm535_vm1, %v35_v41  ;;  %7451 = vmatprep.mubr.msk.f32.mxu1 %vm535_vm1, %v67_v42 }
  0x2d   :  { %7258 = vmatmul.mubr.msk.f32.gmra.mrb[20].mxu0 %vm535_vm1, %v36_v43  ;;  %7452 = vmatmul.mubr.msk.f32.gmra.mrb[20].mxu1 %vm535_vm1, %v68_v44 }
  0x2e   :  { %7260 = vmatprep.mubr.msk.f32.mxu0 %vm535_vm1, %v37_v45  ;;  %7454 = vmatprep.mubr.msk.f32.mxu1 %vm535_vm1, %v69_v46 }
  0x31   :  { %7261 = vmatmul.mubr.msk.f32.gmra.mrb[22].mxu0 %vm535_vm1, %v38_v47  ;;  %7455 = vmatmul.mubr.msk.f32.gmra.mrb[22].mxu1 %vm535_vm1, %v70_v48 }
  0x32   :  { %7263 = vmatprep.mubr.msk.f32.mxu0 %vm535_vm1, %v39_v49  ;;  %7457 = vmatprep.mubr.msk.f32.mxu1 %vm535_vm1, %v71_v50 }
  0x35   :  { %7264 = vmatmul.mubr.msk.f32.gmra.mrb[24].mxu0 %vm535_vm1, %v40_v51  ;;  %7458 = vmatmul.mubr.msk.f32.gmra.mrb[24].mxu1 %vm535_vm1, %v72_v52 }
  0x36   :  { %7266 = vmatprep.mubr.msk.f32.mxu0 %vm535_vm1, %v41_v53  ;;  %7460 = vmatprep.mubr.msk.f32.mxu1 %vm535_vm1, %v73_v54 }
  0x39   :  { %7267 = vmatmul.mubr.msk.f32.gmra.mrb[26].mxu0 %vm535_vm1, %v42_v55  ;;  %7461 = vmatmul.mubr.msk.f32.gmra.mrb[26].mxu1 %vm535_vm1, %v74_v56 }
  0x3a   :  { %7269 = vmatprep.mubr.msk.f32.mxu0 %vm535_vm1, %v43_v57  ;;  %7463 = vmatprep.mubr.msk.f32.mxu1 %vm535_vm1, %v75_v58 }
  0x3d   :  { %7270 = vmatmul.mubr.msk.f32.gmra.mrb[28].mxu0 %vm535_vm1, %v44_v59  ;;  %7464 = vmatmul.mubr.msk.f32.gmra.mrb[28].mxu1 %vm535_vm1, %v76_v60 }
  0x3e   :  { %7272 = vmatprep.mubr.msk.f32.mxu0 %vm535_vm1, %v45_v61  ;;  %7466 = vmatprep.mubr.msk.f32.mxu1 %vm535_vm1, %v77_v62 }
  0x41   :  { %7273 = vmatmul.mubr.msk.f32.gmra.mrb[30].mxu0 %vm535_vm1, %v46_v63  ;;  %7467 = vmatmul.mubr.msk.f32.gmra.mrb[30].mxu1 %vm535_vm1, %v78_v0 }
  0x42   :  { %8 = vsyncpa [#allocation3], 0  ;;  %7275 = vmatprep.mubr.msk.f32.mxu0 %vm535_vm1, %v143_v1  ;;  %7469 = vmatprep.mubr.msk.f32.mxu1 %vm535_vm1, %v175_v2  ;;  %v144_v3 = vld [vmem:[%s11053_s0 + $0x408] sm:$0xff]  ;;  %v145_v5 = vld [vmem:[%s11053_s0 + $0x410] sm:$0xff] }
  0x43   :  { %v176_v4 = vld [vmem:[%s11053_s0 + $0x508] sm:$0xff]  ;;  %v177_v6 = vld [vmem:[%s11053_s0 + $0x510] sm:$0xff]  ;;  %v146_v7 = vld [vmem:[%s11053_s0 + $0x418] sm:$0xff] }
  0x44   :  { %v178_v8 = vld [vmem:[%s11053_s0 + $0x518] sm:$0xff]  ;;  %v147_v9 = vld [vmem:[%s11053_s0 + $0x420] sm:$0xff]  ;;  %v148_v11 = vld [vmem:[%s11053_s0 + $0x428] sm:$0xff] }
  0x45   :  { %7276 = vmatmul.mubr.msk.f32.gmra.mrb[32].mxu0 %vm535_vm1, %v144_v3  ;;  %7470 = vmatmul.mubr.msk.f32.gmra.mrb[32].mxu1 %vm535_vm1, %v176_v4  ;;  %v179_v10 = vld [vmem:[%s11053_s0 + $0x520] sm:$0xff]  ;;  %v180_v12 = vld [vmem:[%s11053_s0 + $0x528] sm:$0xff]  ;;  %v149_v13 = vld [vmem:[%s11053_s0 + $0x430] sm:$0xff] }
  0x46   :  { %7278 = vmatprep.mubr.msk.f32.mxu0 %vm535_vm1, %v145_v5  ;;  %7472 = vmatprep.mubr.msk.f32.mxu1 %vm535_vm1, %v177_v6  ;;  %v181_v14 = vld [vmem:[%s11053_s0 + $0x530] sm:$0xff]  ;;  %v150_v15 = vld [vmem:[%s11053_s0 + $0x438] sm:$0xff]  ;;  %v151_v17 = vld [vmem:[%s11053_s0 + $0x440] sm:$0xff] }
  0x47   :  { %v182_v16 = vld [vmem:[%s11053_s0 + $0x538] sm:$0xff]  ;;  %v183_v18 = vld [vmem:[%s11053_s0 + $0x540] sm:$0xff]  ;;  %v152_v19 = vld [vmem:[%s11053_s0 + $0x448] sm:$0xff] }
  0x48   :  { %v184_v20 = vld [vmem:[%s11053_s0 + $0x548] sm:$0xff]  ;;  %v153_v21 = vld [vmem:[%s11053_s0 + $0x450] sm:$0xff]  ;;  %v154_v23 = vld [vmem:[%s11053_s0 + $0x458] sm:$0xff] }
  0x49   :  { %7279 = vmatmul.mubr.msk.f32.gmra.mrb[34].mxu0 %vm535_vm1, %v146_v7  ;;  %7473 = vmatmul.mubr.msk.f32.gmra.mrb[34].mxu1 %vm535_vm1, %v178_v8  ;;  %v185_v22 = vld [vmem:[%s11053_s0 + $0x550] sm:$0xff]  ;;  %v186_v24 = vld [vmem:[%s11053_s0 + $0x558] sm:$0xff]  ;;  %v155_v25 = vld [vmem:[%s11053_s0 + $0x460] sm:$0xff] }
  0x4a   :  { %7281 = vmatprep.mubr.msk.f32.mxu0 %vm535_vm1, %v147_v9  ;;  %7475 = vmatprep.mubr.msk.f32.mxu1 %vm535_vm1, %v179_v10  ;;  %v187_v26 = vld [vmem:[%s11053_s0 + $0x560] sm:$0xff]  ;;  %v156_v27 = vld [vmem:[%s11053_s0 + $0x468] sm:$0xff]  ;;  %v157_v29 = vld [vmem:[%s11053_s0 + $0x470] sm:$0xff] }
  0x4b   :  { %v188_v28 = vld [vmem:[%s11053_s0 + $0x568] sm:$0xff]  ;;  %v189_v30 = vld [vmem:[%s11053_s0 + $0x570] sm:$0xff]  ;;  %v158_v31 = vld [vmem:[%s11053_s0 + $0x478] sm:$0xff] }
  0x4c   :  { %v190_v32 = vld [vmem:[%s11053_s0 + $0x578] sm:$0xff]  ;;  %v159_v33 = vld [vmem:[%s11053_s0 + $0x480] sm:$0xff]  ;;  %v160_v35 = vld [vmem:[%s11053_s0 + $0x488] sm:$0xff] }
  0x4d   :  { %7282 = vmatmul.mubr.msk.f32.gmra.mrb[36].mxu0 %vm535_vm1, %v148_v11  ;;  %7476 = vmatmul.mubr.msk.f32.gmra.mrb[36].mxu1 %vm535_vm1, %v180_v12  ;;  %v191_v34 = vld [vmem:[%s11053_s0 + $0x580] sm:$0xff]  ;;  %v192_v36 = vld [vmem:[%s11053_s0 + $0x588] sm:$0xff]  ;;  %v161_v37 = vld [vmem:[%s11053_s0 + $0x490] sm:$0xff] }
  0x4e   :  { %7284 = vmatprep.mubr.msk.f32.mxu0 %vm535_vm1, %v149_v13  ;;  %7478 = vmatprep.mubr.msk.f32.mxu1 %vm535_vm1, %v181_v14  ;;  %v193_v38 = vld [vmem:[%s11053_s0 + $0x590] sm:$0xff]  ;;  %v162_v39 = vld [vmem:[%s11053_s0 + $0x498] sm:$0xff]  ;;  %v163_v41 = vld [vmem:[%s11053_s0 + $0x4a0] sm:$0xff] }
  0x4f   :  { %v194_v40 = vld [vmem:[%s11053_s0 + $0x598] sm:$0xff]  ;;  %v195_v42 = vld [vmem:[%s11053_s0 + $0x5a0] sm:$0xff]  ;;  %v164_v43 = vld [vmem:[%s11053_s0 + $0x4a8] sm:$0xff] }
  0x50   :  { %v196_v44 = vld [vmem:[%s11053_s0 + $0x5a8] sm:$0xff]  ;;  %v165_v45 = vld [vmem:[%s11053_s0 + $0x4b0] sm:$0xff]  ;;  %v166_v47 = vld [vmem:[%s11053_s0 + $0x4b8] sm:$0xff] }
  0x51   :  { %7285 = vmatmul.mubr.msk.f32.gmra.mrb[38].mxu0 %vm535_vm1, %v150_v15  ;;  %7479 = vmatmul.mubr.msk.f32.gmra.mrb[38].mxu1 %vm535_vm1, %v182_v16  ;;  %v197_v46 = vld [vmem:[%s11053_s0 + $0x5b0] sm:$0xff]  ;;  %v198_v48 = vld [vmem:[%s11053_s0 + $0x5b8] sm:$0xff]  ;;  %v167_v49 = vld [vmem:[%s11053_s0 + $0x4c0] sm:$0xff] }
  0x52   :  { %7287 = vmatprep.mubr.msk.f32.mxu0 %vm535_vm1, %v151_v17  ;;  %7481 = vmatprep.mubr.msk.f32.mxu1 %vm535_vm1, %v183_v18  ;;  %v199_v50 = vld [vmem:[%s11053_s0 + $0x5c0] sm:$0xff]  ;;  %v168_v51 = vld [vmem:[%s11053_s0 + $0x4c8] sm:$0xff]  ;;  %v169_v53 = vld [vmem:[%s11053_s0 + $0x4d0] sm:$0xff] }
  0x53   :  { %v200_v52 = vld [vmem:[%s11053_s0 + $0x5c8] sm:$0xff]  ;;  %v201_v54 = vld [vmem:[%s11053_s0 + $0x5d0] sm:$0xff]  ;;  %v170_v55 = vld [vmem:[%s11053_s0 + $0x4d8] sm:$0xff] }
  0x54   :  { %v202_v56 = vld [vmem:[%s11053_s0 + $0x5d8] sm:$0xff]  ;;  %v171_v57 = vld [vmem:[%s11053_s0 + $0x4e0] sm:$0xff]  ;;  %v172_v59 = vld [vmem:[%s11053_s0 + $0x4e8] sm:$0xff] }
  0x55   :  { %7288 = vmatmul.mubr.msk.f32.gmra.mrb[40].mxu0 %vm535_vm1, %v152_v19  ;;  %7482 = vmatmul.mubr.msk.f32.gmra.mrb[40].mxu1 %vm535_vm1, %v184_v20  ;;  %v203_v58 = vld [vmem:[%s11053_s0 + $0x5e0] sm:$0xff]  ;;  %v204_v60 = vld [vmem:[%s11053_s0 + $0x5e8] sm:$0xff]  ;;  %v173_v61 = vld [vmem:[%s11053_s0 + $0x4f0] sm:$0xff] }
  0x56   :  { %7290 = vmatprep.mubr.msk.f32.mxu0 %vm535_vm1, %v153_v21  ;;  %7484 = vmatprep.mubr.msk.f32.mxu1 %vm535_vm1, %v185_v22  ;;  %v205_v62 = vld [vmem:[%s11053_s0 + $0x5f0] sm:$0xff]  ;;  %v174_v63 = vld [vmem:[%s11053_s0 + $0x4f8] sm:$0xff]  ;;  %v271_v1 = vld [vmem:[%s11053_s0 + $0x800] sm:$0xff] }
  0x57   :  { %v206_v0 = vld [vmem:[%s11053_s0 + $0x5f8] sm:$0xff]  ;;  %v303_v2 = vld [vmem:[%s11053_s0 + $0x900] sm:$0xff]  ;;  %v272_v3 = vld [vmem:[%s11053_s0 + $0x808] sm:$0xff] }
  0x58   :  { %v304_v4 = vld [vmem:[%s11053_s0 + $0x908] sm:$0xff]  ;;  %v273_v5 = vld [vmem:[%s11053_s0 + $0x810] sm:$0xff]  ;;  %v274_v7 = vld [vmem:[%s11053_s0 + $0x818] sm:$0xff] }
  0x59   :  { %7291 = vmatmul.mubr.msk.f32.gmra.mrb[42].mxu0 %vm535_vm1, %v154_v23  ;;  %7485 = vmatmul.mubr.msk.f32.gmra.mrb[42].mxu1 %vm535_vm1, %v186_v24  ;;  %v305_v6 = vld [vmem:[%s11053_s0 + $0x910] sm:$0xff]  ;;  %v306_v8 = vld [vmem:[%s11053_s0 + $0x918] sm:$0xff]  ;;  %v275_v9 = vld [vmem:[%s11053_s0 + $0x820] sm:$0xff] }
  0x5a   :  { %7293 = vmatprep.mubr.msk.f32.mxu0 %vm535_vm1, %v155_v25  ;;  %7487 = vmatprep.mubr.msk.f32.mxu1 %vm535_vm1, %v187_v26  ;;  %v307_v10 = vld [vmem:[%s11053_s0 + $0x920] sm:$0xff]  ;;  %v276_v11 = vld [vmem:[%s11053_s0 + $0x828] sm:$0xff]  ;;  %v277_v13 = vld [vmem:[%s11053_s0 + $0x830] sm:$0xff] }
  0x5b   :  { %v308_v12 = vld [vmem:[%s11053_s0 + $0x928] sm:$0xff]  ;;  %v309_v14 = vld [vmem:[%s11053_s0 + $0x930] sm:$0xff]  ;;  %v278_v15 = vld [vmem:[%s11053_s0 + $0x838] sm:$0xff] }
  0x5c   :  { %v310_v16 = vld [vmem:[%s11053_s0 + $0x938] sm:$0xff]  ;;  %v279_v17 = vld [vmem:[%s11053_s0 + $0x840] sm:$0xff]  ;;  %v280_v19 = vld [vmem:[%s11053_s0 + $0x848] sm:$0xff] }
  0x5d   :  { %7294 = vmatmul.mubr.msk.f32.gmra.mrb[44].mxu0 %vm535_vm1, %v156_v27  ;;  %7488 = vmatmul.mubr.msk.f32.gmra.mrb[44].mxu1 %vm535_vm1, %v188_v28  ;;  %v311_v18 = vld [vmem:[%s11053_s0 + $0x940] sm:$0xff]  ;;  %v312_v20 = vld [vmem:[%s11053_s0 + $0x948] sm:$0xff]  ;;  %v281_v21 = vld [vmem:[%s11053_s0 + $0x850] sm:$0xff] }
  0x5e   :  { %7296 = vmatprep.mubr.msk.f32.mxu0 %vm535_vm1, %v157_v29  ;;  %7490 = vmatprep.mubr.msk.f32.mxu1 %vm535_vm1, %v189_v30  ;;  %v313_v22 = vld [vmem:[%s11053_s0 + $0x950] sm:$0xff]  ;;  %v282_v23 = vld [vmem:[%s11053_s0 + $0x858] sm:$0xff]  ;;  %v283_v25 = vld [vmem:[%s11053_s0 + $0x860] sm:$0xff] }
  0x5f   :  { %v314_v24 = vld [vmem:[%s11053_s0 + $0x958] sm:$0xff]  ;;  %v315_v26 = vld [vmem:[%s11053_s0 + $0x960] sm:$0xff]  ;;  %v284_v27 = vld [vmem:[%s11053_s0 + $0x868] sm:$0xff] }
  0x60   :  { %v316_v28 = vld [vmem:[%s11053_s0 + $0x968] sm:$0xff]  ;;  %v285_v29 = vld [vmem:[%s11053_s0 + $0x870] sm:$0xff] }
  0x61   :  { %7297 = vmatmul.mubr.msk.f32.gmra.mrb[46].mxu0 %vm535_vm1, %v158_v31  ;;  %7491 = vmatmul.mubr.msk.f32.gmra.mrb[46].mxu1 %vm535_vm1, %v190_v32  ;;  %v317_v30 = vld [vmem:[%s11053_s0 + $0x970] sm:$0xff]  ;;  %v286_v31 = vld [vmem:[%s11053_s0 + $0x878] sm:$0xff] }
  0x62   :  { %7299 = vmatprep.mubr.msk.f32.mxu0 %vm535_vm1, %v159_v33  ;;  %7493 = vmatprep.mubr.msk.f32.mxu1 %vm535_vm1, %v191_v34  ;;  %v318_v32 = vld [vmem:[%s11053_s0 + $0x978] sm:$0xff]  ;;  %v287_v33 = vld [vmem:[%s11053_s0 + $0x880] sm:$0xff] }
  0x63   :  { %v319_v34 = vld [vmem:[%s11053_s0 + $0x980] sm:$0xff] }
  0x65   :  { %7300 = vmatmul.mubr.msk.f32.gmra.mrb[48].mxu0 %vm535_vm1, %v160_v35  ;;  %7494 = vmatmul.mubr.msk.f32.gmra.mrb[48].mxu1 %vm535_vm1, %v192_v36  ;;  %v288_v35 = vld [vmem:[%s11053_s0 + $0x888] sm:$0xff] }
  0x66   :  { %7302 = vmatprep.mubr.msk.f32.mxu0 %vm535_vm1, %v161_v37  ;;  %7496 = vmatprep.mubr.msk.f32.mxu1 %vm535_vm1, %v193_v38  ;;  %v320_v36 = vld [vmem:[%s11053_s0 + $0x988] sm:$0xff]  ;;  %v289_v37 = vld [vmem:[%s11053_s0 + $0x890] sm:$0xff] }
  0x67   :  { %v321_v38 = vld [vmem:[%s11053_s0 + $0x990] sm:$0xff] }
  0x69   :  { %7303 = vmatmul.mubr.msk.f32.gmra.mrb[50].mxu0 %vm535_vm1, %v162_v39  ;;  %7497 = vmatmul.mubr.msk.f32.gmra.mrb[50].mxu1 %vm535_vm1, %v194_v40  ;;  %v290_v39 = vld [vmem:[%s11053_s0 + $0x898] sm:$0xff] }
  0x6a   :  { %7305 = vmatprep.mubr.msk.f32.mxu0 %vm535_vm1, %v163_v41  ;;  %7499 = vmatprep.mubr.msk.f32.mxu1 %vm535_vm1, %v195_v42  ;;  %v322_v40 = vld [vmem:[%s11053_s0 + $0x998] sm:$0xff]  ;;  %v291_v41 = vld [vmem:[%s11053_s0 + $0x8a0] sm:$0xff] }
  0x6b   :  { %v323_v42 = vld [vmem:[%s11053_s0 + $0x9a0] sm:$0xff] }
  0x6d   :  { %7306 = vmatmul.mubr.msk.f32.gmra.mrb[52].mxu0 %vm535_vm1, %v164_v43  ;;  %7500 = vmatmul.mubr.msk.f32.gmra.mrb[52].mxu1 %vm535_vm1, %v196_v44  ;;  %v292_v43 = vld [vmem:[%s11053_s0 + $0x8a8] sm:$0xff] }
  0x6e   :  { %7308 = vmatprep.mubr.msk.f32.mxu0 %vm535_vm1, %v165_v45  ;;  %7502 = vmatprep.mubr.msk.f32.mxu1 %vm535_vm1, %v197_v46  ;;  %v324_v44 = vld [vmem:[%s11053_s0 + $0x9a8] sm:$0xff]  ;;  %v293_v45 = vld [vmem:[%s11053_s0 + $0x8b0] sm:$0xff] }
  0x6f   :  { %v325_v46 = vld [vmem:[%s11053_s0 + $0x9b0] sm:$0xff] }
  0x71   :  { %7309 = vmatmul.mubr.msk.f32.gmra.mrb[54].mxu0 %vm535_vm1, %v166_v47  ;;  %7503 = vmatmul.mubr.msk.f32.gmra.mrb[54].mxu1 %vm535_vm1, %v198_v48  ;;  %v294_v47 = vld [vmem:[%s11053_s0 + $0x8b8] sm:$0xff] }
  0x72   :  { %7311 = vmatprep.mubr.msk.f32.mxu0 %vm535_vm1, %v167_v49  ;;  %7505 = vmatprep.mubr.msk.f32.mxu1 %vm535_vm1, %v199_v50  ;;  %v326_v48 = vld [vmem:[%s11053_s0 + $0x9b8] sm:$0xff]  ;;  %v295_v49 = vld [vmem:[%s11053_s0 + $0x8c0] sm:$0xff] }
  0x73   :  { %v327_v50 = vld [vmem:[%s11053_s0 + $0x9c0] sm:$0xff] }
  0x75   :  { %7312 = vmatmul.mubr.msk.f32.gmra.mrb[56].mxu0 %vm535_vm1, %v168_v51  ;;  %7506 = vmatmul.mubr.msk.f32.gmra.mrb[56].mxu1 %vm535_vm1, %v200_v52  ;;  %v296_v51 = vld [vmem:[%s11053_s0 + $0x8c8] sm:$0xff] }
  0x76   :  { %7314 = vmatprep.mubr.msk.f32.mxu0 %vm535_vm1, %v169_v53  ;;  %7508 = vmatprep.mubr.msk.f32.mxu1 %vm535_vm1, %v201_v54  ;;  %v328_v52 = vld [vmem:[%s11053_s0 + $0x9c8] sm:$0xff]  ;;  %v297_v53 = vld [vmem:[%s11053_s0 + $0x8d0] sm:$0xff] }
  0x77   :  { %v329_v54 = vld [vmem:[%s11053_s0 + $0x9d0] sm:$0xff] }
  0x79   :  { %7315 = vmatmul.mubr.msk.f32.gmra.mrb[58].mxu0 %vm535_vm1, %v170_v55  ;;  %7509 = vmatmul.mubr.msk.f32.gmra.mrb[58].mxu1 %vm535_vm1, %v202_v56  ;;  %v298_v55 = vld [vmem:[%s11053_s0 + $0x8d8] sm:$0xff] }
  0x7a   :  { %7317 = vmatprep.mubr.msk.f32.mxu0 %vm535_vm1, %v171_v57  ;;  %7511 = vmatprep.mubr.msk.f32.mxu1 %vm535_vm1, %v203_v58  ;;  %v330_v56 = vld [vmem:[%s11053_s0 + $0x9d8] sm:$0xff]  ;;  %v299_v57 = vld [vmem:[%s11053_s0 + $0x8e0] sm:$0xff] }
  0x7b   :  { %v331_v58 = vld [vmem:[%s11053_s0 + $0x9e0] sm:$0xff] }
  0x7d   :  { %7318 = vmatmul.mubr.msk.f32.gmra.mrb[60].mxu0 %vm535_vm1, %v172_v59  ;;  %7512 = vmatmul.mubr.msk.f32.gmra.mrb[60].mxu1 %vm535_vm1, %v204_v60  ;;  %v300_v59 = vld [vmem:[%s11053_s0 + $0x8e8] sm:$0xff] }
  0x7e   :  { %7320 = vmatprep.mubr.msk.f32.mxu0 %vm535_vm1, %v173_v61  ;;  %7514 = vmatprep.mubr.msk.f32.mxu1 %vm535_vm1, %v205_v62  ;;  %v332_v60 = vld [vmem:[%s11053_s0 + $0x9e8] sm:$0xff]  ;;  %v301_v61 = vld [vmem:[%s11053_s0 + $0x8f0] sm:$0xff] }
  0x7f   :  { %v333_v62 = vld [vmem:[%s11053_s0 + $0x9f0] sm:$0xff] }
  0x81   :  { %7321 = vmatmul.mubr.msk.f32.gmra.mrb[62].mxu0 %vm535_vm1, %v174_v63  ;;  %7515 = vmatmul.mubr.msk.f32.gmra.mrb[62].mxu1 %vm535_vm1, %v206_v0  ;;  %v302_v63 = vld [vmem:[%s11053_s0 + $0x8f8] sm:$0xff] }
  0x82   :  { %7323 = vmatprep.mubr.msk.f32.mxu0 %vm535_vm1, %v271_v1  ;;  %7517 = vmatprep.mubr.msk.f32.mxu1 %vm535_vm1, %v303_v2  ;;  %v334_v0 = vld [vmem:[%s11053_s0 + $0x9f8] sm:$0xff]  ;;  %v399_v1 = vld [vmem:[%s11053_s0 + $0xc00] sm:$0xff] }
  0x83   :  { %v431_v2 = vld [vmem:[%s11053_s0 + $0xd00] sm:$0xff] }
  0x85   :  { %7324 = vmatmul.mubr.msk.f32.gmra.mrb[64].mxu0 %vm535_vm1, %v272_v3  ;;  %7518 = vmatmul.mubr.msk.f32.gmra.mrb[64].mxu1 %vm535_vm1, %v304_v4  ;;  %v400_v3 = vld [vmem:[%s11053_s0 + $0xc08] sm:$0xff] }
  0x86   :  { %7326 = vmatprep.mubr.msk.f32.mxu0 %vm535_vm1, %v273_v5  ;;  %7520 = vmatprep.mubr.msk.f32.mxu1 %vm535_vm1, %v305_v6  ;;  %v432_v4 = vld [vmem:[%s11053_s0 + $0xd08] sm:$0xff]  ;;  %v401_v5 = vld [vmem:[%s11053_s0 + $0xc10] sm:$0xff] }
  0x87   :  { %v433_v6 = vld [vmem:[%s11053_s0 + $0xd10] sm:$0xff] }
  0x89   :  { %7327 = vmatmul.mubr.msk.f32.gmra.mrb[66].mxu0 %vm535_vm1, %v274_v7  ;;  %7521 = vmatmul.mubr.msk.f32.gmra.mrb[66].mxu1 %vm535_vm1, %v306_v8  ;;  %v402_v7 = vld [vmem:[%s11053_s0 + $0xc18] sm:$0xff] }
  0x8a   :  { %7329 = vmatprep.mubr.msk.f32.mxu0 %vm535_vm1, %v275_v9  ;;  %7523 = vmatprep.mubr.msk.f32.mxu1 %vm535_vm1, %v307_v10  ;;  %v434_v8 = vld [vmem:[%s11053_s0 + $0xd18] sm:$0xff]  ;;  %v403_v9 = vld [vmem:[%s11053_s0 + $0xc20] sm:$0xff] }
  0x8b   :  { %v435_v10 = vld [vmem:[%s11053_s0 + $0xd20] sm:$0xff] }
  0x8d   :  { %7330 = vmatmul.mubr.msk.f32.gmra.mrb[68].mxu0 %vm535_vm1, %v276_v11  ;;  %7524 = vmatmul.mubr.msk.f32.gmra.mrb[68].mxu1 %vm535_vm1, %v308_v12  ;;  %v404_v11 = vld [vmem:[%s11053_s0 + $0xc28] sm:$0xff] }
  0x8e   :  { %7332 = vmatprep.mubr.msk.f32.mxu0 %vm535_vm1, %v277_v13  ;;  %7526 = vmatprep.mubr.msk.f32.mxu1 %vm535_vm1, %v309_v14  ;;  %v436_v12 = vld [vmem:[%s11053_s0 + $0xd28] sm:$0xff]  ;;  %v405_v13 = vld [vmem:[%s11053_s0 + $0xc30] sm:$0xff] }
  0x8f   :  { %v437_v14 = vld [vmem:[%s11053_s0 + $0xd30] sm:$0xff] }
  0x91   :  { %7333 = vmatmul.mubr.msk.f32.gmra.mrb[70].mxu0 %vm535_vm1, %v278_v15  ;;  %7527 = vmatmul.mubr.msk.f32.gmra.mrb[70].mxu1 %vm535_vm1, %v310_v16  ;;  %v406_v15 = vld [vmem:[%s11053_s0 + $0xc38] sm:$0xff] }
  0x92   :  { %7335 = vmatprep.mubr.msk.f32.mxu0 %vm535_vm1, %v279_v17  ;;  %7529 = vmatprep.mubr.msk.f32.mxu1 %vm535_vm1, %v311_v18  ;;  %v438_v16 = vld [vmem:[%s11053_s0 + $0xd38] sm:$0xff]  ;;  %v407_v17 = vld [vmem:[%s11053_s0 + $0xc40] sm:$0xff] }
  0x93   :  { %v439_v18 = vld [vmem:[%s11053_s0 + $0xd40] sm:$0xff] }
  0x95   :  { %7336 = vmatmul.mubr.msk.f32.gmra.mrb[72].mxu0 %vm535_vm1, %v280_v19  ;;  %7530 = vmatmul.mubr.msk.f32.gmra.mrb[72].mxu1 %vm535_vm1, %v312_v20  ;;  %v408_v19 = vld [vmem:[%s11053_s0 + $0xc48] sm:$0xff] }
  0x96   :  { %7338 = vmatprep.mubr.msk.f32.mxu0 %vm535_vm1, %v281_v21  ;;  %7532 = vmatprep.mubr.msk.f32.mxu1 %vm535_vm1, %v313_v22  ;;  %v440_v20 = vld [vmem:[%s11053_s0 + $0xd48] sm:$0xff]  ;;  %v409_v21 = vld [vmem:[%s11053_s0 + $0xc50] sm:$0xff] }
  0x97   :  { %v441_v22 = vld [vmem:[%s11053_s0 + $0xd50] sm:$0xff] }
  0x99   :  { %7339 = vmatmul.mubr.msk.f32.gmra.mrb[74].mxu0 %vm535_vm1, %v282_v23  ;;  %7533 = vmatmul.mubr.msk.f32.gmra.mrb[74].mxu1 %vm535_vm1, %v314_v24  ;;  %v8924_v23 = vld [vmem:[%s11055_s2] ss:$0 sm:$0xff]  ;;  %v410_v24 = vld [vmem:[%s11053_s0 + $0xc58] sm:$0xff] }
  0x9a   :  { %7341 = vmatprep.mubr.msk.f32.mxu0 %vm535_vm1, %v283_v25  ;;  %7535 = vmatprep.mubr.msk.f32.mxu1 %vm535_vm1, %v315_v26  ;;  %v442_v25 = vld [vmem:[%s11053_s0 + $0xd58] sm:$0xff]  ;;  %v411_v26 = vld [vmem:[%s11053_s0 + $0xc60] sm:$0xff] }
  0x9d   :  { %7342 = vmatmul.mubr.msk.f32.gmra.mrb[76].mxu0 %vm535_vm1, %v284_v27  ;;  %7536 = vmatmul.mubr.msk.f32.gmra.mrb[76].mxu1 %vm535_vm1, %v316_v28  ;;  %v443_v27 = vld [vmem:[%s11053_s0 + $0xd60] sm:$0xff] }
  0x9e   :  { %7344 = vmatprep.mubr.msk.f32.mxu0 %vm535_vm1, %v285_v29  ;;  %7538 = vmatprep.mubr.msk.f32.mxu1 %vm535_vm1, %v317_v30 }
  0xa1   :  { %7345 = vmatmul.mubr.msk.f32.gmra.mrb[78].mxu0 %vm535_vm1, %v286_v31  ;;  %7539 = vmatmul.mubr.msk.f32.gmra.mrb[78].mxu1 %vm535_vm1, %v318_v32 }
  0xa2   :  { %7347 = vmatprep.mubr.msk.f32.mxu0 %vm535_vm1, %v287_v33  ;;  %7541 = vmatprep.mubr.msk.f32.mxu1 %vm535_vm1, %v319_v34 }
  0xa5   :  { %7348 = vmatmul.mubr.msk.f32.gmra.mrb[80].mxu0 %vm535_vm1, %v288_v35  ;;  %7542 = vmatmul.mubr.msk.f32.gmra.mrb[80].mxu1 %vm535_vm1, %v320_v36  ;;  %v412_v36 = vld [vmem:[%s11053_s0 + $0xc68] sm:$0xff] }
  0xa6   :  { %7350 = vmatprep.mubr.msk.f32.mxu0 %vm535_vm1, %v289_v37  ;;  %7544 = vmatprep.mubr.msk.f32.mxu1 %vm535_vm1, %v321_v38  ;;  %v444_v37 = vld [vmem:[%s11053_s0 + $0xd68] sm:$0xff] }
  0xa9   :  { %7351 = vmatmul.mubr.msk.f32.gmra.mrb[82].mxu0 %vm535_vm1, %v290_v39  ;;  %7545 = vmatmul.mubr.msk.f32.gmra.mrb[82].mxu1 %vm535_vm1, %v322_v40  ;;  %v413_v40 = vld [vmem:[%s11053_s0 + $0xc70] sm:$0xff] }
  0xaa   :  { %7353 = vmatprep.mubr.msk.f32.mxu0 %vm535_vm1, %v291_v41  ;;  %7547 = vmatprep.mubr.msk.f32.mxu1 %vm535_vm1, %v323_v42  ;;  %v445_v41 = vld [vmem:[%s11053_s0 + $0xd70] sm:$0xff] }
  0xad   :  { %7354 = vmatmul.mubr.msk.f32.gmra.mrb[84].mxu0 %vm535_vm1, %v292_v43  ;;  %7548 = vmatmul.mubr.msk.f32.gmra.mrb[84].mxu1 %vm535_vm1, %v324_v44 }
  0xae   :  { %7356 = vmatprep.mubr.msk.f32.mxu0 %vm535_vm1, %v293_v45  ;;  %7550 = vmatprep.mubr.msk.f32.mxu1 %vm535_vm1, %v325_v46 }
  0xb1   :  { %7357 = vmatmul.mubr.msk.f32.gmra.mrb[86].mxu0 %vm535_vm1, %v294_v47  ;;  %7551 = vmatmul.mubr.msk.f32.gmra.mrb[86].mxu1 %vm535_vm1, %v326_v48 }
  0xb2   :  { %7359 = vmatprep.mubr.msk.f32.mxu0 %vm535_vm1, %v295_v49  ;;  %7553 = vmatprep.mubr.msk.f32.mxu1 %vm535_vm1, %v327_v50 }
  0xb5   :  { %7360 = vmatmul.mubr.msk.f32.gmra.mrb[88].mxu0 %vm535_vm1, %v296_v51  ;;  %7554 = vmatmul.mubr.msk.f32.gmra.mrb[88].mxu1 %vm535_vm1, %v328_v52 }
  0xb6   :  { %7362 = vmatprep.mubr.msk.f32.mxu0 %vm535_vm1, %v297_v53  ;;  %7556 = vmatprep.mubr.msk.f32.mxu1 %vm535_vm1, %v329_v54  ;;  %v414_v54 = vld [vmem:[%s11053_s0 + $0xc78] sm:$0xff] }
  0xb9   :  { %7363 = vmatmul.mubr.msk.f32.gmra.mrb[90].mxu0 %vm535_vm1, %v298_v55  ;;  %7557 = vmatmul.mubr.msk.f32.gmra.mrb[90].mxu1 %vm535_vm1, %v330_v56  ;;  %v446_v55 = vld [vmem:[%s11053_s0 + $0xd78] sm:$0xff] }
  0xba   :  { %7365 = vmatprep.mubr.msk.f32.mxu0 %vm535_vm1, %v299_v57  ;;  %7559 = vmatprep.mubr.msk.f32.mxu1 %vm535_vm1, %v331_v58  ;;  %v415_v58 = vld [vmem:[%s11053_s0 + $0xc80] sm:$0xff] }
  0xbd   :  { %7366 = vmatmul.mubr.msk.f32.gmra.mrb[92].mxu0 %vm535_vm1, %v300_v59  ;;  %7560 = vmatmul.mubr.msk.f32.gmra.mrb[92].mxu1 %vm535_vm1, %v332_v60  ;;  %v447_v59 = vld [vmem:[%s11053_s0 + $0xd80] sm:$0xff] }
  0xbe   :  { %7368 = vmatprep.mubr.msk.f32.mxu0 %vm535_vm1, %v301_v61  ;;  %7562 = vmatprep.mubr.msk.f32.mxu1 %vm535_vm1, %v333_v62 }
  0xc1   :  { %7369 = vmatmul.mubr.msk.f32.gmra.mrb[94].mxu0 %vm535_vm1, %v302_v63  ;;  %7563 = vmatmul.mubr.msk.f32.gmra.mrb[94].mxu1 %vm535_vm1, %v334_v0 }
  0xc2   :  { %7371 = vmatprep.mubr.msk.f32.mxu0 %vm535_vm1, %v399_v1  ;;  %7565 = vmatprep.mubr.msk.f32.mxu1 %vm535_vm1, %v431_v2 }
  0xc5   :  { %7372 = vmatmul.mubr.msk.f32.gmra.mrb[96].mxu0 %vm535_vm1, %v400_v3  ;;  %7566 = vmatmul.mubr.msk.f32.gmra.mrb[96].mxu1 %vm535_vm1, %v432_v4 }
  0xc6   :  { %7374 = vmatprep.mubr.msk.f32.mxu0 %vm535_vm1, %v401_v5  ;;  %7568 = vmatprep.mubr.msk.f32.mxu1 %vm535_vm1, %v433_v6 }
  0xc9   :  { %7375 = vmatmul.mubr.msk.f32.gmra.mrb[98].mxu0 %vm535_vm1, %v402_v7  ;;  %7569 = vmatmul.mubr.msk.f32.gmra.mrb[98].mxu1 %vm535_vm1, %v434_v8  ;;  %v416_v8 = vld [vmem:[%s11053_s0 + $0xc88] sm:$0xff] }
  0xca   :  { %7377 = vmatprep.mubr.msk.f32.mxu0 %vm535_vm1, %v403_v9  ;;  %7571 = vmatprep.mubr.msk.f32.mxu1 %vm535_vm1, %v435_v10  ;;  %v448_v9 = vld [vmem:[%s11053_s0 + $0xd88] sm:$0xff] }
  0xcd   :  { %7378 = vmatmul.mubr.msk.f32.gmra.mrb[100].mxu0 %vm535_vm1, %v404_v11  ;;  %7572 = vmatmul.mubr.msk.f32.gmra.mrb[100].mxu1 %vm535_vm1, %v436_v12  ;;  %v417_v12 = vld [vmem:[%s11053_s0 + $0xc90] sm:$0xff] }
  0xce   :  { %7380 = vmatprep.mubr.msk.f32.mxu0 %vm535_vm1, %v405_v13  ;;  %7574 = vmatprep.mubr.msk.f32.mxu1 %vm535_vm1, %v437_v14  ;;  %v449_v13 = vld [vmem:[%s11053_s0 + $0xd90] sm:$0xff] }
  0xd1   :  { %7381 = vmatmul.mubr.msk.f32.gmra.mrb[102].mxu0 %vm535_vm1, %v406_v15  ;;  %7575 = vmatmul.mubr.msk.f32.gmra.mrb[102].mxu1 %vm535_vm1, %v438_v16 }
  0xd2   :  { %7383 = vmatprep.mubr.msk.f32.mxu0 %vm535_vm1, %v407_v17  ;;  %7577 = vmatprep.mubr.msk.f32.mxu1 %vm535_vm1, %v439_v18 }
  0xd5   :  { %7384 = vmatmul.mubr.msk.f32.gmra.mrb[104].mxu0 %vm535_vm1, %v408_v19  ;;  %7578 = vmatmul.mubr.msk.f32.gmra.mrb[104].mxu1 %vm535_vm1, %v440_v20 }
  0xd6   :  { %7386 = vmatprep.mubr.msk.f32.mxu0 %vm535_vm1, %v409_v21  ;;  %7580 = vmatprep.mubr.msk.f32.mxu1 %vm535_vm1, %v441_v22 }
  0xd8   :  { %v7229_v28 = vpop.f32.mrb[0].mxu0  ;;  %v7423_v29 = vpop.f32.mrb[0].mxu1 }
  0xd9   :  { %v996_v30 = vadd.f32 %v7229_v28, %v8924_v23  ;;  %v2341_v31 = vadd.f32 %v7423_v29, %v8924_v23  ;;  %v990_v32 = vpop.f32.mrb[1].mxu0  ;;  %7387 = vmatmul.mubr.msk.f32.gmra.mrb[106].mxu0 %vm535_vm1, %v410_v24  ;;  %v2335_v33 = vpop.f32.mrb[1].mxu1  ;;  %7581 = vmatmul.mubr.msk.f32.gmra.mrb[106].mxu1 %vm535_vm1, %v442_v25  ;;  %v450_v28 = vld [vmem:[%s11053_s0 + $0xd98] sm:$0xff] }
  0xda   :  { %v991_v34 = vadd.f32 %v8924_v23, %v990_v32  ;;  %v2336_v35 = vadd.f32 %v8924_v23, %v2335_v33  ;;  %7389 = vmatprep.mubr.msk.f32.mxu0 %vm535_vm1, %v411_v26  ;;  %7583 = vmatprep.mubr.msk.f32.mxu1 %vm535_vm1, %v443_v27  ;;  %v418_v27 = vld [vmem:[%s11053_s0 + $0xc98] sm:$0xff]  ;;  %v451_v32 = vld [vmem:[%s11053_s0 + $0xda0] sm:$0xff] }
  0xdb   :  { %v1630_v38 = vmax.f32 %v996_v30, 0.0  ;;  %v2975_v39 = vmax.f32 %v2341_v31, 0.0  ;;  %v419_v31 = vld [vmem:[%s11053_s0 + $0xca0] sm:$0xff] }
  0xdc   :  { %v1629_v42 = vmax.f32 %v991_v34, 0.0  ;;  %v2974_v43 = vmax.f32 %v2336_v35, 0.0  ;;  %v7232_v44 = vpop.f32.mrb[2].mxu0  ;;  %v7426_v45 = vpop.f32.mrb[2].mxu1 }
  0xdd   :  { %v8960_v46 = vadd.f32 %v2975_v39, %v1630_v38  ;;  %v1006_v47 = vadd.f32 %v7232_v44, %v8924_v23  ;;  %v2351_v48 = vadd.f32 %v7426_v45, %v8924_v23  ;;  %v1000_v49 = vpop.f32.mrb[3].mxu0  ;;  %7390 = vmatmul.mubr.msk.f32.gmra.mrb[108].mxu0 %vm535_vm1, %v412_v36  ;;  %v2345_v50 = vpop.f32.mrb[3].mxu1  ;;  %7584 = vmatmul.mubr.msk.f32.gmra.mrb[108].mxu1 %vm535_vm1, %v444_v37  ;;  %v420_v45 = vld [vmem:[%s11053_s0 + $0xca8] sm:$0xff] }
  0xde   :  { %v8966_v51 = vadd.f32 %v2974_v43, %v1629_v42  ;;  %v1001_v52 = vadd.f32 %v8924_v23, %v1000_v49  ;;  %v2346_v53 = vadd.f32 %v8924_v23, %v2345_v50  ;;  %7392 = vmatprep.mubr.msk.f32.mxu0 %vm535_vm1, %v413_v40  ;;  %7586 = vmatprep.mubr.msk.f32.mxu1 %vm535_vm1, %v445_v41  ;;  %v421_v50 = vld [vmem:[%s11053_s0 + $0xcb0] sm:$0xff] }
  0xdf   :  { %v1632_v56 = vmax.f32 %v1006_v47, 0.0  ;;  %v2977_v57 = vmax.f32 %v2351_v48, 0.0  ;;  %v452_v47 = vld [vmem:[%s11053_s0 + $0xda8] sm:$0xff] }
  0xe0   :  { %v1631_v60 = vmax.f32 %v1001_v52, 0.0  ;;  %v2976_v61 = vmax.f32 %v2346_v53, 0.0  ;;  %v7235_v62 = vpop.f32.mrb[4].mxu0  ;;  %v7429_v63 = vpop.f32.mrb[4].mxu1  ;;  %v453_v52 = vld [vmem:[%s11053_s0 + $0xdb0] sm:$0xff] }
  0xe1   :  { %v8984_v0 = vadd.f32 %v2977_v57, %v1632_v56  ;;  %v1016_v1 = vadd.f32 %v7235_v62, %v8924_v23  ;;  %v2361_v2 = vadd.f32 %v7429_v63, %v8924_v23  ;;  %v1010_v3 = vpop.f32.mrb[5].mxu0  ;;  %7393 = vmatmul.mubr.msk.f32.gmra.mrb[110].mxu0 %vm535_vm1, %v414_v54  ;;  %v2355_v4 = vpop.f32.mrb[5].mxu1  ;;  %7587 = vmatmul.mubr.msk.f32.gmra.mrb[110].mxu1 %vm535_vm1, %v446_v55 }
  0xe2   :  { %v8990_v5 = vadd.f32 %v2976_v61, %v1631_v60  ;;  %v1011_v6 = vadd.f32 %v8924_v23, %v1010_v3  ;;  %v2356_v7 = vadd.f32 %v8924_v23, %v2355_v4  ;;  %7395 = vmatprep.mubr.msk.f32.mxu0 %vm535_vm1, %v415_v58  ;;  %7589 = vmatprep.mubr.msk.f32.mxu1 %vm535_vm1, %v447_v59  ;;  %v454_v3 = vld [vmem:[%s11053_s0 + $0xdb8] sm:$0xff] }
  0xe3   :  { %v1634_v10 = vmax.f32 %v1016_v1, 0.0  ;;  %v2979_v11 = vmax.f32 %v2361_v2, 0.0  ;;  %v422_v2 = vld [vmem:[%s11053_s0 + $0xcb8] sm:$0xff] }
  0xe4   :  { %v1633_v14 = vmax.f32 %v1011_v6, 0.0  ;;  %v2978_v15 = vmax.f32 %v2356_v7, 0.0  ;;  %v7238_v16 = vpop.f32.mrb[6].mxu0  ;;  %v7432_v17 = vpop.f32.mrb[6].mxu1  ;;  %v423_v7 = vld [vmem:[%s11053_s0 + $0xcc0] sm:$0xff] }
  0xe5   :  { %v9008_v18 = vadd.f32 %v2979_v11, %v1634_v10  ;;  %v1026_v19 = vadd.f32 %v7238_v16, %v8924_v23  ;;  %v2371_v20 = vadd.f32 %v7432_v17, %v8924_v23  ;;  %v1020_v21 = vpop.f32.mrb[7].mxu0  ;;  %7396 = vmatmul.mubr.msk.f32.gmra.mrb[112].mxu0 %vm535_vm1, %v416_v8  ;;  %v2365_v22 = vpop.f32.mrb[7].mxu1  ;;  %7590 = vmatmul.mubr.msk.f32.gmra.mrb[112].mxu1 %vm535_vm1, %v448_v9  ;;  %v455_v8 = vld [vmem:[%s11053_s0 + $0xdc0] sm:$0xff] }
  0xe6   :  { %v9014_v24 = vadd.f32 %v2978_v15, %v1633_v14  ;;  %v1021_v25 = vadd.f32 %v8924_v23, %v1020_v21  ;;  %v2366_v26 = vadd.f32 %v8924_v23, %v2365_v22  ;;  %7398 = vmatprep.mubr.msk.f32.mxu0 %vm535_vm1, %v417_v12  ;;  %7592 = vmatprep.mubr.msk.f32.mxu1 %vm535_vm1, %v449_v13  ;;  %v424_v22 = vld [vmem:[%s11053_s0 + $0xcc8] sm:$0xff] }
  0xe7   :  { %v1636_v29 = vmax.f32 %v1026_v19, 0.0  ;;  %v2981_v30 = vmax.f32 %v2371_v20, 0.0 }
  0xe8   :  { %v1635_v33 = vmax.f32 %v1021_v25, 0.0  ;;  %v2980_v34 = vmax.f32 %v2366_v26, 0.0  ;;  %v7241_v35 = vpop.f32.mrb[8].mxu0  ;;  %v7435_v36 = vpop.f32.mrb[8].mxu1  ;;  %v456_v25 = vld [vmem:[%s11053_s0 + $0xdc8] sm:$0xff] }
  0xe9   :  { %v9032_v37 = vadd.f32 %v2981_v30, %v1636_v29  ;;  %v1036_v38 = vadd.f32 %v7241_v35, %v8924_v23  ;;  %v2381_v39 = vadd.f32 %v7435_v36, %v8924_v23  ;;  %v1030_v40 = vpop.f32.mrb[9].mxu0  ;;  %7399 = vmatmul.mubr.msk.f32.gmra.mrb[114].mxu0 %vm535_vm1, %v418_v27  ;;  %v2375_v41 = vpop.f32.mrb[9].mxu1  ;;  %7593 = vmatmul.mubr.msk.f32.gmra.mrb[114].mxu1 %vm535_vm1, %v450_v28  ;;  %v425_v28 = vld [vmem:[%s11053_s0 + $0xcd0] sm:$0xff] }
  0xea   :  { %v9038_v42 = vadd.f32 %v2980_v34, %v1635_v33  ;;  %v1031_v43 = vadd.f32 %v8924_v23, %v1030_v40  ;;  %v2376_v44 = vadd.f32 %v8924_v23, %v2375_v41  ;;  %7401 = vmatprep.mubr.msk.f32.mxu0 %vm535_vm1, %v419_v31  ;;  %7595 = vmatprep.mubr.msk.f32.mxu1 %vm535_vm1, %v451_v32  ;;  %v457_v29 = vld [vmem:[%s11053_s0 + $0xdd0] sm:$0xff] }
  0xeb   :  { %v1638_v48 = vmax.f32 %v1036_v38, 0.0  ;;  %v2983_v49 = vmax.f32 %v2381_v39, 0.0 }
  0xec   :  { %v1637_v53 = vmax.f32 %v1031_v43, 0.0  ;;  %v2982_v54 = vmax.f32 %v2376_v44, 0.0  ;;  %v7244_v55 = vpop.f32.mrb[10].mxu0  ;;  %v7438_v56 = vpop.f32.mrb[10].mxu1  ;;  %v426_v44 = vld [vmem:[%s11053_s0 + $0xcd8] sm:$0xff] }
  0xed   :  { %v9056_v57 = vadd.f32 %v2983_v49, %v1638_v48  ;;  %v1046_v58 = vadd.f32 %v7244_v55, %v8924_v23  ;;  %v2391_v59 = vadd.f32 %v7438_v56, %v8924_v23  ;;  %v1040_v60 = vpop.f32.mrb[11].mxu0  ;;  %7402 = vmatmul.mubr.msk.f32.gmra.mrb[116].mxu0 %vm535_vm1, %v420_v45  ;;  %v2385_v61 = vpop.f32.mrb[11].mxu1  ;;  %7596 = vmatmul.mubr.msk.f32.gmra.mrb[116].mxu1 %vm535_vm1, %v452_v47  ;;  %v458_v45 = vld [vmem:[%s11053_s0 + $0xdd8] sm:$0xff]  ;;  %v427_v49 = vld [vmem:[%s11053_s0 + $0xce0] sm:$0xff] }
  0xee   :  { %v9062_v62 = vadd.f32 %v2982_v54, %v1637_v53  ;;  %v1041_v63 = vadd.f32 %v8924_v23, %v1040_v60  ;;  %v2386_v1 = vadd.f32 %v8924_v23, %v2385_v61  ;;  %7404 = vmatprep.mubr.msk.f32.mxu0 %vm535_vm1, %v421_v50  ;;  %7598 = vmatprep.mubr.msk.f32.mxu1 %vm535_vm1, %v453_v52  ;;  %v459_v50 = vld [vmem:[%s11053_s0 + $0xde0] sm:$0xff] }
  0xef   :  { %v1640_v4 = vmax.f32 %v1046_v58, 0.0  ;;  %v2985_v6 = vmax.f32 %v2391_v59, 0.0 }
  0xf0   :  { %v1639_v9 = vmax.f32 %v1041_v63, 0.0  ;;  %v2984_v10 = vmax.f32 %v2386_v1, 0.0  ;;  %v7247_v11 = vpop.f32.mrb[12].mxu0  ;;  %v7441_v12 = vpop.f32.mrb[12].mxu1 }
  0xf1   :  { %v9080_v13 = vadd.f32 %v2985_v6, %v1640_v4  ;;  %v1056_v14 = vadd.f32 %v7247_v11, %v8924_v23  ;;  %v2401_v15 = vadd.f32 %v7441_v12, %v8924_v23  ;;  %v1050_v16 = vpop.f32.mrb[13].mxu0  ;;  %7405 = vmatmul.mubr.msk.f32.gmra.mrb[118].mxu0 %vm535_vm1, %v422_v2  ;;  %v2395_v17 = vpop.f32.mrb[13].mxu1  ;;  %7599 = vmatmul.mubr.msk.f32.gmra.mrb[118].mxu1 %vm535_vm1, %v454_v3  ;;  %v428_v3 = vld [vmem:[%s11053_s0 + $0xce8] sm:$0xff] }
  0xf2   :  { %v9086_v19 = vadd.f32 %v2984_v10, %v1639_v9  ;;  %v1051_v20 = vadd.f32 %v8924_v23, %v1050_v16  ;;  %v2396_v21 = vadd.f32 %v8924_v23, %v2395_v17  ;;  %7407 = vmatprep.mubr.msk.f32.mxu0 %vm535_vm1, %v423_v7  ;;  %7601 = vmatprep.mubr.msk.f32.mxu1 %vm535_vm1, %v455_v8  ;;  %v460_v4 = vld [vmem:[%s11053_s0 + $0xde8] sm:$0xff]  ;;  %v429_v8 = vld [vmem:[%s11053_s0 + $0xcf0] sm:$0xff] }
  0xf3   :  { %v1642_v26 = vmax.f32 %v1056_v14, 0.0  ;;  %v2987_v27 = vmax.f32 %v2401_v15, 0.0  ;;  %v461_v9 = vld [vmem:[%s11053_s0 + $0xdf0] sm:$0xff] }
  0xf4   :  { %v1641_v30 = vmax.f32 %v1051_v20, 0.0  ;;  %v2986_v31 = vmax.f32 %v2396_v21, 0.0  ;;  %v7250_v32 = vpop.f32.mrb[14].mxu0  ;;  %v7444_v33 = vpop.f32.mrb[14].mxu1 }
  0xf5   :  { %v9104_v34 = vadd.f32 %v2987_v27, %v1642_v26  ;;  %v1066_v35 = vadd.f32 %v7250_v32, %v8924_v23  ;;  %v2411_v36 = vadd.f32 %v7444_v33, %v8924_v23  ;;  %v1060_v38 = vpop.f32.mrb[15].mxu0  ;;  %7408 = vmatmul.mubr.msk.f32.gmra.mrb[120].mxu0 %vm535_vm1, %v424_v22  ;;  %v2405_v39 = vpop.f32.mrb[15].mxu1  ;;  %7602 = vmatmul.mubr.msk.f32.gmra.mrb[120].mxu1 %vm535_vm1, %v456_v25  ;;  %v430_v27 = vld [vmem:[%s11053_s0 + $0xcf8] sm:$0xff]  ;;  %v111_v32 = vld [vmem:[%s11053_s0 + $0x300] sm:$0xff] }
  0xf6   :  { %v9110_v40 = vadd.f32 %v2986_v31, %v1641_v30  ;;  %v1061_v41 = vadd.f32 %v8924_v23, %v1060_v38  ;;  %v2406_v43 = vadd.f32 %v8924_v23, %v2405_v39  ;;  %7410 = vmatprep.mubr.msk.f32.mxu0 %vm535_vm1, %v425_v28  ;;  %7604 = vmatprep.mubr.msk.f32.mxu1 %vm535_vm1, %v457_v29  ;;  %v462_v28 = vld [vmem:[%s11053_s0 + $0xdf8] sm:$0xff]  ;;  %v79_v31 = vld [vmem:[%s11053_s0 + $0x200] sm:$0xff] }
  0xf7   :  { %v1644_v47 = vmax.f32 %v1066_v35, 0.0  ;;  %v2989_v48 = vmax.f32 %v2411_v36, 0.0 }
  0xf8   :  { %v1643_v52 = vmax.f32 %v1061_v41, 0.0  ;;  %v2988_v53 = vmax.f32 %v2406_v43, 0.0  ;;  %v7253_v54 = vpop.f32.mrb[16].mxu0  ;;  %v7447_v55 = vpop.f32.mrb[16].mxu1 }
  0xf9   :  { %v9128_v56 = vadd.f32 %v2989_v48, %v1644_v47  ;;  %v1076_v58 = vadd.f32 %v7253_v54, %v8924_v23  ;;  %v2421_v59 = vadd.f32 %v7447_v55, %v8924_v23  ;;  %v1070_v60 = vpop.f32.mrb[17].mxu0  ;;  %7411 = vmatmul.mubr.msk.f32.gmra.mrb[122].mxu0 %vm535_vm1, %v426_v44  ;;  %v2415_v61 = vpop.f32.mrb[17].mxu1  ;;  %7605 = vmatmul.mubr.msk.f32.gmra.mrb[122].mxu1 %vm535_vm1, %v458_v45  ;;  %v81_v55 = vld [vmem:[%s11053_s0 + $0x210] sm:$0xff] }
  0xfa   :  { %v9134_v63 = vadd.f32 %v2988_v53, %v1643_v52  ;;  %v1071_v1 = vadd.f32 %v8924_v23, %v1070_v60  ;;  %v2416_v2 = vadd.f32 %v8924_v23, %v2415_v61  ;;  %7413 = vmatprep.mubr.msk.f32.mxu0 %vm535_vm1, %v427_v49  ;;  %7607 = vmatprep.mubr.msk.f32.mxu1 %vm535_vm1, %v459_v50  ;;  %v80_v50 = vld [vmem:[%s11053_s0 + $0x208] sm:$0xff] }
  0xfb   :  { %v1646_v6 = vmax.f32 %v1076_v58, 0.0  ;;  %v2991_v7 = vmax.f32 %v2421_v59, 0.0  ;;  %v112_v52 = vld [vmem:[%s11053_s0 + $0x308] sm:$0xff]  ;;  %v113_v58 = vld [vmem:[%s11053_s0 + $0x310] sm:$0xff] }
  0xfc   :  { %v1645_v10 = vmax.f32 %v1071_v1, 0.0  ;;  %v2990_v11 = vmax.f32 %v2416_v2, 0.0  ;;  %v7256_v12 = vpop.f32.mrb[18].mxu0  ;;  %v7450_v14 = vpop.f32.mrb[18].mxu1 }
  0xfd   :  { %v9152_v15 = vadd.f32 %v2991_v7, %v1646_v6  ;;  %v1086_v16 = vadd.f32 %v7256_v12, %v8924_v23  ;;  %v2431_v17 = vadd.f32 %v7450_v14, %v8924_v23  ;;  %v1080_v20 = vpop.f32.mrb[19].mxu0  ;;  %7414 = vmatmul.mubr.msk.f32.gmra.mrb[124].mxu0 %vm535_vm1, %v428_v3  ;;  %v2425_v21 = vpop.f32.mrb[19].mxu1  ;;  %7608 = vmatmul.mubr.msk.f32.gmra.mrb[124].mxu1 %vm535_vm1, %v460_v4  ;;  %v114_v12 = vld [vmem:[%s11053_s0 + $0x318] sm:$0xff] }
  0xfe   :  { %v9158_v22 = vadd.f32 %v2990_v11, %v1645_v10  ;;  %v1081_v25 = vadd.f32 %v8924_v23, %v1080_v20  ;;  %v2426_v26 = vadd.f32 %v8924_v23, %v2425_v21  ;;  %7416 = vmatprep.mubr.msk.f32.mxu0 %vm535_vm1, %v429_v8  ;;  %7610 = vmatprep.mubr.msk.f32.mxu1 %vm535_vm1, %v461_v9  ;;  %v82_v11 = vld [vmem:[%s11053_s0 + $0x218] sm:$0xff]  ;;  %v115_v20 = vld [vmem:[%s11053_s0 + $0x320] sm:$0xff] }
  0xff   :  { %v1648_v29 = vmax.f32 %v1086_v16, 0.0  ;;  %v2993_v30 = vmax.f32 %v2431_v17, 0.0  ;;  %v83_v17 = vld [vmem:[%s11053_s0 + $0x220] sm:$0xff] }
 0x100   :  { %v1647_v33 = vmax.f32 %v1081_v25, 0.0  ;;  %v2992_v35 = vmax.f32 %v2426_v26, 0.0  ;;  %v7259_v36 = vpop.f32.mrb[20].mxu0  ;;  %v7453_v38 = vpop.f32.mrb[20].mxu1 }
 0x101   :  { %v9176_v39 = vadd.f32 %v2993_v30, %v1648_v29  ;;  %v1096_v41 = vadd.f32 %v7259_v36, %v8924_v23  ;;  %v2441_v43 = vadd.f32 %v7453_v38, %v8924_v23  ;;  %v1090_v44 = vpop.f32.mrb[21].mxu0  ;;  %7417 = vmatmul.mubr.msk.f32.gmra.mrb[126].mxu0 %vm535_vm1, %v430_v27  ;;  %v2435_v45 = vpop.f32.mrb[21].mxu1  ;;  %7611 = vmatmul.mubr.msk.f32.gmra.mrb[126].mxu1 %vm535_vm1, %v462_v28  ;;  %v84_v38 = vld [vmem:[%s11053_s0 + $0x228] sm:$0xff] }
 0x102   :  { %v9182_v47 = vadd.f32 %v2992_v35, %v1647_v33  ;;  %v1091_v48 = vadd.f32 %v8924_v23, %v1090_v44  ;;  %v2436_v49 = vadd.f32 %v8924_v23, %v2435_v45  ;;  %7615 = vmatprep.mubr.msk.f32.mxu0 %vm535_vm1, %v79_v31  ;;  %7809 = vmatprep.mubr.msk.f32.mxu1 %vm535_vm1, %v111_v32  ;;  %v85_v45 = vld [vmem:[%s11053_s0 + $0x230] sm:$0xff] }
 0x103   :  { %v1650_v53 = vmax.f32 %v1096_v41, 0.0  ;;  %v2995_v54 = vmax.f32 %v2441_v43, 0.0  ;;  %v116_v41 = vld [vmem:[%s11053_s0 + $0x328] sm:$0xff] }
 0x104   :  { %v1649_v59 = vmax.f32 %v1091_v48, 0.0  ;;  %v2994_v60 = vmax.f32 %v2436_v49, 0.0  ;;  %v7262_v61 = vpop.f32.mrb[22].mxu0  ;;  %v7456_v1 = vpop.f32.mrb[22].mxu1  ;;  %v117_v48 = vld [vmem:[%s11053_s0 + $0x330] sm:$0xff] }
 0x105   :  { %v9200_v2 = vadd.f32 %v2995_v54, %v1650_v53  ;;  %v1106_v3 = vadd.f32 %v7262_v61, %v8924_v23  ;;  %v2451_v4 = vadd.f32 %v7456_v1, %v8924_v23  ;;  %v1100_v6 = vpop.f32.mrb[23].mxu0  ;;  %v2445_v7 = vpop.f32.mrb[23].mxu1  ;;  %7616 = vmatmul.mubr.msk.f32.vlgmr.msra.gmra.mrb[128].mxu0 %vm535_vm1, %v80_v50  ;;  %7810 = vmatmul.mubr.msk.f32.vlgmr.msra.gmra.mrb[128].mxu1 %vm535_vm1, %v112_v52 }
 0x106   :  { %v9206_v8 = vadd.f32 %v2994_v60, %v1649_v59  ;;  %v1101_v9 = vadd.f32 %v8924_v23, %v1100_v6  ;;  %v2446_v10 = vadd.f32 %v8924_v23, %v2445_v7  ;;  %7618 = vmatprep.mubr.msk.f32.mxu0 %vm535_vm1, %v81_v55  ;;  %7812 = vmatprep.mubr.msk.f32.mxu1 %vm535_vm1, %v113_v58  ;;  %v118_v6 = vld [vmem:[%s11053_s0 + $0x338] sm:$0xff] }
 0x107   :  { %v1652_v14 = vmax.f32 %v1106_v3, 0.0  ;;  %v2997_v16 = vmax.f32 %v2451_v4, 0.0  ;;  %v86_v4 = vld [vmem:[%s11053_s0 + $0x238] sm:$0xff] }
 0x108   :  { %v1651_v21 = vmax.f32 %v1101_v9, 0.0  ;;  %v2996_v25 = vmax.f32 %v2446_v10, 0.0  ;;  %v7265_v26 = vpop.f32.mrb[24].mxu0  ;;  %v7459_v27 = vpop.f32.mrb[24].mxu1  ;;  %v87_v10 = vld [vmem:[%s11053_s0 + $0x240] sm:$0xff] }
 0x109   :  { %v9224_v28 = vadd.f32 %v2997_v16, %v1652_v14  ;;  %v1116_v29 = vadd.f32 %v7265_v26, %v8924_v23  ;;  %v2461_v30 = vadd.f32 %v7459_v27, %v8924_v23  ;;  %v1110_v31 = vpop.f32.mrb[25].mxu0  ;;  %v2455_v32 = vpop.f32.mrb[25].mxu1  ;;  %7619 = vmatmul.mubr.msk.f32.gmra.mrb[130].mxu0 %vm535_vm1, %v82_v11  ;;  %7813 = vmatmul.mubr.msk.f32.gmra.mrb[130].mxu1 %vm535_vm1, %v114_v12  ;;  %v119_v11 = vld [vmem:[%s11053_s0 + $0x340] sm:$0xff] }
 0x10a   :  { %v9230_v33 = vadd.f32 %v2996_v25, %v1651_v21  ;;  %v1111_v35 = vadd.f32 %v8924_v23, %v1110_v31  ;;  %v2456_v36 = vadd.f32 %v8924_v23, %v2455_v32  ;;  %7621 = vmatprep.mubr.msk.f32.mxu0 %vm535_vm1, %v83_v17  ;;  %7815 = vmatprep.mubr.msk.f32.mxu1 %vm535_vm1, %v115_v20  ;;  %v88_v32 = vld [vmem:[%s11053_s0 + $0x248] sm:$0xff] }
 0x10b   :  { %v1654_v43 = vmax.f32 %v1116_v29, 0.0  ;;  %v2999_v44 = vmax.f32 %v2461_v30, 0.0 }
 0x10c   :  { %v1653_v49 = vmax.f32 %v1111_v35, 0.0  ;;  %v2998_v50 = vmax.f32 %v2456_v36, 0.0  ;;  %v7268_v52 = vpop.f32.mrb[26].mxu0  ;;  %v7462_v53 = vpop.f32.mrb[26].mxu1  ;;  %v120_v35 = vld [vmem:[%s11053_s0 + $0x348] sm:$0xff] }
 0x10d   :  { %v9248_v54 = vadd.f32 %v2999_v44, %v1654_v43  ;;  %v1126_v55 = vadd.f32 %v7268_v52, %v8924_v23  ;;  %v2471_v58 = vadd.f32 %v7462_v53, %v8924_v23  ;;  %v1120_v59 = vpop.f32.mrb[27].mxu0  ;;  %v2465_v60 = vpop.f32.mrb[27].mxu1  ;;  %7622 = vmatmul.mubr.msk.f32.gmra.mrb[132].mxu0 %vm535_vm1, %v84_v38  ;;  %7816 = vmatmul.mubr.msk.f32.gmra.mrb[132].mxu1 %vm535_vm1, %v116_v41  ;;  %v89_v41 = vld [vmem:[%s11053_s0 + $0x250] sm:$0xff] }
 0x10e   :  { %v9254_v61 = vadd.f32 %v2998_v50, %v1653_v49  ;;  %v1121_v1 = vadd.f32 %v8924_v23, %v1120_v59  ;;  %v2466_v3 = vadd.f32 %v8924_v23, %v2465_v60  ;;  %7624 = vmatprep.mubr.msk.f32.mxu0 %vm535_vm1, %v85_v45  ;;  %7818 = vmatprep.mubr.msk.f32.mxu1 %vm535_vm1, %v117_v48  ;;  %v121_v43 = vld [vmem:[%s11053_s0 + $0x350] sm:$0xff] }
 0x10f   :  { %v1656_v7 = vmax.f32 %v1126_v55, 0.0  ;;  %v3001_v9 = vmax.f32 %v2471_v58, 0.0 }
 0x110   :  { %v1655_v12 = vmax.f32 %v1121_v1, 0.0  ;;  %v3000_v14 = vmax.f32 %v2466_v3, 0.0  ;;  %v7271_v16 = vpop.f32.mrb[28].mxu0  ;;  %v7465_v17 = vpop.f32.mrb[28].mxu1  ;;  %v90_v3 = vld [vmem:[%s11053_s0 + $0x258] sm:$0xff] }
 0x111   :  { %v9272_v20 = vadd.f32 %v3001_v9, %v1656_v7  ;;  %v1136_v21 = vadd.f32 %v7271_v16, %v8924_v23  ;;  %v2481_v25 = vadd.f32 %v7465_v17, %v8924_v23  ;;  %v1130_v26 = vpop.f32.mrb[29].mxu0  ;;  %v2475_v27 = vpop.f32.mrb[29].mxu1  ;;  %7625 = vmatmul.mubr.msk.f32.gmra.mrb[134].mxu0 %vm535_vm1, %v86_v4  ;;  %7819 = vmatmul.mubr.msk.f32.gmra.mrb[134].mxu1 %vm535_vm1, %v118_v6  ;;  %v122_v4 = vld [vmem:[%s11053_s0 + $0x358] sm:$0xff]  ;;  %v91_v9 = vld [vmem:[%s11053_s0 + $0x260] sm:$0xff] }
 0x112   :  { %v9278_v29 = vadd.f32 %v3000_v14, %v1655_v12  ;;  %v1131_v30 = vadd.f32 %v8924_v23, %v1130_v26  ;;  %v2476_v31 = vadd.f32 %v8924_v23, %v2475_v27  ;;  %7627 = vmatprep.mubr.msk.f32.mxu0 %vm535_vm1, %v87_v10  ;;  %7821 = vmatprep.mubr.msk.f32.mxu1 %vm535_vm1, %v119_v11  ;;  %v123_v10 = vld [vmem:[%s11053_s0 + $0x360] sm:$0xff] }
 0x113   :  { %v1658_v36 = vmax.f32 %v1136_v21, 0.0  ;;  %v3003_v38 = vmax.f32 %v2481_v25, 0.0 }
 0x114   :  { %v1657_v44 = vmax.f32 %v1131_v30, 0.0  ;;  %v3002_v45 = vmax.f32 %v2476_v31, 0.0  ;;  %v7274_v48 = vpop.f32.mrb[30].mxu0  ;;  %v7468_v49 = vpop.f32.mrb[30].mxu1 }
 0x115   :  { %v9296_v50 = vadd.f32 %v3003_v38, %v1658_v36  ;;  %v1146_v52 = vadd.f32 %v7274_v48, %v8924_v23  ;;  %v2491_v53 = vadd.f32 %v7468_v49, %v8924_v23  ;;  %v1140_v55 = vpop.f32.mrb[31].mxu0  ;;  %v2485_v58 = vpop.f32.mrb[31].mxu1  ;;  %7628 = vmatmul.mubr.msk.f32.gmra.mrb[136].mxu0 %vm535_vm1, %v88_v32  ;;  %7822 = vmatmul.mubr.msk.f32.gmra.mrb[136].mxu1 %vm535_vm1, %v120_v35  ;;  %v92_v35 = vld [vmem:[%s11053_s0 + $0x268] sm:$0xff] }
 0x116   :  { %v9302_v59 = vadd.f32 %v3002_v45, %v1657_v44  ;;  %v1141_v60 = vadd.f32 %v8924_v23, %v1140_v55  ;;  %v2486_v1 = vadd.f32 %v8924_v23, %v2485_v58  ;;  %7630 = vmatprep.mubr.msk.f32.mxu0 %vm535_vm1, %v89_v41  ;;  %7824 = vmatprep.mubr.msk.f32.mxu1 %vm535_vm1, %v121_v43  ;;  %v124_v36 = vld [vmem:[%s11053_s0 + $0x368] sm:$0xff]  ;;  %v93_v43 = vld [vmem:[%s11053_s0 + $0x270] sm:$0xff] }
 0x117   :  { %v1660_v6 = vmax.f32 %v1146_v52, 0.0  ;;  %v3005_v7 = vmax.f32 %v2491_v53, 0.0  ;;  %v125_v44 = vld [vmem:[%s11053_s0 + $0x370] sm:$0xff] }
 0x118   :  { %v1659_v11 = vmax.f32 %v1141_v60, 0.0  ;;  %v3004_v12 = vmax.f32 %v2486_v1, 0.0  ;;  %v7277_v14 = vpop.f32.mrb[32].mxu0  ;;  %v7471_v16 = vpop.f32.mrb[32].mxu1 }
 0x119   :  { %v9320_v17 = vadd.f32 %v3005_v7, %v1660_v6  ;;  %v1156_v21 = vadd.f32 %v7277_v14, %v8924_v23  ;;  %v2501_v25 = vadd.f32 %v7471_v16, %v8924_v23  ;;  %v1150_v26 = vpop.f32.mrb[33].mxu0  ;;  %v2495_v27 = vpop.f32.mrb[33].mxu1  ;;  %7631 = vmatmul.mubr.msk.f32.gmra.mrb[138].mxu0 %vm535_vm1, %v90_v3  ;;  %7825 = vmatmul.mubr.msk.f32.gmra.mrb[138].mxu1 %vm535_vm1, %v122_v4  ;;  %v94_v7 = vld [vmem:[%s11053_s0 + $0x278] sm:$0xff]  ;;  %v127_v14 = vld [vmem:[%s11053_s0 + $0x380] sm:$0xff] }
 0x11a   :  { %v9326_v30 = vadd.f32 %v3004_v12, %v1659_v11  ;;  %v1151_v31 = vadd.f32 %v8924_v23, %v1150_v26  ;;  %v2496_v32 = vadd.f32 %v8924_v23, %v2495_v27  ;;  %7633 = vmatprep.mubr.msk.f32.mxu0 %vm535_vm1, %v91_v9  ;;  %7827 = vmatprep.mubr.msk.f32.mxu1 %vm535_vm1, %v123_v10  ;;  %v126_v9 = vld [vmem:[%s11053_s0 + $0x378] sm:$0xff]  ;;  %v95_v12 = vld [vmem:[%s11053_s0 + $0x280] sm:$0xff] }
 0x11b   :  { %v1662_v38 = vmax.f32 %v1156_v21, 0.0  ;;  %v3007_v41 = vmax.f32 %v2501_v25, 0.0 }
 0x11c   :  { %v1661_v45 = vmax.f32 %v1151_v31, 0.0  ;;  %v3006_v48 = vmax.f32 %v2496_v32, 0.0  ;;  %v7280_v49 = vpop.f32.mrb[34].mxu0  ;;  %v7474_v52 = vpop.f32.mrb[34].mxu1 }
 0x11d   :  { %v9344_v53 = vadd.f32 %v3007_v41, %v1662_v38  ;;  %v1166_v55 = vadd.f32 %v7280_v49, %v8924_v23  ;;  %v2511_v58 = vadd.f32 %v7474_v52, %v8924_v23  ;;  %v1160_v60 = vpop.f32.mrb[35].mxu0  ;;  %v2505_v1 = vpop.f32.mrb[35].mxu1  ;;  %7634 = vmatmul.mubr.msk.f32.gmra.mrb[140].mxu0 %vm535_vm1, %v92_v35  ;;  %7828 = vmatmul.mubr.msk.f32.gmra.mrb[140].mxu1 %vm535_vm1, %v124_v36  ;;  %v97_v52 = vld [vmem:[%s11053_s0 + $0x290] sm:$0xff] }
 0x11e   :  { %v9350_v3 = vadd.f32 %v3006_v48, %v1661_v45  ;;  %v1161_v4 = vadd.f32 %v8924_v23, %v1160_v60  ;;  %v2506_v6 = vadd.f32 %v8924_v23, %v2505_v1  ;;  %7636 = vmatprep.mubr.msk.f32.mxu0 %vm535_vm1, %v93_v43  ;;  %7830 = vmatprep.mubr.msk.f32.mxu1 %vm535_vm1, %v125_v44  ;;  %v96_v44 = vld [vmem:[%s11053_s0 + $0x288] sm:$0xff] }
 0x11f   :  { %v1664_v10 = vmax.f32 %v1166_v55, 0.0  ;;  %v3009_v11 = vmax.f32 %v2511_v58, 0.0  ;;  %v128_v45 = vld [vmem:[%s11053_s0 + $0x388] sm:$0xff]  ;;  %v129_v55 = vld [vmem:[%s11053_s0 + $0x390] sm:$0xff] }
 0x120   :  { %v1663_v16 = vmax.f32 %v1161_v4, 0.0  ;;  %v3008_v21 = vmax.f32 %v2506_v6, 0.0  ;;  %v7283_v25 = vpop.f32.mrb[36].mxu0  ;;  %v7477_v26 = vpop.f32.mrb[36].mxu1 }
 0x121   :  { %v9368_v27 = vadd.f32 %v3009_v11, %v1664_v10  ;;  %v1176_v31 = vadd.f32 %v7283_v25, %v8924_v23  ;;  %v2521_v32 = vadd.f32 %v7477_v26, %v8924_v23  ;;  %v1170_v35 = vpop.f32.mrb[37].mxu0  ;;  %v2515_v36 = vpop.f32.mrb[37].mxu1  ;;  %7637 = vmatmul.mubr.msk.f32.gmra.mrb[142].mxu0 %vm535_vm1, %v94_v7  ;;  %7831 = vmatmul.mubr.msk.f32.gmra.mrb[142].mxu1 %vm535_vm1, %v126_v9  ;;  %v130_v25 = vld [vmem:[%s11053_s0 + $0x398] sm:$0xff] }
 0x122   :  { %v9374_v38 = vadd.f32 %v3008_v21, %v1663_v16  ;;  %v1171_v41 = vadd.f32 %v8924_v23, %v1170_v35  ;;  %v2516_v43 = vadd.f32 %v8924_v23, %v2515_v36  ;;  %7639 = vmatprep.mubr.msk.f32.mxu0 %vm535_vm1, %v95_v12  ;;  %7833 = vmatprep.mubr.msk.f32.mxu1 %vm535_vm1, %v127_v14  ;;  %v98_v21 = vld [vmem:[%s11053_s0 + $0x298] sm:$0xff]  ;;  %v131_v35 = vld [vmem:[%s11053_s0 + $0x3a0] sm:$0xff] }
 0x123   :  { %v1666_v48 = vmax.f32 %v1176_v31, 0.0  ;;  %v3011_v49 = vmax.f32 %v2521_v32, 0.0  ;;  %v99_v32 = vld [vmem:[%s11053_s0 + $0x2a0] sm:$0xff] }
 0x124   :  { %v1665_v58 = vmax.f32 %v1171_v41, 0.0  ;;  %v3010_v60 = vmax.f32 %v2516_v43, 0.0  ;;  %v7286_v1 = vpop.f32.mrb[38].mxu0  ;;  %v7480_v4 = vpop.f32.mrb[38].mxu1 }
 0x125   :  { %v9392_v6 = vadd.f32 %v3011_v49, %v1666_v48  ;;  %v1186_v7 = vadd.f32 %v7286_v1, %v8924_v23  ;;  %v2531_v9 = vadd.f32 %v7480_v4, %v8924_v23  ;;  %v1180_v10 = vpop.f32.mrb[39].mxu0  ;;  %v2525_v11 = vpop.f32.mrb[39].mxu1  ;;  %7640 = vmatmul.mubr.msk.f32.gmra.mrb[144].mxu0 %vm535_vm1, %v96_v44  ;;  %7834 = vmatmul.mubr.msk.f32.gmra.mrb[144].mxu1 %vm535_vm1, %v128_v45  ;;  %v100_v4 = vld [vmem:[%s11053_s0 + $0x2a8] sm:$0xff] }
 0x126   :  { %v9398_v12 = vadd.f32 %v3010_v60, %v1665_v58  ;;  %v1181_v14 = vadd.f32 %v8924_v23, %v1180_v10  ;;  %v2526_v16 = vadd.f32 %v8924_v23, %v2525_v11  ;;  %7642 = vmatprep.mubr.msk.f32.mxu0 %vm535_vm1, %v97_v52  ;;  %7836 = vmatprep.mubr.msk.f32.mxu1 %vm535_vm1, %v129_v55  ;;  %v101_v11 = vld [vmem:[%s11053_s0 + $0x2b0] sm:$0xff] }
 0x127   :  { %v1668_v26 = vmax.f32 %v1186_v7, 0.0  ;;  %v3013_v31 = vmax.f32 %v2531_v9, 0.0  ;;  %v132_v7 = vld [vmem:[%s11053_s0 + $0x3a8] sm:$0xff] }
 0x128   :  { %v1667_v36 = vmax.f32 %v1181_v14, 0.0  ;;  %v3012_v41 = vmax.f32 %v2526_v16, 0.0  ;;  %v7289_v43 = vpop.f32.mrb[40].mxu0  ;;  %v7483_v44 = vpop.f32.mrb[40].mxu1  ;;  %v133_v14 = vld [vmem:[%s11053_s0 + $0x3b0] sm:$0xff] }
 0x129   :  { %v9416_v45 = vadd.f32 %v3013_v31, %v1668_v26  ;;  %v1196_v48 = vadd.f32 %v7289_v43, %v8924_v23  ;;  %v2541_v49 = vadd.f32 %v7483_v44, %v8924_v23  ;;  %v1190_v52 = vpop.f32.mrb[41].mxu0  ;;  %v2535_v55 = vpop.f32.mrb[41].mxu1  ;;  %7643 = vmatmul.mubr.msk.f32.gmra.mrb[146].mxu0 %vm535_vm1, %v98_v21  ;;  %7837 = vmatmul.mubr.msk.f32.gmra.mrb[146].mxu1 %vm535_vm1, %v130_v25 }
 0x12a   :  { %v9422_v58 = vadd.f32 %v3012_v41, %v1667_v36  ;;  %v1191_v60 = vadd.f32 %v8924_v23, %v1190_v52  ;;  %v2536_v1 = vadd.f32 %v8924_v23, %v2535_v55  ;;  %7645 = vmatprep.mubr.msk.f32.mxu0 %vm535_vm1, %v99_v32  ;;  %7839 = vmatprep.mubr.msk.f32.mxu1 %vm535_vm1, %v131_v35  ;;  %v134_v52 = vld [vmem:[%s11053_s0 + $0x3b8] sm:$0xff] }
 0x12b   :  { %v1670_v9 = vmax.f32 %v1196_v48, 0.0  ;;  %v3015_v10 = vmax.f32 %v2541_v49, 0.0  ;;  %v102_v49 = vld [vmem:[%s11053_s0 + $0x2b8] sm:$0xff] }
 0x12c   :  { %v1669_v16 = vmax.f32 %v1191_v60, 0.0  ;;  %v3014_v21 = vmax.f32 %v2536_v1, 0.0  ;;  %v7292_v25 = vpop.f32.mrb[42].mxu0  ;;  %v7486_v26 = vpop.f32.mrb[42].mxu1  ;;  %v103_v1 = vld [vmem:[%s11053_s0 + $0x2c0] sm:$0xff] }
 0x12d   :  { %v9440_v31 = vadd.f32 %v3015_v10, %v1670_v9  ;;  %v1206_v32 = vadd.f32 %v7292_v25, %v8924_v23  ;;  %v2551_v35 = vadd.f32 %v7486_v26, %v8924_v23  ;;  %v1200_v36 = vpop.f32.mrb[43].mxu0  ;;  %v2545_v41 = vpop.f32.mrb[43].mxu1  ;;  %7646 = vmatmul.mubr.msk.f32.gmra.mrb[148].mxu0 %vm535_vm1, %v100_v4  ;;  %7840 = vmatmul.mubr.msk.f32.gmra.mrb[148].mxu1 %vm535_vm1, %v132_v7  ;;  %v135_v4 = vld [vmem:[%s11053_s0 + $0x3c0] sm:$0xff] }
 0x12e   :  { %v9446_v43 = vadd.f32 %v3014_v21, %v1669_v16  ;;  %v1201_v44 = vadd.f32 %v8924_v23, %v1200_v36  ;;  %v2546_v48 = vadd.f32 %v8924_v23, %v2545_v41  ;;  %7648 = vmatprep.mubr.msk.f32.mxu0 %vm535_vm1, %v101_v11  ;;  %7842 = vmatprep.mubr.msk.f32.mxu1 %vm535_vm1, %v133_v14  ;;  %v104_v41 = vld [vmem:[%s11053_s0 + $0x2c8] sm:$0xff] }
 0x12f   :  { %v1672_v55 = vmax.f32 %v1206_v32, 0.0  ;;  %v3017_v60 = vmax.f32 %v2551_v35, 0.0 }
 0x130   :  { %v1671_v7 = vmax.f32 %v1201_v44, 0.0  ;;  %v3016_v9 = vmax.f32 %v2546_v48, 0.0  ;;  %v7295_v10 = vpop.f32.mrb[44].mxu0  ;;  %v7489_v11 = vpop.f32.mrb[44].mxu1  ;;  %v136_v44 = vld [vmem:[%s11053_s0 + $0x3c8] sm:$0xff] }
 0x131   :  { %v9464_v16 = vadd.f32 %v3017_v60, %v1672_v55  ;;  %v1216_v14 = vadd.f32 %v7295_v10, %v8924_v23  ;;  %v2561_v21 = vadd.f32 %v7489_v11, %v8924_v23  ;;  %v1210_v25 = vpop.f32.mrb[45].mxu0  ;;  %v2555_v26 = vpop.f32.mrb[45].mxu1  ;;  %7649 = vmatmul.mubr.msk.f32.gmra.mrb[150].mxu0 %vm535_vm1, %v102_v49  ;;  %7843 = vmatmul.mubr.msk.f32.gmra.mrb[150].mxu1 %vm535_vm1, %v134_v52  ;;  %v105_v52 = vld [vmem:[%s11053_s0 + $0x2d0] sm:$0xff] }
 0x132   :  { %v9470_v32 = vadd.f32 %v3016_v9, %v1671_v7  ;;  %v1211_v35 = vadd.f32 %v8924_v23, %v1210_v25  ;;  %v2556_v36 = vadd.f32 %v8924_v23, %v2555_v26  ;;  %7651 = vmatprep.mubr.msk.f32.mxu0 %vm535_vm1, %v103_v1  ;;  %7845 = vmatprep.mubr.msk.f32.mxu1 %vm535_vm1, %v135_v4  ;;  %v137_v23 = vld [vmem:[%s11053_s0 + $0x3d0] sm:$0xff]  ;;  %v9493_v4 = vld [vmem:[%s11055_s2] ss:$0 sm:$0xff] }
 0x133   :  { %11057 = vst [vmem:[#allocation5_spill] sm:$0xff] %v9464_v16  ;;  %v1674_v48 = vmax.f32 %v1216_v14, 0.0  ;;  %v3019_v49 = vmax.f32 %v2561_v21, 0.0 }
 0x134   :  { %11058 = vst [vmem:[#allocation6_spill] sm:$0xff] %v9470_v32  ;;  %v1673_v55 = vmax.f32 %v1211_v35, 0.0  ;;  %v3018_v60 = vmax.f32 %v2556_v36, 0.0  ;;  %v7298_v1 = vpop.f32.mrb[46].mxu0  ;;  %v7492_v7 = vpop.f32.mrb[46].mxu1  ;;  %v106_v36 = vld [vmem:[%s11053_s0 + $0x2d8] sm:$0xff] }
 0x135   :  { %v9488_v9 = vadd.f32 %v3019_v49, %v1674_v48  ;;  %v1226_v10 = vadd.f32 %v9493_v4, %v7298_v1  ;;  %v2571_v11 = vadd.f32 %v9493_v4, %v7492_v7  ;;  %v1220_v14 = vpop.f32.mrb[47].mxu0  ;;  %v2565_v21 = vpop.f32.mrb[47].mxu1  ;;  %7652 = vmatmul.mubr.msk.f32.gmra.mrb[152].mxu0 %vm535_vm1, %v104_v41  ;;  %7846 = vmatmul.mubr.msk.f32.gmra.mrb[152].mxu1 %vm535_vm1, %v136_v44  ;;  %v138_v41 = vld [vmem:[%s11053_s0 + $0x3d8] sm:$0xff]  ;;  %v107_v49 = vld [vmem:[%s11053_s0 + $0x2e0] sm:$0xff] }
 0x136   :  { %v9499_v25 = vadd.f32 %v3018_v60, %v1673_v55  ;;  %v1221_v26 = vadd.f32 %v9493_v4, %v1220_v14  ;;  %v2566_v35 = vadd.f32 %v9493_v4, %v2565_v21  ;;  %7654 = vmatprep.mubr.msk.f32.mxu0 %vm535_vm1, %v105_v52  ;;  %7848 = vmatprep.mubr.msk.f32.mxu1 %vm535_vm1, %v137_v23  ;;  %v139_v52 = vld [vmem:[%s11053_s0 + $0x3e0] sm:$0xff] }
 0x137   :  { %11059 = vst [vmem:[#allocation7_spill] sm:$0xff] %v9488_v9  ;;  %v1676_v48 = vmax.f32 %v1226_v10, 0.0  ;;  %v3021_v44 = vmax.f32 %v2571_v11, 0.0 }
 0x138   :  { %11060 = vst [vmem:[#allocation8_spill] sm:$0xff] %v9499_v25  ;;  %v1675_v55 = vmax.f32 %v1221_v26, 0.0  ;;  %v3020_v60 = vmax.f32 %v2566_v35, 0.0  ;;  %v7301_v1 = vpop.f32.mrb[48].mxu0  ;;  %v7495_v7 = vpop.f32.mrb[48].mxu1  ;;  %v108_v35 = vld [vmem:[%s11053_s0 + $0x2e8] sm:$0xff] }
 0x139   :  { %v9517_v14 = vadd.f32 %v3021_v44, %v1676_v48  ;;  %v1236_v23 = vadd.f32 %v9493_v4, %v7301_v1  ;;  %v2581_v21 = vadd.f32 %v9493_v4, %v7495_v7  ;;  %v1230_v10 = vpop.f32.mrb[49].mxu0  ;;  %v2575_v11 = vpop.f32.mrb[49].mxu1  ;;  %7655 = vmatmul.mubr.msk.f32.gmra.mrb[154].mxu0 %vm535_vm1, %v106_v36  ;;  %7849 = vmatmul.mubr.msk.f32.gmra.mrb[154].mxu1 %vm535_vm1, %v138_v41  ;;  %v140_v36 = vld [vmem:[%s11053_s0 + $0x3e8] sm:$0xff]  ;;  %v109_v44 = vld [vmem:[%s11053_s0 + $0x2f0] sm:$0xff] }
 0x13a   :  { %v9523_v25 = vadd.f32 %v3020_v60, %v1675_v55  ;;  %v1231_v9 = vadd.f32 %v9493_v4, %v1230_v10  ;;  %v2576_v26 = vadd.f32 %v9493_v4, %v2575_v11  ;;  %7657 = vmatprep.mubr.msk.f32.mxu0 %vm535_vm1, %v107_v49  ;;  %7851 = vmatprep.mubr.msk.f32.mxu1 %vm535_vm1, %v139_v52  ;;  %v141_v49 = vld [vmem:[%s11053_s0 + $0x3f0] sm:$0xff] }
 0x13b   :  { %11061 = vst [vmem:[#allocation9_spill] sm:$0xff] %v9517_v14  ;;  %v1678_v48 = vmax.f32 %v1236_v23, 0.0  ;;  %v3023_v41 = vmax.f32 %v2581_v21, 0.0 }
 0x13c   :  { %11062 = vst [vmem:[#allocation10_spill] sm:$0xff] %v9523_v25  ;;  %v1677_v55 = vmax.f32 %v1231_v9, 0.0  ;;  %v3022_v60 = vmax.f32 %v2576_v26, 0.0  ;;  %v7304_v1 = vpop.f32.mrb[50].mxu0  ;;  %v7498_v7 = vpop.f32.mrb[50].mxu1  ;;  %v110_v26 = vld [vmem:[%s11053_s0 + $0x2f8] sm:$0xff] }
 0x13d   :  { %v9541_v10 = vadd.f32 %v3023_v41, %v1678_v48  ;;  %v1246_v52 = vadd.f32 %v9493_v4, %v7304_v1  ;;  %v2591_v11 = vadd.f32 %v9493_v4, %v7498_v7  ;;  %v1240_v23 = vpop.f32.mrb[51].mxu0  ;;  %v2585_v21 = vpop.f32.mrb[51].mxu1  ;;  %7658 = vmatmul.mubr.msk.f32.gmra.mrb[156].mxu0 %vm535_vm1, %v108_v35  ;;  %7852 = vmatmul.mubr.msk.f32.gmra.mrb[156].mxu1 %vm535_vm1, %v140_v36  ;;  %v142_v35 = vld [vmem:[%s11053_s0 + $0x3f8] sm:$0xff]  ;;  %v207_v41 = vld [vmem:[%s11053_s0 + $0x600] sm:$0xff] }
 0x13e   :  { %v9547_v25 = vadd.f32 %v3022_v60, %v1677_v55  ;;  %v1241_v14 = vadd.f32 %v9493_v4, %v1240_v23  ;;  %v2586_v9 = vadd.f32 %v9493_v4, %v2585_v21  ;;  %7660 = vmatprep.mubr.msk.f32.mxu0 %vm535_vm1, %v109_v44  ;;  %7854 = vmatprep.mubr.msk.f32.mxu1 %vm535_vm1, %v141_v49  ;;  %v239_v44 = vld [vmem:[%s11053_s0 + $0x700] sm:$0xff] }
 0x13f   :  { %11063 = vst [vmem:[#allocation11_spill] sm:$0xff] %v9541_v10  ;;  %v1680_v48 = vmax.f32 %v1246_v52, 0.0  ;;  %v3025_v36 = vmax.f32 %v2591_v11, 0.0 }
 0x140   :  { %11064 = vst [vmem:[#allocation12_spill] sm:$0xff] %v9547_v25  ;;  %v1679_v55 = vmax.f32 %v1241_v14, 0.0  ;;  %v3024_v60 = vmax.f32 %v2586_v9, 0.0  ;;  %v7307_v1 = vpop.f32.mrb[52].mxu0  ;;  %v7501_v7 = vpop.f32.mrb[52].mxu1  ;;  %v208_v9 = vld [vmem:[%s11053_s0 + $0x608] sm:$0xff] }
 0x141   :  { %v9565_v23 = vadd.f32 %v3025_v36, %v1680_v48  ;;  %v1256_v49 = vadd.f32 %v9493_v4, %v7307_v1  ;;  %v2601_v21 = vadd.f32 %v9493_v4, %v7501_v7  ;;  %v1250_v52 = vpop.f32.mrb[53].mxu0  ;;  %v2595_v11 = vpop.f32.mrb[53].mxu1  ;;  %7661 = vmatmul.mubr.msk.f32.gmra.mrb[158].mxu0 %vm535_vm1, %v110_v26  ;;  %7855 = vmatmul.mubr.msk.f32.gmra.mrb[158].mxu1 %vm535_vm1, %v142_v35  ;;  %v240_v26 = vld [vmem:[%s11053_s0 + $0x708] sm:$0xff]  ;;  %v209_v36 = vld [vmem:[%s11053_s0 + $0x610] sm:$0xff] }
 0x142   :  { %v9571_v25 = vadd.f32 %v3024_v60, %v1679_v55  ;;  %v1251_v10 = vadd.f32 %v9493_v4, %v1250_v52  ;;  %v2596_v14 = vadd.f32 %v9493_v4, %v2595_v11  ;;  %7663 = vmatprep.mubr.msk.f32.mxu0 %vm535_vm1, %v207_v41  ;;  %7857 = vmatprep.mubr.msk.f32.mxu1 %vm535_vm1, %v239_v44  ;;  %v241_v41 = vld [vmem:[%s11053_s0 + $0x710] sm:$0xff] }
 0x143   :  { %11065 = vst [vmem:[#allocation13_spill] sm:$0xff] %v9565_v23  ;;  %v1682_v48 = vmax.f32 %v1256_v49, 0.0  ;;  %v3027_v35 = vmax.f32 %v2601_v21, 0.0 }
 0x144   :  { %11066 = vst [vmem:[#allocation14_spill] sm:$0xff] %v9571_v25  ;;  %v1681_v55 = vmax.f32 %v1251_v10, 0.0  ;;  %v3026_v60 = vmax.f32 %v2596_v14, 0.0  ;;  %v7310_v1 = vpop.f32.mrb[54].mxu0  ;;  %v7504_v7 = vpop.f32.mrb[54].mxu1  ;;  %v210_v14 = vld [vmem:[%s11053_s0 + $0x618] sm:$0xff] }
 0x145   :  { %v9589_v52 = vadd.f32 %v3027_v35, %v1682_v48  ;;  %v1266_v44 = vadd.f32 %v9493_v4, %v7310_v1  ;;  %v2611_v11 = vadd.f32 %v9493_v4, %v7504_v7  ;;  %v1260_v49 = vpop.f32.mrb[55].mxu0  ;;  %v2605_v21 = vpop.f32.mrb[55].mxu1  ;;  %7664 = vmatmul.mubr.msk.f32.gmra.mrb[160].mxu0 %vm535_vm1, %v208_v9  ;;  %7858 = vmatmul.mubr.msk.f32.gmra.mrb[160].mxu1 %vm535_vm1, %v240_v26  ;;  %v242_v9 = vld [vmem:[%s11053_s0 + $0x718] sm:$0xff]  ;;  %v211_v35 = vld [vmem:[%s11053_s0 + $0x620] sm:$0xff] }
 0x146   :  { %v9595_v25 = vadd.f32 %v3026_v60, %v1681_v55  ;;  %v1261_v23 = vadd.f32 %v9493_v4, %v1260_v49  ;;  %v2606_v10 = vadd.f32 %v9493_v4, %v2605_v21  ;;  %7666 = vmatprep.mubr.msk.f32.mxu0 %vm535_vm1, %v209_v36  ;;  %7860 = vmatprep.mubr.msk.f32.mxu1 %vm535_vm1, %v241_v41  ;;  %v243_v36 = vld [vmem:[%s11053_s0 + $0x720] sm:$0xff] }
 0x147   :  { %11067 = vst [vmem:[#allocation15_spill] sm:$0xff] %v9589_v52  ;;  %v1684_v48 = vmax.f32 %v1266_v44, 0.0  ;;  %v3029_v26 = vmax.f32 %v2611_v11, 0.0 }
 0x148   :  { %11068 = vst [vmem:[#allocation16_spill] sm:$0xff] %v9595_v25  ;;  %v1683_v55 = vmax.f32 %v1261_v23, 0.0  ;;  %v3028_v60 = vmax.f32 %v2606_v10, 0.0  ;;  %v7313_v1 = vpop.f32.mrb[56].mxu0  ;;  %v7507_v7 = vpop.f32.mrb[56].mxu1  ;;  %v212_v10 = vld [vmem:[%s11053_s0 + $0x628] sm:$0xff] }
 0x149   :  { %v9613_v49 = vadd.f32 %v3029_v26, %v1684_v48  ;;  %v1276_v41 = vadd.f32 %v9493_v4, %v7313_v1  ;;  %v2621_v21 = vadd.f32 %v9493_v4, %v7507_v7  ;;  %v1270_v44 = vpop.f32.mrb[57].mxu0  ;;  %v2615_v11 = vpop.f32.mrb[57].mxu1  ;;  %7667 = vmatmul.mubr.msk.f32.gmra.mrb[162].mxu0 %vm535_vm1, %v210_v14  ;;  %7861 = vmatmul.mubr.msk.f32.gmra.mrb[162].mxu1 %vm535_vm1, %v242_v9  ;;  %v244_v14 = vld [vmem:[%s11053_s0 + $0x728] sm:$0xff]  ;;  %v213_v26 = vld [vmem:[%s11053_s0 + $0x630] sm:$0xff] }
 0x14a   :  { %v9619_v25 = vadd.f32 %v3028_v60, %v1683_v55  ;;  %v1271_v52 = vadd.f32 %v9493_v4, %v1270_v44  ;;  %v2616_v23 = vadd.f32 %v9493_v4, %v2615_v11  ;;  %7669 = vmatprep.mubr.msk.f32.mxu0 %vm535_vm1, %v211_v35  ;;  %7863 = vmatprep.mubr.msk.f32.mxu1 %vm535_vm1, %v243_v36  ;;  %v245_v35 = vld [vmem:[%s11053_s0 + $0x730] sm:$0xff] }
 0x14b   :  { %11069 = vst [vmem:[#allocation17_spill] sm:$0xff] %v9613_v49  ;;  %v1686_v48 = vmax.f32 %v1276_v41, 0.0  ;;  %v3031_v9 = vmax.f32 %v2621_v21, 0.0 }
 0x14c   :  { %11070 = vst [vmem:[#allocation18_spill] sm:$0xff] %v9619_v25  ;;  %v1685_v55 = vmax.f32 %v1271_v52, 0.0  ;;  %v3030_v60 = vmax.f32 %v2616_v23, 0.0  ;;  %v7316_v1 = vpop.f32.mrb[58].mxu0  ;;  %v7510_v7 = vpop.f32.mrb[58].mxu1  ;;  %v214_v23 = vld [vmem:[%s11053_s0 + $0x638] sm:$0xff] }
 0x14d   :  { %v9637_v44 = vadd.f32 %v3031_v9, %v1686_v48  ;;  %v1286_v36 = vadd.f32 %v9493_v4, %v7316_v1  ;;  %v2631_v11 = vadd.f32 %v9493_v4, %v7510_v7  ;;  %v1280_v41 = vpop.f32.mrb[59].mxu0  ;;  %v2625_v21 = vpop.f32.mrb[59].mxu1  ;;  %7670 = vmatmul.mubr.msk.f32.gmra.mrb[164].mxu0 %vm535_vm1, %v212_v10  ;;  %7864 = vmatmul.mubr.msk.f32.gmra.mrb[164].mxu1 %vm535_vm1, %v244_v14  ;;  %v246_v10 = vld [vmem:[%s11053_s0 + $0x738] sm:$0xff]  ;;  %v215_v9 = vld [vmem:[%s11053_s0 + $0x640] sm:$0xff] }
 0x14e   :  { %v9643_v25 = vadd.f32 %v3030_v60, %v1685_v55  ;;  %v1281_v49 = vadd.f32 %v9493_v4, %v1280_v41  ;;  %v2626_v52 = vadd.f32 %v9493_v4, %v2625_v21  ;;  %7672 = vmatprep.mubr.msk.f32.mxu0 %vm535_vm1, %v213_v26  ;;  %7866 = vmatprep.mubr.msk.f32.mxu1 %vm535_vm1, %v245_v35  ;;  %v247_v26 = vld [vmem:[%s11053_s0 + $0x740] sm:$0xff] }
 0x14f   :  { %11071 = vst [vmem:[#allocation19_spill] sm:$0xff] %v9637_v44  ;;  %v1688_v48 = vmax.f32 %v1286_v36, 0.0  ;;  %v3033_v14 = vmax.f32 %v2631_v11, 0.0 }
 0x150   :  { %11072 = vst [vmem:[#allocation20_spill] sm:$0xff] %v9643_v25  ;;  %v1687_v55 = vmax.f32 %v1281_v49, 0.0  ;;  %v3032_v60 = vmax.f32 %v2626_v52, 0.0  ;;  %v7319_v1 = vpop.f32.mrb[60].mxu0  ;;  %v7513_v7 = vpop.f32.mrb[60].mxu1  ;;  %v216_v52 = vld [vmem:[%s11053_s0 + $0x648] sm:$0xff] }
 0x151   :  { %v9661_v41 = vadd.f32 %v3033_v14, %v1688_v48  ;;  %v1296_v35 = vadd.f32 %v9493_v4, %v7319_v1  ;;  %v2641_v21 = vadd.f32 %v9493_v4, %v7513_v7  ;;  %v1290_v36 = vpop.f32.mrb[61].mxu0  ;;  %v2635_v11 = vpop.f32.mrb[61].mxu1  ;;  %7673 = vmatmul.mubr.msk.f32.gmra.mrb[166].mxu0 %vm535_vm1, %v214_v23  ;;  %7867 = vmatmul.mubr.msk.f32.gmra.mrb[166].mxu1 %vm535_vm1, %v246_v10  ;;  %v248_v23 = vld [vmem:[%s11053_s0 + $0x748] sm:$0xff]  ;;  %v217_v14 = vld [vmem:[%s11053_s0 + $0x650] sm:$0xff] }
 0x152   :  { %v9667_v25 = vadd.f32 %v3032_v60, %v1687_v55  ;;  %v1291_v44 = vadd.f32 %v9493_v4, %v1290_v36  ;;  %v2636_v49 = vadd.f32 %v9493_v4, %v2635_v11  ;;  %7675 = vmatprep.mubr.msk.f32.mxu0 %vm535_vm1, %v215_v9  ;;  %7869 = vmatprep.mubr.msk.f32.mxu1 %vm535_vm1, %v247_v26  ;;  %v249_v9 = vld [vmem:[%s11053_s0 + $0x750] sm:$0xff] }
 0x153   :  { %11073 = vst [vmem:[#allocation21_spill] sm:$0xff] %v9661_v41  ;;  %v1690_v48 = vmax.f32 %v1296_v35, 0.0  ;;  %v3035_v10 = vmax.f32 %v2641_v21, 0.0 }
 0x154   :  { %11074 = vst [vmem:[#allocation22_spill] sm:$0xff] %v9667_v25  ;;  %v1689_v55 = vmax.f32 %v1291_v44, 0.0  ;;  %v3034_v60 = vmax.f32 %v2636_v49, 0.0  ;;  %v7322_v1 = vpop.f32.mrb[62].mxu0  ;;  %v7516_v7 = vpop.f32.mrb[62].mxu1  ;;  %v218_v49 = vld [vmem:[%s11053_s0 + $0x658] sm:$0xff] }
 0x155   :  { %v9685_v36 = vadd.f32 %v3035_v10, %v1690_v48  ;;  %v1306_v26 = vadd.f32 %v9493_v4, %v7322_v1  ;;  %v2651_v11 = vadd.f32 %v9493_v4, %v7516_v7  ;;  %v1300_v35 = vpop.f32.mrb[63].mxu0  ;;  %v2645_v21 = vpop.f32.mrb[63].mxu1  ;;  %7676 = vmatmul.mubr.msk.f32.gmra.mrb[168].mxu0 %vm535_vm1, %v216_v52  ;;  %7870 = vmatmul.mubr.msk.f32.gmra.mrb[168].mxu1 %vm535_vm1, %v248_v23  ;;  %v250_v52 = vld [vmem:[%s11053_s0 + $0x758] sm:$0xff]  ;;  %v219_v10 = vld [vmem:[%s11053_s0 + $0x660] sm:$0xff] }
 0x156   :  { %v9691_v25 = vadd.f32 %v3034_v60, %v1689_v55  ;;  %v1301_v41 = vadd.f32 %v9493_v4, %v1300_v35  ;;  %v2646_v44 = vadd.f32 %v9493_v4, %v2645_v21  ;;  %7678 = vmatprep.mubr.msk.f32.mxu0 %vm535_vm1, %v217_v14  ;;  %7872 = vmatprep.mubr.msk.f32.mxu1 %vm535_vm1, %v249_v9  ;;  %v251_v14 = vld [vmem:[%s11053_s0 + $0x760] sm:$0xff] }
 0x157   :  { %11075 = vst [vmem:[#allocation23_spill] sm:$0xff] %v9685_v36  ;;  %v1692_v48 = vmax.f32 %v1306_v26, 0.0  ;;  %v3037_v23 = vmax.f32 %v2651_v11, 0.0 }
 0x158   :  { %11076 = vst [vmem:[#allocation24_spill] sm:$0xff] %v9691_v25  ;;  %v1691_v55 = vmax.f32 %v1301_v41, 0.0  ;;  %v3036_v60 = vmax.f32 %v2646_v44, 0.0  ;;  %v7325_v1 = vpop.f32.mrb[64].mxu0  ;;  %v7519_v7 = vpop.f32.mrb[64].mxu1  ;;  %v220_v44 = vld [vmem:[%s11053_s0 + $0x668] sm:$0xff] }
 0x159   :  { %v9709_v35 = vadd.f32 %v3037_v23, %v1692_v48  ;;  %v1316_v9 = vadd.f32 %v9493_v4, %v7325_v1  ;;  %v2661_v21 = vadd.f32 %v9493_v4, %v7519_v7  ;;  %v1310_v26 = vpop.f32.mrb[65].mxu0  ;;  %v2655_v11 = vpop.f32.mrb[65].mxu1  ;;  %7679 = vmatmul.mubr.msk.f32.gmra.mrb[170].mxu0 %vm535_vm1, %v218_v49  ;;  %7873 = vmatmul.mubr.msk.f32.gmra.mrb[170].mxu1 %vm535_vm1, %v250_v52  ;;  %v252_v49 = vld [vmem:[%s11053_s0 + $0x768] sm:$0xff]  ;;  %v221_v23 = vld [vmem:[%s11053_s0 + $0x670] sm:$0xff] }
 0x15a   :  { %v9715_v25 = vadd.f32 %v3036_v60, %v1691_v55  ;;  %v1311_v36 = vadd.f32 %v9493_v4, %v1310_v26  ;;  %v2656_v41 = vadd.f32 %v9493_v4, %v2655_v11  ;;  %7681 = vmatprep.mubr.msk.f32.mxu0 %vm535_vm1, %v219_v10  ;;  %7875 = vmatprep.mubr.msk.f32.mxu1 %vm535_vm1, %v251_v14  ;;  %v253_v10 = vld [vmem:[%s11053_s0 + $0x770] sm:$0xff] }
 0x15b   :  { %11077 = vst [vmem:[#allocation25_spill] sm:$0xff] %v9709_v35  ;;  %v1694_v48 = vmax.f32 %v1316_v9, 0.0  ;;  %v3039_v52 = vmax.f32 %v2661_v21, 0.0 }
 0x15c   :  { %11078 = vst [vmem:[#allocation26_spill] sm:$0xff] %v9715_v25  ;;  %v1693_v55 = vmax.f32 %v1311_v36, 0.0  ;;  %v3038_v60 = vmax.f32 %v2656_v41, 0.0  ;;  %v7328_v1 = vpop.f32.mrb[66].mxu0  ;;  %v7522_v7 = vpop.f32.mrb[66].mxu1  ;;  %v222_v41 = vld [vmem:[%s11053_s0 + $0x678] sm:$0xff] }
 0x15d   :  { %v9733_v26 = vadd.f32 %v3039_v52, %v1694_v48  ;;  %v1326_v14 = vadd.f32 %v9493_v4, %v7328_v1  ;;  %v2671_v11 = vadd.f32 %v9493_v4, %v7522_v7  ;;  %v1320_v9 = vpop.f32.mrb[67].mxu0  ;;  %v2665_v21 = vpop.f32.mrb[67].mxu1  ;;  %7682 = vmatmul.mubr.msk.f32.gmra.mrb[172].mxu0 %vm535_vm1, %v220_v44  ;;  %7876 = vmatmul.mubr.msk.f32.gmra.mrb[172].mxu1 %vm535_vm1, %v252_v49  ;;  %v254_v44 = vld [vmem:[%s11053_s0 + $0x778] sm:$0xff]  ;;  %v223_v52 = vld [vmem:[%s11053_s0 + $0x680] sm:$0xff] }
 0x15e   :  { %v9739_v25 = vadd.f32 %v3038_v60, %v1693_v55  ;;  %v1321_v35 = vadd.f32 %v9493_v4, %v1320_v9  ;;  %v2666_v36 = vadd.f32 %v9493_v4, %v2665_v21  ;;  %7684 = vmatprep.mubr.msk.f32.mxu0 %vm535_vm1, %v221_v23  ;;  %7878 = vmatprep.mubr.msk.f32.mxu1 %vm535_vm1, %v253_v10  ;;  %v255_v23 = vld [vmem:[%s11053_s0 + $0x780] sm:$0xff] }
 0x15f   :  { %11079 = vst [vmem:[#allocation27_spill] sm:$0xff] %v9733_v26  ;;  %v1696_v48 = vmax.f32 %v1326_v14, 0.0  ;;  %v3041_v49 = vmax.f32 %v2671_v11, 0.0 }
 0x160   :  { %11080 = vst [vmem:[#allocation28_spill] sm:$0xff] %v9739_v25  ;;  %v1695_v55 = vmax.f32 %v1321_v35, 0.0  ;;  %v3040_v60 = vmax.f32 %v2666_v36, 0.0  ;;  %v7331_v1 = vpop.f32.mrb[68].mxu0  ;;  %v7525_v7 = vpop.f32.mrb[68].mxu1  ;;  %v224_v36 = vld [vmem:[%s11053_s0 + $0x688] sm:$0xff] }
 0x161   :  { %v9757_v9 = vadd.f32 %v3041_v49, %v1696_v48  ;;  %v1336_v10 = vadd.f32 %v9493_v4, %v7331_v1  ;;  %v2681_v21 = vadd.f32 %v9493_v4, %v7525_v7  ;;  %v1330_v14 = vpop.f32.mrb[69].mxu0  ;;  %v2675_v11 = vpop.f32.mrb[69].mxu1  ;;  %7685 = vmatmul.mubr.msk.f32.gmra.mrb[174].mxu0 %vm535_vm1, %v222_v41  ;;  %7879 = vmatmul.mubr.msk.f32.gmra.mrb[174].mxu1 %vm535_vm1, %v254_v44  ;;  %v256_v41 = vld [vmem:[%s11053_s0 + $0x788] sm:$0xff]  ;;  %v225_v49 = vld [vmem:[%s11053_s0 + $0x690] sm:$0xff] }
 0x162   :  { %v9763_v25 = vadd.f32 %v3040_v60, %v1695_v55  ;;  %v1331_v26 = vadd.f32 %v9493_v4, %v1330_v14  ;;  %v2676_v35 = vadd.f32 %v9493_v4, %v2675_v11  ;;  %7687 = vmatprep.mubr.msk.f32.mxu0 %vm535_vm1, %v223_v52  ;;  %7881 = vmatprep.mubr.msk.f32.mxu1 %vm535_vm1, %v255_v23  ;;  %v257_v52 = vld [vmem:[%s11053_s0 + $0x790] sm:$0xff] }
 0x163   :  { %11081 = vst [vmem:[#allocation29_spill] sm:$0xff] %v9757_v9  ;;  %v1698_v48 = vmax.f32 %v1336_v10, 0.0  ;;  %v3043_v44 = vmax.f32 %v2681_v21, 0.0 }
 0x164   :  { %11082 = vst [vmem:[#allocation30_spill] sm:$0xff] %v9763_v25  ;;  %v1697_v55 = vmax.f32 %v1331_v26, 0.0  ;;  %v3042_v60 = vmax.f32 %v2676_v35, 0.0  ;;  %v7334_v1 = vpop.f32.mrb[70].mxu0  ;;  %v7528_v7 = vpop.f32.mrb[70].mxu1  ;;  %v226_v35 = vld [vmem:[%s11053_s0 + $0x698] sm:$0xff] }
 0x165   :  { %v9781_v14 = vadd.f32 %v3043_v44, %v1698_v48  ;;  %v1346_v23 = vadd.f32 %v9493_v4, %v7334_v1  ;;  %v2691_v11 = vadd.f32 %v9493_v4, %v7528_v7  ;;  %v1340_v10 = vpop.f32.mrb[71].mxu0  ;;  %v2685_v21 = vpop.f32.mrb[71].mxu1  ;;  %7688 = vmatmul.mubr.msk.f32.gmra.mrb[176].mxu0 %vm535_vm1, %v224_v36  ;;  %7882 = vmatmul.mubr.msk.f32.gmra.mrb[176].mxu1 %vm535_vm1, %v256_v41  ;;  %v258_v36 = vld [vmem:[%s11053_s0 + $0x798] sm:$0xff]  ;;  %v227_v44 = vld [vmem:[%s11053_s0 + $0x6a0] sm:$0xff] }
 0x166   :  { %v9787_v25 = vadd.f32 %v3042_v60, %v1697_v55  ;;  %v1341_v9 = vadd.f32 %v9493_v4, %v1340_v10  ;;  %v2686_v26 = vadd.f32 %v9493_v4, %v2685_v21  ;;  %7690 = vmatprep.mubr.msk.f32.mxu0 %vm535_vm1, %v225_v49  ;;  %7884 = vmatprep.mubr.msk.f32.mxu1 %vm535_vm1, %v257_v52  ;;  %v259_v49 = vld [vmem:[%s11053_s0 + $0x7a0] sm:$0xff] }
 0x167   :  { %11083 = vst [vmem:[#allocation31_spill] sm:$0xff] %v9781_v14  ;;  %v1700_v48 = vmax.f32 %v1346_v23, 0.0  ;;  %v3045_v41 = vmax.f32 %v2691_v11, 0.0 }
 0x168   :  { %11084 = vst [vmem:[#allocation32_spill] sm:$0xff] %v9787_v25  ;;  %v1699_v55 = vmax.f32 %v1341_v9, 0.0  ;;  %v3044_v60 = vmax.f32 %v2686_v26, 0.0  ;;  %v7337_v1 = vpop.f32.mrb[72].mxu0  ;;  %v7531_v7 = vpop.f32.mrb[72].mxu1  ;;  %v228_v26 = vld [vmem:[%s11053_s0 + $0x6a8] sm:$0xff] }
 0x169   :  { %v9805_v10 = vadd.f32 %v3045_v41, %v1700_v48  ;;  %v1356_v52 = vadd.f32 %v9493_v4, %v7337_v1  ;;  %v2701_v21 = vadd.f32 %v9493_v4, %v7531_v7  ;;  %v1350_v23 = vpop.f32.mrb[73].mxu0  ;;  %v2695_v11 = vpop.f32.mrb[73].mxu1  ;;  %7691 = vmatmul.mubr.msk.f32.gmra.mrb[178].mxu0 %vm535_vm1, %v226_v35  ;;  %7885 = vmatmul.mubr.msk.f32.gmra.mrb[178].mxu1 %vm535_vm1, %v258_v36  ;;  %v260_v35 = vld [vmem:[%s11053_s0 + $0x7a8] sm:$0xff]  ;;  %v229_v41 = vld [vmem:[%s11053_s0 + $0x6b0] sm:$0xff] }
 0x16a   :  { %v9811_v25 = vadd.f32 %v3044_v60, %v1699_v55  ;;  %v1351_v14 = vadd.f32 %v9493_v4, %v1350_v23  ;;  %v2696_v9 = vadd.f32 %v9493_v4, %v2695_v11  ;;  %7693 = vmatprep.mubr.msk.f32.mxu0 %vm535_vm1, %v227_v44  ;;  %7887 = vmatprep.mubr.msk.f32.mxu1 %vm535_vm1, %v259_v49  ;;  %v261_v44 = vld [vmem:[%s11053_s0 + $0x7b0] sm:$0xff] }
 0x16b   :  { %11085 = vst [vmem:[#allocation33_spill] sm:$0xff] %v9805_v10  ;;  %v1702_v48 = vmax.f32 %v1356_v52, 0.0  ;;  %v3047_v36 = vmax.f32 %v2701_v21, 0.0 }
 0x16c   :  { %11086 = vst [vmem:[#allocation34_spill] sm:$0xff] %v9811_v25  ;;  %v1701_v55 = vmax.f32 %v1351_v14, 0.0  ;;  %v3046_v60 = vmax.f32 %v2696_v9, 0.0  ;;  %v7340_v1 = vpop.f32.mrb[74].mxu0  ;;  %v7534_v7 = vpop.f32.mrb[74].mxu1  ;;  %v230_v9 = vld [vmem:[%s11053_s0 + $0x6b8] sm:$0xff] }
 0x16d   :  { %v9829_v23 = vadd.f32 %v3047_v36, %v1702_v48  ;;  %v1366_v49 = vadd.f32 %v9493_v4, %v7340_v1  ;;  %v2711_v11 = vadd.f32 %v9493_v4, %v7534_v7  ;;  %v1360_v52 = vpop.f32.mrb[75].mxu0  ;;  %v2705_v21 = vpop.f32.mrb[75].mxu1  ;;  %7694 = vmatmul.mubr.msk.f32.gmra.mrb[180].mxu0 %vm535_vm1, %v228_v26  ;;  %7888 = vmatmul.mubr.msk.f32.gmra.mrb[180].mxu1 %vm535_vm1, %v260_v35  ;;  %v262_v26 = vld [vmem:[%s11053_s0 + $0x7b8] sm:$0xff]  ;;  %v231_v36 = vld [vmem:[%s11053_s0 + $0x6c0] sm:$0xff] }
 0x16e   :  { %v9835_v25 = vadd.f32 %v3046_v60, %v1701_v55  ;;  %v1361_v10 = vadd.f32 %v9493_v4, %v1360_v52  ;;  %v2706_v14 = vadd.f32 %v9493_v4, %v2705_v21  ;;  %7696 = vmatprep.mubr.msk.f32.mxu0 %vm535_vm1, %v229_v41  ;;  %7890 = vmatprep.mubr.msk.f32.mxu1 %vm535_vm1, %v261_v44  ;;  %v263_v41 = vld [vmem:[%s11053_s0 + $0x7c0] sm:$0xff] }
 0x16f   :  { %11087 = vst [vmem:[#allocation35_spill] sm:$0xff] %v9829_v23  ;;  %v1704_v48 = vmax.f32 %v1366_v49, 0.0  ;;  %v3049_v35 = vmax.f32 %v2711_v11, 0.0 }
 0x170   :  { %11088 = vst [vmem:[#allocation36_spill] sm:$0xff] %v9835_v25  ;;  %v1703_v55 = vmax.f32 %v1361_v10, 0.0  ;;  %v3048_v60 = vmax.f32 %v2706_v14, 0.0  ;;  %v7343_v1 = vpop.f32.mrb[76].mxu0  ;;  %v7537_v7 = vpop.f32.mrb[76].mxu1  ;;  %v232_v14 = vld [vmem:[%s11053_s0 + $0x6c8] sm:$0xff] }
 0x171   :  { %v9853_v52 = vadd.f32 %v3049_v35, %v1704_v48  ;;  %v1376_v44 = vadd.f32 %v9493_v4, %v7343_v1  ;;  %v2721_v21 = vadd.f32 %v9493_v4, %v7537_v7  ;;  %v1370_v49 = vpop.f32.mrb[77].mxu0  ;;  %v2715_v11 = vpop.f32.mrb[77].mxu1  ;;  %7697 = vmatmul.mubr.msk.f32.gmra.mrb[182].mxu0 %vm535_vm1, %v230_v9  ;;  %7891 = vmatmul.mubr.msk.f32.gmra.mrb[182].mxu1 %vm535_vm1, %v262_v26  ;;  %v264_v9 = vld [vmem:[%s11053_s0 + $0x7c8] sm:$0xff]  ;;  %v233_v35 = vld [vmem:[%s11053_s0 + $0x6d0] sm:$0xff] }
 0x172   :  { %v9859_v25 = vadd.f32 %v3048_v60, %v1703_v55  ;;  %v1371_v23 = vadd.f32 %v9493_v4, %v1370_v49  ;;  %v2716_v10 = vadd.f32 %v9493_v4, %v2715_v11  ;;  %7699 = vmatprep.mubr.msk.f32.mxu0 %vm535_vm1, %v231_v36  ;;  %7893 = vmatprep.mubr.msk.f32.mxu1 %vm535_vm1, %v263_v41  ;;  %v265_v36 = vld [vmem:[%s11053_s0 + $0x7d0] sm:$0xff] }
 0x173   :  { %11089 = vst [vmem:[#allocation37_spill] sm:$0xff] %v9853_v52  ;;  %v1706_v48 = vmax.f32 %v1376_v44, 0.0  ;;  %v3051_v26 = vmax.f32 %v2721_v21, 0.0 }
 0x174   :  { %11090 = vst [vmem:[#allocation38_spill] sm:$0xff] %v9859_v25  ;;  %v1705_v55 = vmax.f32 %v1371_v23, 0.0  ;;  %v3050_v60 = vmax.f32 %v2716_v10, 0.0  ;;  %v7346_v1 = vpop.f32.mrb[78].mxu0  ;;  %v7540_v7 = vpop.f32.mrb[78].mxu1  ;;  %v234_v10 = vld [vmem:[%s11053_s0 + $0x6d8] sm:$0xff] }
 0x175   :  { %v9877_v49 = vadd.f32 %v3051_v26, %v1706_v48  ;;  %v1386_v41 = vadd.f32 %v9493_v4, %v7346_v1  ;;  %v2731_v11 = vadd.f32 %v9493_v4, %v7540_v7  ;;  %v1380_v44 = vpop.f32.mrb[79].mxu0  ;;  %v2725_v21 = vpop.f32.mrb[79].mxu1  ;;  %7700 = vmatmul.mubr.msk.f32.gmra.mrb[184].mxu0 %vm535_vm1, %v232_v14  ;;  %7894 = vmatmul.mubr.msk.f32.gmra.mrb[184].mxu1 %vm535_vm1, %v264_v9  ;;  %v266_v14 = vld [vmem:[%s11053_s0 + $0x7d8] sm:$0xff]  ;;  %v235_v26 = vld [vmem:[%s11053_s0 + $0x6e0] sm:$0xff] }
 0x176   :  { %v9883_v25 = vadd.f32 %v3050_v60, %v1705_v55  ;;  %v1381_v52 = vadd.f32 %v9493_v4, %v1380_v44  ;;  %v2726_v23 = vadd.f32 %v9493_v4, %v2725_v21  ;;  %7702 = vmatprep.mubr.msk.f32.mxu0 %vm535_vm1, %v233_v35  ;;  %7896 = vmatprep.mubr.msk.f32.mxu1 %vm535_vm1, %v265_v36  ;;  %v267_v35 = vld [vmem:[%s11053_s0 + $0x7e0] sm:$0xff] }
 0x177   :  { %11091 = vst [vmem:[#allocation39_spill] sm:$0xff] %v9877_v49  ;;  %v1708_v48 = vmax.f32 %v1386_v41, 0.0  ;;  %v3053_v9 = vmax.f32 %v2731_v11, 0.0 }
 0x178   :  { %11092 = vst [vmem:[#allocation40_spill] sm:$0xff] %v9883_v25  ;;  %v1707_v55 = vmax.f32 %v1381_v52, 0.0  ;;  %v3052_v60 = vmax.f32 %v2726_v23, 0.0  ;;  %v7349_v1 = vpop.f32.mrb[80].mxu0  ;;  %v7543_v7 = vpop.f32.mrb[80].mxu1  ;;  %v236_v23 = vld [vmem:[%s11053_s0 + $0x6e8] sm:$0xff] }
 0x179   :  { %v9901_v44 = vadd.f32 %v3053_v9, %v1708_v48  ;;  %v1396_v36 = vadd.f32 %v9493_v4, %v7349_v1  ;;  %v2741_v21 = vadd.f32 %v9493_v4, %v7543_v7  ;;  %v1390_v41 = vpop.f32.mrb[81].mxu0  ;;  %v2735_v11 = vpop.f32.mrb[81].mxu1  ;;  %7703 = vmatmul.mubr.msk.f32.gmra.mrb[186].mxu0 %vm535_vm1, %v234_v10  ;;  %7897 = vmatmul.mubr.msk.f32.gmra.mrb[186].mxu1 %vm535_vm1, %v266_v14  ;;  %v268_v10 = vld [vmem:[%s11053_s0 + $0x7e8] sm:$0xff]  ;;  %v237_v9 = vld [vmem:[%s11053_s0 + $0x6f0] sm:$0xff] }
 0x17a   :  { %v9907_v25 = vadd.f32 %v3052_v60, %v1707_v55  ;;  %v1391_v49 = vadd.f32 %v9493_v4, %v1390_v41  ;;  %v2736_v52 = vadd.f32 %v9493_v4, %v2735_v11  ;;  %7705 = vmatprep.mubr.msk.f32.mxu0 %vm535_vm1, %v235_v26  ;;  %7899 = vmatprep.mubr.msk.f32.mxu1 %vm535_vm1, %v267_v35  ;;  %v269_v26 = vld [vmem:[%s11053_s0 + $0x7f0] sm:$0xff] }
 0x17b   :  { %11093 = vst [vmem:[#allocation41_spill] sm:$0xff] %v9901_v44  ;;  %v1710_v48 = vmax.f32 %v1396_v36, 0.0  ;;  %v3055_v14 = vmax.f32 %v2741_v21, 0.0 }
 0x17c   :  { %11094 = vst [vmem:[#allocation42_spill] sm:$0xff] %v9907_v25  ;;  %v1709_v55 = vmax.f32 %v1391_v49, 0.0  ;;  %v3054_v60 = vmax.f32 %v2736_v52, 0.0  ;;  %v7352_v1 = vpop.f32.mrb[82].mxu0  ;;  %v7546_v7 = vpop.f32.mrb[82].mxu1  ;;  %v238_v52 = vld [vmem:[%s11053_s0 + $0x6f8] sm:$0xff] }
 0x17d   :  { %v9925_v41 = vadd.f32 %v3055_v14, %v1710_v48  ;;  %v1406_v35 = vadd.f32 %v9493_v4, %v7352_v1  ;;  %v2751_v11 = vadd.f32 %v9493_v4, %v7546_v7  ;;  %v1400_v36 = vpop.f32.mrb[83].mxu0  ;;  %v2745_v21 = vpop.f32.mrb[83].mxu1  ;;  %7706 = vmatmul.mubr.msk.f32.gmra.mrb[188].mxu0 %vm535_vm1, %v236_v23  ;;  %7900 = vmatmul.mubr.msk.f32.gmra.mrb[188].mxu1 %vm535_vm1, %v268_v10  ;;  %v270_v23 = vld [vmem:[%s11053_s0 + $0x7f8] sm:$0xff]  ;;  %v335_v14 = vld [vmem:[%s11053_s0 + $0xa00] sm:$0xff] }
 0x17e   :  { %v9931_v25 = vadd.f32 %v3054_v60, %v1709_v55  ;;  %v1401_v44 = vadd.f32 %v9493_v4, %v1400_v36  ;;  %v2746_v49 = vadd.f32 %v9493_v4, %v2745_v21  ;;  %7708 = vmatprep.mubr.msk.f32.mxu0 %vm535_vm1, %v237_v9  ;;  %7902 = vmatprep.mubr.msk.f32.mxu1 %vm535_vm1, %v269_v26  ;;  %v367_v9 = vld [vmem:[%s11053_s0 + $0xb00] sm:$0xff] }
 0x17f   :  { %11095 = vst [vmem:[#allocation43_spill] sm:$0xff] %v9925_v41  ;;  %v1712_v48 = vmax.f32 %v1406_v35, 0.0  ;;  %v3057_v10 = vmax.f32 %v2751_v11, 0.0 }
 0x180   :  { %11096 = vst [vmem:[#allocation44_spill] sm:$0xff] %v9931_v25  ;;  %v1711_v55 = vmax.f32 %v1401_v44, 0.0  ;;  %v3056_v60 = vmax.f32 %v2746_v49, 0.0  ;;  %v7355_v1 = vpop.f32.mrb[84].mxu0  ;;  %v7549_v7 = vpop.f32.mrb[84].mxu1  ;;  %v336_v49 = vld [vmem:[%s11053_s0 + $0xa08] sm:$0xff] }
 0x181   :  { %v9949_v36 = vadd.f32 %v3057_v10, %v1712_v48  ;;  %v1416_v26 = vadd.f32 %v9493_v4, %v7355_v1  ;;  %v2761_v21 = vadd.f32 %v9493_v4, %v7549_v7  ;;  %v1410_v35 = vpop.f32.mrb[85].mxu0  ;;  %v2755_v11 = vpop.f32.mrb[85].mxu1  ;;  %7709 = vmatmul.mubr.msk.f32.gmra.mrb[190].mxu0 %vm535_vm1, %v238_v52  ;;  %7903 = vmatmul.mubr.msk.f32.gmra.mrb[190].mxu1 %vm535_vm1, %v270_v23  ;;  %v368_v52 = vld [vmem:[%s11053_s0 + $0xb08] sm:$0xff]  ;;  %v337_v10 = vld [vmem:[%s11053_s0 + $0xa10] sm:$0xff] }
 0x182   :  { %v9955_v25 = vadd.f32 %v3056_v60, %v1711_v55  ;;  %v1411_v41 = vadd.f32 %v9493_v4, %v1410_v35  ;;  %v2756_v44 = vadd.f32 %v9493_v4, %v2755_v11  ;;  %7711 = vmatprep.mubr.msk.f32.mxu0 %vm535_vm1, %v335_v14  ;;  %7905 = vmatprep.mubr.msk.f32.mxu1 %vm535_vm1, %v367_v9  ;;  %v369_v14 = vld [vmem:[%s11053_s0 + $0xb10] sm:$0xff] }
 0x183   :  { %11097 = vst [vmem:[#allocation45_spill] sm:$0xff] %v9949_v36  ;;  %v1714_v48 = vmax.f32 %v1416_v26, 0.0  ;;  %v3059_v23 = vmax.f32 %v2761_v21, 0.0 }
 0x184   :  { %11098 = vst [vmem:[#allocation46_spill] sm:$0xff] %v9955_v25  ;;  %v1713_v55 = vmax.f32 %v1411_v41, 0.0  ;;  %v3058_v60 = vmax.f32 %v2756_v44, 0.0  ;;  %v7358_v1 = vpop.f32.mrb[86].mxu0  ;;  %v7552_v7 = vpop.f32.mrb[86].mxu1  ;;  %v338_v44 = vld [vmem:[%s11053_s0 + $0xa18] sm:$0xff] }
 0x185   :  { %v9973_v35 = vadd.f32 %v3059_v23, %v1714_v48  ;;  %v1426_v9 = vadd.f32 %v9493_v4, %v7358_v1  ;;  %v2771_v11 = vadd.f32 %v9493_v4, %v7552_v7  ;;  %v1420_v26 = vpop.f32.mrb[87].mxu0  ;;  %v2765_v21 = vpop.f32.mrb[87].mxu1  ;;  %7712 = vmatmul.mubr.msk.f32.gmra.mrb[192].mxu0 %vm535_vm1, %v336_v49  ;;  %7906 = vmatmul.mubr.msk.f32.gmra.mrb[192].mxu1 %vm535_vm1, %v368_v52  ;;  %v370_v49 = vld [vmem:[%s11053_s0 + $0xb18] sm:$0xff]  ;;  %v339_v23 = vld [vmem:[%s11053_s0 + $0xa20] sm:$0xff] }
 0x186   :  { %v9979_v25 = vadd.f32 %v3058_v60, %v1713_v55  ;;  %v1421_v36 = vadd.f32 %v9493_v4, %v1420_v26  ;;  %v2766_v41 = vadd.f32 %v9493_v4, %v2765_v21  ;;  %7714 = vmatprep.mubr.msk.f32.mxu0 %vm535_vm1, %v337_v10  ;;  %7908 = vmatprep.mubr.msk.f32.mxu1 %vm535_vm1, %v369_v14  ;;  %v371_v10 = vld [vmem:[%s11053_s0 + $0xb20] sm:$0xff] }
 0x187   :  { %11099 = vst [vmem:[#allocation47_spill] sm:$0xff] %v9973_v35  ;;  %v1716_v48 = vmax.f32 %v1426_v9, 0.0  ;;  %v3061_v52 = vmax.f32 %v2771_v11, 0.0 }
 0x188   :  { %11100 = vst [vmem:[#allocation48_spill] sm:$0xff] %v9979_v25  ;;  %v1715_v55 = vmax.f32 %v1421_v36, 0.0  ;;  %v3060_v60 = vmax.f32 %v2766_v41, 0.0  ;;  %v7361_v1 = vpop.f32.mrb[88].mxu0  ;;  %v7555_v7 = vpop.f32.mrb[88].mxu1  ;;  %v340_v41 = vld [vmem:[%s11053_s0 + $0xa28] sm:$0xff] }
 0x189   :  { %v9997_v26 = vadd.f32 %v3061_v52, %v1716_v48  ;;  %v1436_v14 = vadd.f32 %v9493_v4, %v7361_v1  ;;  %v2781_v21 = vadd.f32 %v9493_v4, %v7555_v7  ;;  %v1430_v9 = vpop.f32.mrb[89].mxu0  ;;  %v2775_v11 = vpop.f32.mrb[89].mxu1  ;;  %7715 = vmatmul.mubr.msk.f32.gmra.mrb[194].mxu0 %vm535_vm1, %v338_v44  ;;  %7909 = vmatmul.mubr.msk.f32.gmra.mrb[194].mxu1 %vm535_vm1, %v370_v49  ;;  %v372_v44 = vld [vmem:[%s11053_s0 + $0xb28] sm:$0xff]  ;;  %v341_v52 = vld [vmem:[%s11053_s0 + $0xa30] sm:$0xff] }
 0x18a   :  { %v10003_v25 = vadd.f32 %v3060_v60, %v1715_v55  ;;  %v1431_v35 = vadd.f32 %v9493_v4, %v1430_v9  ;;  %v2776_v36 = vadd.f32 %v9493_v4, %v2775_v11  ;;  %7717 = vmatprep.mubr.msk.f32.mxu0 %vm535_vm1, %v339_v23  ;;  %7911 = vmatprep.mubr.msk.f32.mxu1 %vm535_vm1, %v371_v10  ;;  %v373_v23 = vld [vmem:[%s11053_s0 + $0xb30] sm:$0xff] }
 0x18b   :  { %11101 = vst [vmem:[#allocation49_spill] sm:$0xff] %v9997_v26  ;;  %v1718_v48 = vmax.f32 %v1436_v14, 0.0  ;;  %v3063_v49 = vmax.f32 %v2781_v21, 0.0 }
 0x18c   :  { %11102 = vst [vmem:[#allocation50_spill] sm:$0xff] %v10003_v25  ;;  %v1717_v55 = vmax.f32 %v1431_v35, 0.0  ;;  %v3062_v60 = vmax.f32 %v2776_v36, 0.0  ;;  %v7364_v1 = vpop.f32.mrb[90].mxu0  ;;  %v7558_v7 = vpop.f32.mrb[90].mxu1  ;;  %v342_v36 = vld [vmem:[%s11053_s0 + $0xa38] sm:$0xff] }
 0x18d   :  { %v10021_v9 = vadd.f32 %v3063_v49, %v1718_v48  ;;  %v1446_v10 = vadd.f32 %v9493_v4, %v7364_v1  ;;  %v2791_v11 = vadd.f32 %v9493_v4, %v7558_v7  ;;  %v1440_v14 = vpop.f32.mrb[91].mxu0  ;;  %v2785_v21 = vpop.f32.mrb[91].mxu1  ;;  %7718 = vmatmul.mubr.msk.f32.gmra.mrb[196].mxu0 %vm535_vm1, %v340_v41  ;;  %7912 = vmatmul.mubr.msk.f32.gmra.mrb[196].mxu1 %vm535_vm1, %v372_v44  ;;  %v374_v41 = vld [vmem:[%s11053_s0 + $0xb38] sm:$0xff]  ;;  %v343_v49 = vld [vmem:[%s11053_s0 + $0xa40] sm:$0xff] }
 0x18e   :  { %v10027_v25 = vadd.f32 %v3062_v60, %v1717_v55  ;;  %v1441_v26 = vadd.f32 %v9493_v4, %v1440_v14  ;;  %v2786_v35 = vadd.f32 %v9493_v4, %v2785_v21  ;;  %7720 = vmatprep.mubr.msk.f32.mxu0 %vm535_vm1, %v341_v52  ;;  %7914 = vmatprep.mubr.msk.f32.mxu1 %vm535_vm1, %v373_v23  ;;  %v375_v52 = vld [vmem:[%s11053_s0 + $0xb40] sm:$0xff] }
 0x18f   :  { %11103 = vst [vmem:[#allocation51_spill] sm:$0xff] %v10021_v9  ;;  %v1720_v48 = vmax.f32 %v1446_v10, 0.0  ;;  %v3065_v44 = vmax.f32 %v2791_v11, 0.0 }
 0x190   :  { %11104 = vst [vmem:[#allocation52_spill] sm:$0xff] %v10027_v25  ;;  %v1719_v55 = vmax.f32 %v1441_v26, 0.0  ;;  %v3064_v60 = vmax.f32 %v2786_v35, 0.0  ;;  %v7367_v1 = vpop.f32.mrb[92].mxu0  ;;  %v7561_v7 = vpop.f32.mrb[92].mxu1 }
 0x191   :  { %v10045_v14 = vadd.f32 %v3065_v44, %v1720_v48  ;;  %v1456_v23 = vadd.f32 %v9493_v4, %v7367_v1  ;;  %v2801_v21 = vadd.f32 %v9493_v4, %v7561_v7  ;;  %v1450_v10 = vpop.f32.mrb[93].mxu0  ;;  %v2795_v11 = vpop.f32.mrb[93].mxu1  ;;  %7721 = vmatmul.mubr.msk.f32.gmra.mrb[198].mxu0 %vm535_vm1, %v342_v36  ;;  %7915 = vmatmul.mubr.msk.f32.gmra.mrb[198].mxu1 %vm535_vm1, %v374_v41  ;;  %v10056_v26 = vld [vmem:[%s11055_s2] ss:$0 sm:$0xff]  ;;  %v344_v4 = vld [vmem:[%s11053_s0 + $0xa48] sm:$0xff] }
 0x192   :  { %v10051_v25 = vadd.f32 %v3064_v60, %v1719_v55  ;;  %v1451_v35 = vadd.f32 %v10056_v26, %v1450_v10  ;;  %v2796_v48 = vadd.f32 %v10056_v26, %v2795_v11  ;;  %7723 = vmatprep.mubr.msk.f32.mxu0 %vm535_vm1, %v343_v49  ;;  %7917 = vmatprep.mubr.msk.f32.mxu1 %vm535_vm1, %v375_v52  ;;  %v376_v36 = vld [vmem:[%s11053_s0 + $0xb48] sm:$0xff]  ;;  %v345_v55 = vld [vmem:[%s11053_s0 + $0xa50] sm:$0xff] }
 0x193   :  { %11105 = vst [vmem:[#allocation53_spill] sm:$0xff] %v10045_v14  ;;  %v1722_v41 = vmax.f32 %v1456_v23, 0.0  ;;  %v3067_v44 = vmax.f32 %v2801_v21, 0.0  ;;  %v377_v49 = vld [vmem:[%s11053_s0 + $0xb50] sm:$0xff] }
 0x194   :  { %11106 = vst [vmem:[#allocation54_spill] sm:$0xff] %v10051_v25  ;;  %v1721_v60 = vmax.f32 %v1451_v35, 0.0  ;;  %v3066_v1 = vmax.f32 %v2796_v48, 0.0  ;;  %v7370_v7 = vpop.f32.mrb[94].mxu0  ;;  %v7564_v10 = vpop.f32.mrb[94].mxu1  ;;  %v346_v48 = vld [vmem:[%s11053_s0 + $0xa58] sm:$0xff] }
 0x195   :  { %v10074_v11 = vadd.f32 %v3067_v44, %v1722_v41  ;;  %v1466_v52 = vadd.f32 %v10056_v26, %v7370_v7  ;;  %v2811_v25 = vadd.f32 %v10056_v26, %v7564_v10  ;;  %v1460_v23 = vpop.f32.mrb[95].mxu0  ;;  %v2805_v21 = vpop.f32.mrb[95].mxu1  ;;  %7724 = vmatmul.mubr.msk.f32.gmra.mrb[200].mxu0 %vm535_vm1, %v344_v4  ;;  %7918 = vmatmul.mubr.msk.f32.gmra.mrb[200].mxu1 %vm535_vm1, %v376_v36  ;;  %v378_v4 = vld [vmem:[%s11053_s0 + $0xb58] sm:$0xff]  ;;  %v347_v44 = vld [vmem:[%s11053_s0 + $0xa60] sm:$0xff] }
 0x196   :  { %v10080_v14 = vadd.f32 %v3066_v1, %v1721_v60  ;;  %v1461_v9 = vadd.f32 %v10056_v26, %v1460_v23  ;;  %v2806_v35 = vadd.f32 %v10056_v26, %v2805_v21  ;;  %7726 = vmatprep.mubr.msk.f32.mxu0 %vm535_vm1, %v345_v55  ;;  %7920 = vmatprep.mubr.msk.f32.mxu1 %vm535_vm1, %v377_v49  ;;  %v379_v55 = vld [vmem:[%s11053_s0 + $0xb60] sm:$0xff] }
 0x197   :  { %11107 = vst [vmem:[#allocation55_spill] sm:$0xff] %v10074_v11  ;;  %v1724_v41 = vmax.f32 %v1466_v52, 0.0  ;;  %v3069_v36 = vmax.f32 %v2811_v25, 0.0 }
 0x198   :  { %11108 = vst [vmem:[#allocation56_spill] sm:$0xff] %v10080_v14  ;;  %v1723_v60 = vmax.f32 %v1461_v9, 0.0  ;;  %v3068_v1 = vmax.f32 %v2806_v35, 0.0  ;;  %v7373_v7 = vpop.f32.mrb[96].mxu0  ;;  %v7567_v10 = vpop.f32.mrb[96].mxu1  ;;  %v348_v35 = vld [vmem:[%s11053_s0 + $0xa68] sm:$0xff] }
 0x199   :  { %v10098_v23 = vadd.f32 %v3069_v36, %v1724_v41  ;;  %v1476_v49 = vadd.f32 %v10056_v26, %v7373_v7  ;;  %v2821_v21 = vadd.f32 %v10056_v26, %v7567_v10  ;;  %v1470_v52 = vpop.f32.mrb[97].mxu0  ;;  %v2815_v25 = vpop.f32.mrb[97].mxu1  ;;  %7727 = vmatmul.mubr.msk.f32.gmra.mrb[202].mxu0 %vm535_vm1, %v346_v48  ;;  %7921 = vmatmul.mubr.msk.f32.gmra.mrb[202].mxu1 %vm535_vm1, %v378_v4  ;;  %v380_v48 = vld [vmem:[%s11053_s0 + $0xb68] sm:$0xff]  ;;  %v349_v36 = vld [vmem:[%s11053_s0 + $0xa70] sm:$0xff] }
 0x19a   :  { %v10104_v14 = vadd.f32 %v3068_v1, %v1723_v60  ;;  %v1471_v11 = vadd.f32 %v10056_v26, %v1470_v52  ;;  %v2816_v9 = vadd.f32 %v10056_v26, %v2815_v25  ;;  %7729 = vmatprep.mubr.msk.f32.mxu0 %vm535_vm1, %v347_v44  ;;  %7923 = vmatprep.mubr.msk.f32.mxu1 %vm535_vm1, %v379_v55  ;;  %v381_v44 = vld [vmem:[%s11053_s0 + $0xb70] sm:$0xff] }
 0x19b   :  { %11109 = vst [vmem:[#allocation57_spill] sm:$0xff] %v10098_v23  ;;  %v1726_v41 = vmax.f32 %v1476_v49, 0.0  ;;  %v3071_v4 = vmax.f32 %v2821_v21, 0.0 }
 0x19c   :  { %11110 = vst [vmem:[#allocation58_spill] sm:$0xff] %v10104_v14  ;;  %v1725_v60 = vmax.f32 %v1471_v11, 0.0  ;;  %v3070_v1 = vmax.f32 %v2816_v9, 0.0  ;;  %v7376_v7 = vpop.f32.mrb[98].mxu0  ;;  %v7570_v10 = vpop.f32.mrb[98].mxu1  ;;  %v350_v9 = vld [vmem:[%s11053_s0 + $0xa78] sm:$0xff] }
 0x19d   :  { %v10122_v52 = vadd.f32 %v3071_v4, %v1726_v41  ;;  %v1486_v55 = vadd.f32 %v10056_v26, %v7376_v7  ;;  %v2831_v25 = vadd.f32 %v10056_v26, %v7570_v10  ;;  %v1480_v49 = vpop.f32.mrb[99].mxu0  ;;  %v2825_v21 = vpop.f32.mrb[99].mxu1  ;;  %7730 = vmatmul.mubr.msk.f32.gmra.mrb[204].mxu0 %vm535_vm1, %v348_v35  ;;  %7924 = vmatmul.mubr.msk.f32.gmra.mrb[204].mxu1 %vm535_vm1, %v380_v48  ;;  %v382_v35 = vld [vmem:[%s11053_s0 + $0xb78] sm:$0xff]  ;;  %v351_v4 = vld [vmem:[%s11053_s0 + $0xa80] sm:$0xff] }
 0x19e   :  { %v10128_v14 = vadd.f32 %v3070_v1, %v1725_v60  ;;  %v1481_v23 = vadd.f32 %v10056_v26, %v1480_v49  ;;  %v2826_v11 = vadd.f32 %v10056_v26, %v2825_v21  ;;  %7732 = vmatprep.mubr.msk.f32.mxu0 %vm535_vm1, %v349_v36  ;;  %7926 = vmatprep.mubr.msk.f32.mxu1 %vm535_vm1, %v381_v44  ;;  %v383_v36 = vld [vmem:[%s11053_s0 + $0xb80] sm:$0xff] }
 0x19f   :  { %11111 = vst [vmem:[#allocation59_spill] sm:$0xff] %v10122_v52  ;;  %v1728_v41 = vmax.f32 %v1486_v55, 0.0  ;;  %v3073_v48 = vmax.f32 %v2831_v25, 0.0 }
 0x1a0   :  { %11112 = vst [vmem:[#allocation60_spill] sm:$0xff] %v10128_v14  ;;  %v1727_v60 = vmax.f32 %v1481_v23, 0.0  ;;  %v3072_v1 = vmax.f32 %v2826_v11, 0.0  ;;  %v7379_v7 = vpop.f32.mrb[100].mxu0  ;;  %v7573_v10 = vpop.f32.mrb[100].mxu1  ;;  %v352_v11 = vld [vmem:[%s11053_s0 + $0xa88] sm:$0xff] }
 0x1a1   :  { %v10146_v49 = vadd.f32 %v3073_v48, %v1728_v41  ;;  %v1496_v44 = vadd.f32 %v10056_v26, %v7379_v7  ;;  %v2841_v21 = vadd.f32 %v10056_v26, %v7573_v10  ;;  %v1490_v55 = vpop.f32.mrb[101].mxu0  ;;  %v2835_v25 = vpop.f32.mrb[101].mxu1  ;;  %7733 = vmatmul.mubr.msk.f32.gmra.mrb[206].mxu0 %vm535_vm1, %v350_v9  ;;  %7927 = vmatmul.mubr.msk.f32.gmra.mrb[206].mxu1 %vm535_vm1, %v382_v35  ;;  %v384_v9 = vld [vmem:[%s11053_s0 + $0xb88] sm:$0xff]  ;;  %v353_v48 = vld [vmem:[%s11053_s0 + $0xa90] sm:$0xff] }
 0x1a2   :  { %v10152_v14 = vadd.f32 %v3072_v1, %v1727_v60  ;;  %v1491_v52 = vadd.f32 %v10056_v26, %v1490_v55  ;;  %v2836_v23 = vadd.f32 %v10056_v26, %v2835_v25  ;;  %7735 = vmatprep.mubr.msk.f32.mxu0 %vm535_vm1, %v351_v4  ;;  %7929 = vmatprep.mubr.msk.f32.mxu1 %vm535_vm1, %v383_v36  ;;  %v385_v4 = vld [vmem:[%s11053_s0 + $0xb90] sm:$0xff] }
 0x1a3   :  { %11113 = vst [vmem:[#allocation61_spill] sm:$0xff] %v10146_v49  ;;  %v1730_v41 = vmax.f32 %v1496_v44, 0.0  ;;  %v3075_v35 = vmax.f32 %v2841_v21, 0.0 }
 0x1a4   :  { %11114 = vst [vmem:[#allocation62_spill] sm:$0xff] %v10152_v14  ;;  %v1729_v60 = vmax.f32 %v1491_v52, 0.0  ;;  %v3074_v1 = vmax.f32 %v2836_v23, 0.0  ;;  %v7382_v7 = vpop.f32.mrb[102].mxu0  ;;  %v7576_v10 = vpop.f32.mrb[102].mxu1  ;;  %v354_v23 = vld [vmem:[%s11053_s0 + $0xa98] sm:$0xff] }
 0x1a5   :  { %v10170_v55 = vadd.f32 %v3075_v35, %v1730_v41  ;;  %v1506_v36 = vadd.f32 %v10056_v26, %v7382_v7  ;;  %v2851_v25 = vadd.f32 %v10056_v26, %v7576_v10  ;;  %v1500_v44 = vpop.f32.mrb[103].mxu0  ;;  %v2845_v21 = vpop.f32.mrb[103].mxu1  ;;  %7736 = vmatmul.mubr.msk.f32.gmra.mrb[208].mxu0 %vm535_vm1, %v352_v11  ;;  %7930 = vmatmul.mubr.msk.f32.gmra.mrb[208].mxu1 %vm535_vm1, %v384_v9  ;;  %v386_v11 = vld [vmem:[%s11053_s0 + $0xb98] sm:$0xff]  ;;  %v355_v35 = vld [vmem:[%s11053_s0 + $0xaa0] sm:$0xff] }
 0x1a6   :  { %v10176_v14 = vadd.f32 %v3074_v1, %v1729_v60  ;;  %v1501_v49 = vadd.f32 %v10056_v26, %v1500_v44  ;;  %v2846_v52 = vadd.f32 %v10056_v26, %v2845_v21  ;;  %7738 = vmatprep.mubr.msk.f32.mxu0 %vm535_vm1, %v353_v48  ;;  %7932 = vmatprep.mubr.msk.f32.mxu1 %vm535_vm1, %v385_v4  ;;  %v387_v48 = vld [vmem:[%s11053_s0 + $0xba0] sm:$0xff] }
 0x1a7   :  { %11115 = vst [vmem:[#allocation63_spill] sm:$0xff] %v10170_v55  ;;  %v1732_v41 = vmax.f32 %v1506_v36, 0.0  ;;  %v3077_v9 = vmax.f32 %v2851_v25, 0.0 }
 0x1a8   :  { %11116 = vst [vmem:[#allocation64_spill] sm:$0xff] %v10176_v14  ;;  %v1731_v60 = vmax.f32 %v1501_v49, 0.0  ;;  %v3076_v1 = vmax.f32 %v2846_v52, 0.0  ;;  %v7385_v7 = vpop.f32.mrb[104].mxu0  ;;  %v7579_v10 = vpop.f32.mrb[104].mxu1  ;;  %v356_v52 = vld [vmem:[%s11053_s0 + $0xaa8] sm:$0xff] }
 0x1a9   :  { %v10194_v44 = vadd.f32 %v3077_v9, %v1732_v41  ;;  %v1516_v4 = vadd.f32 %v10056_v26, %v7385_v7  ;;  %v2861_v21 = vadd.f32 %v10056_v26, %v7579_v10  ;;  %v1510_v36 = vpop.f32.mrb[105].mxu0  ;;  %v2855_v25 = vpop.f32.mrb[105].mxu1  ;;  %7739 = vmatmul.mubr.msk.f32.gmra.mrb[210].mxu0 %vm535_vm1, %v354_v23  ;;  %7933 = vmatmul.mubr.msk.f32.gmra.mrb[210].mxu1 %vm535_vm1, %v386_v11  ;;  %v388_v23 = vld [vmem:[%s11053_s0 + $0xba8] sm:$0xff]  ;;  %v357_v9 = vld [vmem:[%s11053_s0 + $0xab0] sm:$0xff] }
 0x1aa   :  { %v10200_v14 = vadd.f32 %v3076_v1, %v1731_v60  ;;  %v1511_v55 = vadd.f32 %v10056_v26, %v1510_v36  ;;  %v2856_v49 = vadd.f32 %v10056_v26, %v2855_v25  ;;  %7741 = vmatprep.mubr.msk.f32.mxu0 %vm535_vm1, %v355_v35  ;;  %7935 = vmatprep.mubr.msk.f32.mxu1 %vm535_vm1, %v387_v48  ;;  %v389_v35 = vld [vmem:[%s11053_s0 + $0xbb0] sm:$0xff] }
 0x1ab   :  { %11117 = vst [vmem:[#allocation65_spill] sm:$0xff] %v10194_v44  ;;  %v1734_v41 = vmax.f32 %v1516_v4, 0.0  ;;  %v3079_v11 = vmax.f32 %v2861_v21, 0.0 }
 0x1ac   :  { %11118 = vst [vmem:[#allocation66_spill] sm:$0xff] %v10200_v14  ;;  %v1733_v60 = vmax.f32 %v1511_v55, 0.0  ;;  %v3078_v1 = vmax.f32 %v2856_v49, 0.0  ;;  %v7388_v7 = vpop.f32.mrb[106].mxu0  ;;  %v7582_v10 = vpop.f32.mrb[106].mxu1  ;;  %v358_v49 = vld [vmem:[%s11053_s0 + $0xab8] sm:$0xff] }
 0x1ad   :  { %v10218_v36 = vadd.f32 %v3079_v11, %v1734_v41  ;;  %v1526_v48 = vadd.f32 %v10056_v26, %v7388_v7  ;;  %v2871_v25 = vadd.f32 %v10056_v26, %v7582_v10  ;;  %v1520_v4 = vpop.f32.mrb[107].mxu0  ;;  %v2865_v21 = vpop.f32.mrb[107].mxu1  ;;  %7742 = vmatmul.mubr.msk.f32.gmra.mrb[212].mxu0 %vm535_vm1, %v356_v52  ;;  %7936 = vmatmul.mubr.msk.f32.gmra.mrb[212].mxu1 %vm535_vm1, %v388_v23  ;;  %v390_v52 = vld [vmem:[%s11053_s0 + $0xbb8] sm:$0xff]  ;;  %v359_v11 = vld [vmem:[%s11053_s0 + $0xac0] sm:$0xff] }
 0x1ae   :  { %v10224_v14 = vadd.f32 %v3078_v1, %v1733_v60  ;;  %v1521_v44 = vadd.f32 %v10056_v26, %v1520_v4  ;;  %v2866_v55 = vadd.f32 %v10056_v26, %v2865_v21  ;;  %7744 = vmatprep.mubr.msk.f32.mxu0 %vm535_vm1, %v357_v9  ;;  %7938 = vmatprep.mubr.msk.f32.mxu1 %vm535_vm1, %v389_v35  ;;  %v391_v9 = vld [vmem:[%s11053_s0 + $0xbc0] sm:$0xff] }
 0x1af   :  { %11119 = vst [vmem:[#allocation67_spill] sm:$0xff] %v10218_v36  ;;  %v1736_v41 = vmax.f32 %v1526_v48, 0.0  ;;  %v3081_v23 = vmax.f32 %v2871_v25, 0.0 }
 0x1b0   :  { %11120 = vst [vmem:[#allocation68_spill] sm:$0xff] %v10224_v14  ;;  %v1735_v60 = vmax.f32 %v1521_v44, 0.0  ;;  %v3080_v1 = vmax.f32 %v2866_v55, 0.0  ;;  %v7391_v7 = vpop.f32.mrb[108].mxu0  ;;  %v7585_v10 = vpop.f32.mrb[108].mxu1  ;;  %v360_v55 = vld [vmem:[%s11053_s0 + $0xac8] sm:$0xff] }
 0x1b1   :  { %v10242_v4 = vadd.f32 %v3081_v23, %v1736_v41  ;;  %v1536_v35 = vadd.f32 %v10056_v26, %v7391_v7  ;;  %v2881_v21 = vadd.f32 %v10056_v26, %v7585_v10  ;;  %v1530_v48 = vpop.f32.mrb[109].mxu0  ;;  %v2875_v25 = vpop.f32.mrb[109].mxu1  ;;  %7745 = vmatmul.mubr.msk.f32.gmra.mrb[214].mxu0 %vm535_vm1, %v358_v49  ;;  %7939 = vmatmul.mubr.msk.f32.gmra.mrb[214].mxu1 %vm535_vm1, %v390_v52  ;;  %v392_v49 = vld [vmem:[%s11053_s0 + $0xbc8] sm:$0xff]  ;;  %v361_v23 = vld [vmem:[%s11053_s0 + $0xad0] sm:$0xff] }
 0x1b2   :  { %v10248_v14 = vadd.f32 %v3080_v1, %v1735_v60  ;;  %v1531_v36 = vadd.f32 %v10056_v26, %v1530_v48  ;;  %v2876_v44 = vadd.f32 %v10056_v26, %v2875_v25  ;;  %7747 = vmatprep.mubr.msk.f32.mxu0 %vm535_vm1, %v359_v11  ;;  %7941 = vmatprep.mubr.msk.f32.mxu1 %vm535_vm1, %v391_v9  ;;  %v393_v11 = vld [vmem:[%s11053_s0 + $0xbd0] sm:$0xff] }
 0x1b3   :  { %11121 = vst [vmem:[#allocation69_spill] sm:$0xff] %v10242_v4  ;;  %v1738_v41 = vmax.f32 %v1536_v35, 0.0  ;;  %v3083_v52 = vmax.f32 %v2881_v21, 0.0 }
 0x1b4   :  { %11122 = vst [vmem:[#allocation70_spill] sm:$0xff] %v10248_v14  ;;  %v1737_v60 = vmax.f32 %v1531_v36, 0.0  ;;  %v3082_v1 = vmax.f32 %v2876_v44, 0.0  ;;  %v7394_v7 = vpop.f32.mrb[110].mxu0  ;;  %v7588_v10 = vpop.f32.mrb[110].mxu1  ;;  %v362_v44 = vld [vmem:[%s11053_s0 + $0xad8] sm:$0xff] }
 0x1b5   :  { %v10266_v48 = vadd.f32 %v3083_v52, %v1738_v41  ;;  %v1546_v9 = vadd.f32 %v10056_v26, %v7394_v7  ;;  %v2891_v25 = vadd.f32 %v10056_v26, %v7588_v10  ;;  %v1540_v35 = vpop.f32.mrb[111].mxu0  ;;  %v2885_v21 = vpop.f32.mrb[111].mxu1  ;;  %7748 = vmatmul.mubr.msk.f32.gmra.mrb[216].mxu0 %vm535_vm1, %v360_v55  ;;  %7942 = vmatmul.mubr.msk.f32.gmra.mrb[216].mxu1 %vm535_vm1, %v392_v49  ;;  %v394_v55 = vld [vmem:[%s11053_s0 + $0xbd8] sm:$0xff]  ;;  %v363_v52 = vld [vmem:[%s11053_s0 + $0xae0] sm:$0xff] }
 0x1b6   :  { %v10272_v14 = vadd.f32 %v3082_v1, %v1737_v60  ;;  %v1541_v4 = vadd.f32 %v10056_v26, %v1540_v35  ;;  %v2886_v36 = vadd.f32 %v10056_v26, %v2885_v21  ;;  %7750 = vmatprep.mubr.msk.f32.mxu0 %vm535_vm1, %v361_v23  ;;  %7944 = vmatprep.mubr.msk.f32.mxu1 %vm535_vm1, %v393_v11  ;;  %v395_v23 = vld [vmem:[%s11053_s0 + $0xbe0] sm:$0xff] }
 0x1b7   :  { %11123 = vst [vmem:[#allocation71_spill] sm:$0xff] %v10266_v48  ;;  %v1740_v41 = vmax.f32 %v1546_v9, 0.0  ;;  %v3085_v49 = vmax.f32 %v2891_v25, 0.0 }
 0x1b8   :  { %11124 = vst [vmem:[#allocation72_spill] sm:$0xff] %v10272_v14  ;;  %v1739_v60 = vmax.f32 %v1541_v4, 0.0  ;;  %v3084_v1 = vmax.f32 %v2886_v36, 0.0  ;;  %v7397_v7 = vpop.f32.mrb[112].mxu0  ;;  %v7591_v10 = vpop.f32.mrb[112].mxu1  ;;  %v364_v36 = vld [vmem:[%s11053_s0 + $0xae8] sm:$0xff] }
 0x1b9   :  { %v10290_v35 = vadd.f32 %v3085_v49, %v1740_v41  ;;  %v1556_v11 = vadd.f32 %v10056_v26, %v7397_v7  ;;  %v2901_v21 = vadd.f32 %v10056_v26, %v7591_v10  ;;  %v1550_v9 = vpop.f32.mrb[113].mxu0  ;;  %v2895_v25 = vpop.f32.mrb[113].mxu1  ;;  %7751 = vmatmul.mubr.msk.f32.gmra.mrb[218].mxu0 %vm535_vm1, %v362_v44  ;;  %7945 = vmatmul.mubr.msk.f32.gmra.mrb[218].mxu1 %vm535_vm1, %v394_v55  ;;  %v396_v44 = vld [vmem:[%s11053_s0 + $0xbe8] sm:$0xff]  ;;  %v365_v49 = vld [vmem:[%s11053_s0 + $0xaf0] sm:$0xff] }
 0x1ba   :  { %v10296_v14 = vadd.f32 %v3084_v1, %v1739_v60  ;;  %v1551_v48 = vadd.f32 %v10056_v26, %v1550_v9  ;;  %v2896_v4 = vadd.f32 %v10056_v26, %v2895_v25  ;;  %7753 = vmatprep.mubr.msk.f32.mxu0 %vm535_vm1, %v363_v52  ;;  %7947 = vmatprep.mubr.msk.f32.mxu1 %vm535_vm1, %v395_v23  ;;  %v397_v52 = vld [vmem:[%s11053_s0 + $0xbf0] sm:$0xff] }
 0x1bb   :  { %11125 = vst [vmem:[#allocation73_spill] sm:$0xff] %v10290_v35  ;;  %v1742_v41 = vmax.f32 %v1556_v11, 0.0  ;;  %v3087_v55 = vmax.f32 %v2901_v21, 0.0 }
 0x1bc   :  { %11126 = vst [vmem:[#allocation74_spill] sm:$0xff] %v10296_v14  ;;  %v1741_v60 = vmax.f32 %v1551_v48, 0.0  ;;  %v3086_v1 = vmax.f32 %v2896_v4, 0.0  ;;  %v7400_v7 = vpop.f32.mrb[114].mxu0  ;;  %v7594_v10 = vpop.f32.mrb[114].mxu1  ;;  %v366_v4 = vld [vmem:[%s11053_s0 + $0xaf8] sm:$0xff] }
 0x1bd   :  { %v10314_v9 = vadd.f32 %v3087_v55, %v1742_v41  ;;  %v1566_v23 = vadd.f32 %v10056_v26, %v7400_v7  ;;  %v2911_v25 = vadd.f32 %v10056_v26, %v7594_v10  ;;  %v1560_v11 = vpop.f32.mrb[115].mxu0  ;;  %v2905_v21 = vpop.f32.mrb[115].mxu1  ;;  %7754 = vmatmul.mubr.msk.f32.gmra.mrb[220].mxu0 %vm535_vm1, %v364_v36  ;;  %7948 = vmatmul.mubr.msk.f32.gmra.mrb[220].mxu1 %vm535_vm1, %v396_v44  ;;  %v398_v36 = vld [vmem:[%s11053_s0 + $0xbf8] sm:$0xff]  ;;  %v463_v55 = vld [vmem:[%s11053_s0 + $0xe00] sm:$0xff] }
 0x1be   :  { %v10320_v14 = vadd.f32 %v3086_v1, %v1741_v60  ;;  %v1561_v35 = vadd.f32 %v10056_v26, %v1560_v11  ;;  %v2906_v48 = vadd.f32 %v10056_v26, %v2905_v21  ;;  %7756 = vmatprep.mubr.msk.f32.mxu0 %vm535_vm1, %v365_v49  ;;  %7950 = vmatprep.mubr.msk.f32.mxu1 %vm535_vm1, %v397_v52  ;;  %v495_v49 = vld [vmem:[%s11053_s0 + $0xf00] sm:$0xff] }
 0x1bf   :  { %11127 = vst [vmem:[#allocation75_spill] sm:$0xff] %v10314_v9  ;;  %v1744_v41 = vmax.f32 %v1566_v23, 0.0  ;;  %v3089_v44 = vmax.f32 %v2911_v25, 0.0 }
 0x1c0   :  { %11128 = vst [vmem:[#allocation76_spill] sm:$0xff] %v10320_v14  ;;  %v1743_v60 = vmax.f32 %v1561_v35, 0.0  ;;  %v3088_v1 = vmax.f32 %v2906_v48, 0.0  ;;  %v7403_v7 = vpop.f32.mrb[116].mxu0  ;;  %v7597_v10 = vpop.f32.mrb[116].mxu1  ;;  %v464_v48 = vld [vmem:[%s11053_s0 + $0xe08] sm:$0xff] }
 0x1c1   :  { %v10338_v11 = vadd.f32 %v3089_v44, %v1744_v41  ;;  %v1576_v52 = vadd.f32 %v10056_v26, %v7403_v7  ;;  %v2921_v21 = vadd.f32 %v10056_v26, %v7597_v10  ;;  %v1570_v23 = vpop.f32.mrb[117].mxu0  ;;  %v2915_v25 = vpop.f32.mrb[117].mxu1  ;;  %7757 = vmatmul.mubr.msk.f32.gmra.mrb[222].mxu0 %vm535_vm1, %v366_v4  ;;  %7951 = vmatmul.mubr.msk.f32.gmra.mrb[222].mxu1 %vm535_vm1, %v398_v36  ;;  %v496_v4 = vld [vmem:[%s11053_s0 + $0xf08] sm:$0xff]  ;;  %v465_v44 = vld [vmem:[%s11053_s0 + $0xe10] sm:$0xff] }
 0x1c2   :  { %v10344_v14 = vadd.f32 %v3088_v1, %v1743_v60  ;;  %v1571_v9 = vadd.f32 %v10056_v26, %v1570_v23  ;;  %v2916_v35 = vadd.f32 %v10056_v26, %v2915_v25  ;;  %7759 = vmatprep.mubr.msk.f32.mxu0 %vm535_vm1, %v463_v55  ;;  %7953 = vmatprep.mubr.msk.f32.mxu1 %vm535_vm1, %v495_v49  ;;  %v497_v55 = vld [vmem:[%s11053_s0 + $0xf10] sm:$0xff] }
 0x1c3   :  { %11129 = vst [vmem:[#allocation77_spill] sm:$0xff] %v10338_v11  ;;  %v1746_v41 = vmax.f32 %v1576_v52, 0.0  ;;  %v3091_v36 = vmax.f32 %v2921_v21, 0.0 }
 0x1c4   :  { %11130 = vst [vmem:[#allocation78_spill] sm:$0xff] %v10344_v14  ;;  %v1745_v60 = vmax.f32 %v1571_v9, 0.0  ;;  %v3090_v1 = vmax.f32 %v2916_v35, 0.0  ;;  %v7406_v7 = vpop.f32.mrb[118].mxu0  ;;  %v7600_v10 = vpop.f32.mrb[118].mxu1  ;;  %v466_v35 = vld [vmem:[%s11053_s0 + $0xe18] sm:$0xff] }
 0x1c5   :  { %v10362_v23 = vadd.f32 %v3091_v36, %v1746_v41  ;;  %v1586_v49 = vadd.f32 %v10056_v26, %v7406_v7  ;;  %v2931_v25 = vadd.f32 %v10056_v26, %v7600_v10  ;;  %v1580_v52 = vpop.f32.mrb[119].mxu0  ;;  %v2925_v21 = vpop.f32.mrb[119].mxu1  ;;  %7760 = vmatmul.mubr.msk.f32.gmra.mrb[224].mxu0 %vm535_vm1, %v464_v48  ;;  %7954 = vmatmul.mubr.msk.f32.gmra.mrb[224].mxu1 %vm535_vm1, %v496_v4  ;;  %v498_v48 = vld [vmem:[%s11053_s0 + $0xf18] sm:$0xff]  ;;  %v467_v36 = vld [vmem:[%s11053_s0 + $0xe20] sm:$0xff] }
 0x1c6   :  { %v10368_v14 = vadd.f32 %v3090_v1, %v1745_v60  ;;  %v1581_v11 = vadd.f32 %v10056_v26, %v1580_v52  ;;  %v2926_v9 = vadd.f32 %v10056_v26, %v2925_v21  ;;  %7762 = vmatprep.mubr.msk.f32.mxu0 %vm535_vm1, %v465_v44  ;;  %7956 = vmatprep.mubr.msk.f32.mxu1 %vm535_vm1, %v497_v55  ;;  %v499_v44 = vld [vmem:[%s11053_s0 + $0xf20] sm:$0xff] }
 0x1c7   :  { %11131 = vst [vmem:[#allocation79_spill] sm:$0xff] %v10362_v23  ;;  %v1748_v41 = vmax.f32 %v1586_v49, 0.0  ;;  %v3093_v4 = vmax.f32 %v2931_v25, 0.0 }
 0x1c8   :  { %11132 = vst [vmem:[#allocation80_spill] sm:$0xff] %v10368_v14  ;;  %v1747_v60 = vmax.f32 %v1581_v11, 0.0  ;;  %v3092_v1 = vmax.f32 %v2926_v9, 0.0  ;;  %v7409_v7 = vpop.f32.mrb[120].mxu0  ;;  %v7603_v10 = vpop.f32.mrb[120].mxu1  ;;  %v468_v9 = vld [vmem:[%s11053_s0 + $0xe28] sm:$0xff] }
 0x1c9   :  { %v10386_v52 = vadd.f32 %v3093_v4, %v1748_v41  ;;  %v1596_v55 = vadd.f32 %v10056_v26, %v7409_v7  ;;  %v2941_v21 = vadd.f32 %v10056_v26, %v7603_v10  ;;  %v1590_v49 = vpop.f32.mrb[121].mxu0  ;;  %v2935_v25 = vpop.f32.mrb[121].mxu1  ;;  %7763 = vmatmul.mubr.msk.f32.gmra.mrb[226].mxu0 %vm535_vm1, %v466_v35  ;;  %7957 = vmatmul.mubr.msk.f32.gmra.mrb[226].mxu1 %vm535_vm1, %v498_v48  ;;  %v500_v35 = vld [vmem:[%s11053_s0 + $0xf28] sm:$0xff]  ;;  %v469_v4 = vld [vmem:[%s11053_s0 + $0xe30] sm:$0xff] }
 0x1ca   :  { %v10392_v14 = vadd.f32 %v3092_v1, %v1747_v60  ;;  %v1591_v23 = vadd.f32 %v10056_v26, %v1590_v49  ;;  %v2936_v11 = vadd.f32 %v10056_v26, %v2935_v25  ;;  %7765 = vmatprep.mubr.msk.f32.mxu0 %vm535_vm1, %v467_v36  ;;  %7959 = vmatprep.mubr.msk.f32.mxu1 %vm535_vm1, %v499_v44  ;;  %v501_v36 = vld [vmem:[%s11053_s0 + $0xf30] sm:$0xff] }
 0x1cb   :  { %11133 = vst [vmem:[#allocation81_spill] sm:$0xff] %v10386_v52  ;;  %v1750_v41 = vmax.f32 %v1596_v55, 0.0  ;;  %v3095_v48 = vmax.f32 %v2941_v21, 0.0 }
 0x1cc   :  { %11134 = vst [vmem:[#allocation82_spill] sm:$0xff] %v10392_v14  ;;  %v1749_v60 = vmax.f32 %v1591_v23, 0.0  ;;  %v3094_v1 = vmax.f32 %v2936_v11, 0.0  ;;  %v7412_v7 = vpop.f32.mrb[122].mxu0  ;;  %v7606_v10 = vpop.f32.mrb[122].mxu1  ;;  %v470_v11 = vld [vmem:[%s11053_s0 + $0xe38] sm:$0xff] }
 0x1cd   :  { %v10410_v49 = vadd.f32 %v3095_v48, %v1750_v41  ;;  %v1606_v44 = vadd.f32 %v10056_v26, %v7412_v7  ;;  %v2951_v25 = vadd.f32 %v10056_v26, %v7606_v10  ;;  %v1600_v55 = vpop.f32.mrb[123].mxu0  ;;  %v2945_v21 = vpop.f32.mrb[123].mxu1  ;;  %7766 = vmatmul.mubr.msk.f32.gmra.mrb[228].mxu0 %vm535_vm1, %v468_v9  ;;  %7960 = vmatmul.mubr.msk.f32.gmra.mrb[228].mxu1 %vm535_vm1, %v500_v35  ;;  %v502_v9 = vld [vmem:[%s11053_s0 + $0xf38] sm:$0xff]  ;;  %v471_v48 = vld [vmem:[%s11053_s0 + $0xe40] sm:$0xff] }
 0x1ce   :  { %v10416_v14 = vadd.f32 %v3094_v1, %v1749_v60  ;;  %v1601_v52 = vadd.f32 %v10056_v26, %v1600_v55  ;;  %v2946_v23 = vadd.f32 %v10056_v26, %v2945_v21  ;;  %7768 = vmatprep.mubr.msk.f32.mxu0 %vm535_vm1, %v469_v4  ;;  %7962 = vmatprep.mubr.msk.f32.mxu1 %vm535_vm1, %v501_v36  ;;  %v503_v4 = vld [vmem:[%s11053_s0 + $0xf40] sm:$0xff] }
 0x1cf   :  { %11135 = vst [vmem:[#allocation83_spill] sm:$0xff] %v10410_v49  ;;  %v1752_v41 = vmax.f32 %v1606_v44, 0.0  ;;  %v3097_v35 = vmax.f32 %v2951_v25, 0.0 }
 0x1d0   :  { %11136 = vst [vmem:[#allocation84_spill] sm:$0xff] %v10416_v14  ;;  %v1751_v60 = vmax.f32 %v1601_v52, 0.0  ;;  %v3096_v1 = vmax.f32 %v2946_v23, 0.0  ;;  %v7415_v7 = vpop.f32.mrb[124].mxu0  ;;  %v7609_v10 = vpop.f32.mrb[124].mxu1  ;;  %v472_v23 = vld [vmem:[%s11053_s0 + $0xe48] sm:$0xff] }
 0x1d1   :  { %v10434_v55 = vadd.f32 %v3097_v35, %v1752_v41  ;;  %v1616_v36 = vadd.f32 %v10056_v26, %v7415_v7  ;;  %v2961_v21 = vadd.f32 %v10056_v26, %v7609_v10  ;;  %v1610_v44 = vpop.f32.mrb[125].mxu0  ;;  %v2955_v25 = vpop.f32.mrb[125].mxu1  ;;  %7769 = vmatmul.mubr.msk.f32.gmra.mrb[230].mxu0 %vm535_vm1, %v470_v11  ;;  %7963 = vmatmul.mubr.msk.f32.gmra.mrb[230].mxu1 %vm535_vm1, %v502_v9  ;;  %v504_v11 = vld [vmem:[%s11053_s0 + $0xf48] sm:$0xff]  ;;  %v473_v35 = vld [vmem:[%s11053_s0 + $0xe50] sm:$0xff] }
 0x1d2   :  { %v10440_v14 = vadd.f32 %v3096_v1, %v1751_v60  ;;  %v1611_v49 = vadd.f32 %v10056_v26, %v1610_v44  ;;  %v2956_v52 = vadd.f32 %v10056_v26, %v2955_v25  ;;  %7771 = vmatprep.mubr.msk.f32.mxu0 %vm535_vm1, %v471_v48  ;;  %7965 = vmatprep.mubr.msk.f32.mxu1 %vm535_vm1, %v503_v4  ;;  %v505_v48 = vld [vmem:[%s11053_s0 + $0xf50] sm:$0xff] }
 0x1d3   :  { %11137 = vst [vmem:[#allocation85_spill] sm:$0xff] %v10434_v55  ;;  %v1754_v41 = vmax.f32 %v1616_v36, 0.0  ;;  %v3099_v9 = vmax.f32 %v2961_v21, 0.0 }
 0x1d4   :  { %11138 = vst [vmem:[#allocation86_spill] sm:$0xff] %v10440_v14  ;;  %v1753_v60 = vmax.f32 %v1611_v49, 0.0  ;;  %v3098_v1 = vmax.f32 %v2956_v52, 0.0  ;;  %v7418_v7 = vpop.f32.mrb[126].mxu0  ;;  %v7612_v10 = vpop.f32.mrb[126].mxu1  ;;  %v474_v52 = vld [vmem:[%s11053_s0 + $0xe58] sm:$0xff] }
 0x1d5   :  { %v10458_v44 = vadd.f32 %v3099_v9, %v1754_v41  ;;  %v1626_v4 = vadd.f32 %v10056_v26, %v7418_v7  ;;  %v2971_v25 = vadd.f32 %v10056_v26, %v7612_v10  ;;  %v1620_v36 = vpop.f32.mrb[127].mxu0  ;;  %v2965_v21 = vpop.f32.mrb[127].mxu1  ;;  %7772 = vmatmul.mubr.msk.f32.gmra.mrb[232].mxu0 %vm535_vm1, %v472_v23  ;;  %7966 = vmatmul.mubr.msk.f32.gmra.mrb[232].mxu1 %vm535_vm1, %v504_v11  ;;  %v506_v23 = vld [vmem:[%s11053_s0 + $0xf58] sm:$0xff]  ;;  %v475_v9 = vld [vmem:[%s11053_s0 + $0xe60] sm:$0xff] }
 0x1d6   :  { %v10464_v14 = vadd.f32 %v3098_v1, %v1753_v60  ;;  %v1621_v55 = vadd.f32 %v10056_v26, %v1620_v36  ;;  %v2966_v49 = vadd.f32 %v10056_v26, %v2965_v21  ;;  %7774 = vmatprep.mubr.msk.f32.mxu0 %vm535_vm1, %v473_v35  ;;  %7968 = vmatprep.mubr.msk.f32.mxu1 %vm535_vm1, %v505_v48  ;;  %v507_v35 = vld [vmem:[%s11053_s0 + $0xf60] sm:$0xff] }
 0x1d7   :  { %11139 = vst [vmem:[#allocation87_spill] sm:$0xff] %v10458_v44  ;;  %v1756_v41 = vmax.f32 %v1626_v4, 0.0  ;;  %v3101_v11 = vmax.f32 %v2971_v25, 0.0 }
 0x1d8   :  { %11140 = vst [vmem:[#allocation88_spill] sm:$0xff] %v10464_v14  ;;  %v1755_v60 = vmax.f32 %v1621_v55, 0.0  ;;  %v3100_v1 = vmax.f32 %v2966_v49, 0.0  ;;  %v7617_v7 = vpop.f32.mrb[128].mxu0  ;;  %v7811_v10 = vpop.f32.mrb[128].mxu1  ;;  %v476_v49 = vld [vmem:[%s11053_s0 + $0xe68] sm:$0xff] }
 0x1d9   :  { %v10482_v36 = vadd.f32 %v3101_v11, %v1756_v41  ;;  %v3686_v48 = vadd.f32 %v10056_v26, %v7617_v7  ;;  %v3680_v21 = vpop.f32.mrb[129].mxu0  ;;  %7775 = vmatmul.mubr.msk.f32.gmra.mrb[234].mxu0 %vm535_vm1, %v474_v52  ;;  %v5031_v4 = vadd.f32 %v10056_v26, %v7811_v10  ;;  %v5025_v25 = vpop.f32.mrb[129].mxu1  ;;  %7969 = vmatmul.mubr.msk.f32.gmra.mrb[234].mxu1 %vm535_vm1, %v506_v23  ;;  %v508_v52 = vld [vmem:[%s11053_s0 + $0xf68] sm:$0xff]  ;;  %v477_v11 = vld [vmem:[%s11053_s0 + $0xe70] sm:$0xff] }
 0x1da   :  { %v10488_v14 = vadd.f32 %v3100_v1, %v1755_v60  ;;  %v3681_v44 = vadd.f32 %v10056_v26, %v3680_v21  ;;  %v5026_v55 = vadd.f32 %v10056_v26, %v5025_v25  ;;  %7777 = vmatprep.mubr.msk.f32.mxu0 %vm535_vm1, %v475_v9  ;;  %7971 = vmatprep.mubr.msk.f32.mxu1 %vm535_vm1, %v507_v35  ;;  %v509_v9 = vld [vmem:[%s11053_s0 + $0xf70] sm:$0xff] }
 0x1db   :  { %11141 = vst [vmem:[#allocation89_spill] sm:$0xff] %v10482_v36  ;;  %v4320_v41 = vmax.f32 %v3686_v48, 0.0  ;;  %v5665_v23 = vmax.f32 %v5031_v4, 0.0 }
 0x1dc   :  { %11142 = vst [vmem:[#allocation90_spill] sm:$0xff] %v10488_v14  ;;  %v4319_v60 = vmax.f32 %v3681_v44, 0.0  ;;  %v5664_v1 = vmax.f32 %v5026_v55, 0.0  ;;  %v7620_v7 = vpop.f32.mrb[130].mxu0  ;;  %v7814_v10 = vpop.f32.mrb[130].mxu1  ;;  %v510_v55 = vld [vmem:[%s11053_s0 + $0xf78] sm:$0xff] }
 0x1dd   :  { %v4448_v35 = vadd.f32 %v4320_v41, %v8960_v46  ;;  %v3696_v21 = vadd.f32 %v10056_v26, %v7620_v7  ;;  %v3690_v25 = vpop.f32.mrb[131].mxu0  ;;  %7778 = vmatmul.mubr.msk.f32.gmra.mrb[236].mxu0 %vm535_vm1, %v476_v49  ;;  %v5041_v48 = vadd.f32 %v10056_v26, %v7814_v10  ;;  %v5035_v4 = vpop.f32.mrb[131].mxu1  ;;  %7972 = vmatmul.mubr.msk.f32.gmra.mrb[236].mxu1 %vm535_vm1, %v508_v52  ;;  %v478_v46 = vld [vmem:[%s11053_s0 + $0xe78] sm:$0xff] }
 0x1de   :  { %v4447_v14 = vadd.f32 %v4319_v60, %v8966_v51  ;;  %v3691_v36 = vadd.f32 %v10056_v26, %v3690_v25  ;;  %v5036_v44 = vadd.f32 %v10056_v26, %v5035_v4  ;;  %7780 = vmatprep.mubr.msk.f32.mxu0 %vm535_vm1, %v477_v11  ;;  %7974 = vmatprep.mubr.msk.f32.mxu1 %vm535_vm1, %v509_v9  ;;  %v479_v51 = vld [vmem:[%s11053_s0 + $0xe80] sm:$0xff] }
 0x1df   :  { %v5793_v49 = vadd.f32 %v5665_v23, %v4448_v35  ;;  %v4322_v52 = vmax.f32 %v3696_v21, 0.0  ;;  %v5667_v41 = vmax.f32 %v5041_v48, 0.0  ;;  %v511_v11 = vld [vmem:[%s11053_s0 + $0xf80] sm:$0xff] }
 0x1e0   :  { %v5792_v60 = vadd.f32 %v5664_v1, %v4447_v14  ;;  %v4321_v7 = vmax.f32 %v3691_v36, 0.0  ;;  %v5666_v10 = vmax.f32 %v5036_v44, 0.0  ;;  %v7623_v25 = vpop.f32.mrb[132].mxu0  ;;  %v7817_v9 = vpop.f32.mrb[132].mxu1  ;;  %v512_v44 = vld [vmem:[%s11053_s0 + $0xf88] sm:$0xff] }
 0x1e1   :  { %v5921_v4 = vmul.f32 0.25, %v5793_v49  ;;  %v4450_v32 = vadd.f32 %v4322_v52, %v8984_v0  ;;  %v3706_v23 = vadd.f32 %v10056_v26, %v7623_v25  ;;  %v3700_v35 = vpop.f32.mrb[133].mxu0  ;;  %7781 = vmatmul.mubr.msk.f32.gmra.mrb[238].mxu0 %vm535_vm1, %v478_v46  ;;  %v5051_v21 = vadd.f32 %v10056_v26, %v7817_v9  ;;  %v5045_v48 = vpop.f32.mrb[133].mxu1  ;;  %7975 = vmatmul.mubr.msk.f32.gmra.mrb[238].mxu1 %vm535_vm1, %v510_v55  ;;  %v480_v0 = vld [vmem:[%s11053_s0 + $0xe88] sm:$0xff]  ;;  %v481_v49 = vld [vmem:[%s11053_s0 + $0xe90] sm:$0xff] }
 0x1e2   :  { %v5920_v16 = vmul.f32 0.25, %v5792_v60  ;;  %v4449_v14 = vadd.f32 %v4321_v7, %v8990_v5  ;;  %v3701_v36 = vadd.f32 %v10056_v26, %v3700_v35  ;;  %v5046_v1 = vadd.f32 %v10056_v26, %v5045_v48  ;;  %7783 = vmatprep.mubr.msk.f32.mxu0 %vm535_vm1, %v479_v51  ;;  %7977 = vmatprep.mubr.msk.f32.mxu1 %vm535_vm1, %v511_v11  ;;  %v513_v52 = vld [vmem:[%s11053_s0 + $0xf90] sm:$0xff] }
 0x1e3   :  { %6049 = vst [vmem:[#allocation2 + $0x8] sm:$0xff] %v5921_v4  ;;  %v5795_v46 = vadd.f32 %v5667_v41, %v4450_v32  ;;  %v4324_v55 = vmax.f32 %v3706_v23, 0.0  ;;  %v5669_v5 = vmax.f32 %v5051_v21, 0.0 }
 0x1e4   :  { %6048 = vst [vmem:[#allocation2] sm:$0xff] %v5920_v16  ;;  %v5794_v51 = vadd.f32 %v5666_v10, %v4449_v14  ;;  %v4323_v60 = vmax.f32 %v3701_v36, 0.0  ;;  %v5668_v11 = vmax.f32 %v5046_v1, 0.0  ;;  %v7626_v7 = vpop.f32.mrb[134].mxu0  ;;  %v7820_v25 = vpop.f32.mrb[134].mxu1  ;;  %v514_v14 = vld [vmem:[%s11053_s0 + $0xf98] sm:$0xff] }
 0x1e5   :  { %v5923_v9 = vmul.f32 0.25, %v5795_v46  ;;  %v4452_v4 = vadd.f32 %v4324_v55, %v9008_v18  ;;  %v3716_v32 = vadd.f32 %v10056_v26, %v7626_v7  ;;  %v3710_v41 = vpop.f32.mrb[135].mxu0  ;;  %7784 = vmatmul.mubr.msk.f32.gmra.mrb[240].mxu0 %vm535_vm1, %v480_v0  ;;  %v5061_v23 = vadd.f32 %v10056_v26, %v7820_v25  ;;  %v5055_v35 = vpop.f32.mrb[135].mxu1  ;;  %7978 = vmatmul.mubr.msk.f32.gmra.mrb[240].mxu1 %vm535_vm1, %v512_v44  ;;  %v482_v18 = vld [vmem:[%s11053_s0 + $0xe98] sm:$0xff]  ;;  %v483_v0 = vld [vmem:[%s11053_s0 + $0xea0] sm:$0xff] }
 0x1e6   :  { %v5922_v21 = vmul.f32 0.25, %v5794_v51  ;;  %v4451_v16 = vadd.f32 %v4323_v60, %v9014_v24  ;;  %v3711_v10 = vadd.f32 %v10056_v26, %v3710_v41  ;;  %v5056_v48 = vadd.f32 %v10056_v26, %v5055_v35  ;;  %7786 = vmatprep.mubr.msk.f32.mxu0 %vm535_vm1, %v481_v49  ;;  %7980 = vmatprep.mubr.msk.f32.mxu1 %vm535_vm1, %v513_v52  ;;  %v515_v44 = vld [vmem:[%s11053_s0 + $0xfa0] sm:$0xff]  ;;  %v516_v35 = vld [vmem:[%s11053_s0 + $0xfa8] sm:$0xff] }
 0x1e7   :  { %6051 = vst [vmem:[#allocation2 + $0x18] sm:$0xff] %v5923_v9  ;;  %v5797_v36 = vadd.f32 %v5669_v5, %v4452_v4  ;;  %v4326_v1 = vmax.f32 %v3716_v32, 0.0  ;;  %v5671_v24 = vmax.f32 %v5061_v23, 0.0 }
 0x1e8   :  { %6050 = vst [vmem:[#allocation2 + $0x10] sm:$0xff] %v5922_v21  ;;  %v5796_v46 = vadd.f32 %v5668_v11, %v4451_v16  ;;  %v4325_v55 = vmax.f32 %v3711_v10, 0.0  ;;  %v5670_v49 = vmax.f32 %v5056_v48, 0.0  ;;  %v7629_v52 = vpop.f32.mrb[136].mxu0  ;;  %v7823_v51 = vpop.f32.mrb[136].mxu1  ;;  %v517_v10 = vld [vmem:[%s11053_s0 + $0xfb0] sm:$0xff] }
 0x1e9   :  { %v5925_v60 = vmul.f32 0.25, %v5797_v36  ;;  %v4454_v7 = vadd.f32 %v4326_v1, %v9032_v37  ;;  %v3726_v5 = vadd.f32 %v10056_v26, %v7629_v52  ;;  %v3720_v25 = vpop.f32.mrb[137].mxu0  ;;  %7787 = vmatmul.mubr.msk.f32.gmra.mrb[242].mxu0 %vm535_vm1, %v482_v18  ;;  %v5071_v9 = vadd.f32 %v10056_v26, %v7823_v51  ;;  %v5065_v4 = vpop.f32.mrb[137].mxu1  ;;  %7981 = vmatmul.mubr.msk.f32.gmra.mrb[242].mxu1 %vm535_vm1, %v514_v14  ;;  %v484_v37 = vld [vmem:[%s11053_s0 + $0xea8] sm:$0xff] }
 0x1ea   :  { %v5924_v32 = vmul.f32 0.25, %v5796_v46  ;;  %v4453_v11 = vadd.f32 %v4325_v55, %v9038_v42  ;;  %v3721_v41 = vadd.f32 %v10056_v26, %v3720_v25  ;;  %v5066_v23 = vadd.f32 %v10056_v26, %v5065_v4  ;;  %7789 = vmatprep.mubr.msk.f32.mxu0 %vm535_vm1, %v483_v0  ;;  %7983 = vmatprep.mubr.msk.f32.mxu1 %vm535_vm1, %v515_v44  ;;  %v485_v26 = vld [vmem:[%s11053_s0 + $0xeb0] sm:$0xff]  ;;  %v518_v25 = vld [vmem:[%s11053_s0 + $0xfb8] sm:$0xff] }
 0x1eb   :  { %6053 = vst [vmem:[#allocation2 + $0x28] sm:$0xff] %v5925_v60  ;;  %v5799_v21 = vadd.f32 %v5671_v24, %v4454_v7  ;;  %v4328_v16 = vmax.f32 %v3726_v5, 0.0  ;;  %v5673_v42 = vmax.f32 %v5071_v9, 0.0  ;;  %v10598_v24 = vld [vmem:[%s11055_s2] ss:$0 sm:$0xff]  ;;  %v486_v5 = vld [vmem:[%s11053_s0 + $0xeb8] sm:$0xff] }
 0x1ec   :  { %6052 = vst [vmem:[#allocation2 + $0x20] sm:$0xff] %v5924_v32  ;;  %v5798_v48 = vadd.f32 %v5670_v49, %v4453_v11  ;;  %v4327_v18 = vmax.f32 %v3721_v41, 0.0  ;;  %v5672_v14 = vmax.f32 %v5066_v23, 0.0  ;;  %v7632_v36 = vpop.f32.mrb[138].mxu0  ;;  %v7826_v1 = vpop.f32.mrb[138].mxu1  ;;  %v487_v32 = vld [vmem:[%s11053_s0 + $0xec0] sm:$0xff] }
 0x1ed   :  { %v5927_v0 = vmul.f32 0.25, %v5799_v21  ;;  %v4456_v44 = vadd.f32 %v4328_v16, %v9056_v57  ;;  %v3736_v46 = vadd.f32 %v10598_v24, %v7632_v36  ;;  %v3730_v55 = vpop.f32.mrb[139].mxu0  ;;  %7790 = vmatmul.mubr.msk.f32.gmra.mrb[244].mxu0 %vm535_vm1, %v484_v37  ;;  %v5081_v52 = vadd.f32 %v10598_v24, %v7826_v1  ;;  %v5075_v49 = vpop.f32.mrb[139].mxu1  ;;  %7984 = vmatmul.mubr.msk.f32.gmra.mrb[244].mxu1 %vm535_vm1, %v516_v35  ;;  %v519_v11 = vld [vmem:[%s11053_s0 + $0xfc0] sm:$0xff] }
 0x1ee   :  { %v5926_v51 = vmul.f32 0.25, %v5798_v48  ;;  %v4455_v60 = vadd.f32 %v4327_v18, %v9062_v62  ;;  %v3731_v57 = vadd.f32 %v10598_v24, %v3730_v55  ;;  %v5076_v7 = vadd.f32 %v10598_v24, %v5075_v49  ;;  %7792 = vmatprep.mubr.msk.f32.mxu0 %vm535_vm1, %v485_v26  ;;  %7986 = vmatprep.mubr.msk.f32.mxu1 %vm535_vm1, %v517_v10  ;;  %v521_v49 = vld [vmem:[%s11053_s0 + $0xfd0] sm:$0xff] }
 0x1ef   :  { %6055 = vst [vmem:[#allocation2 + $0x38] sm:$0xff] %v5927_v0  ;;  %v5801_v9 = vadd.f32 %v5673_v42, %v4456_v44  ;;  %v4330_v4 = vmax.f32 %v3736_v46, 0.0  ;;  %v5675_v62 = vmax.f32 %v5081_v52, 0.0  ;;  %v520_v44 = vld [vmem:[%s11053_s0 + $0xfc8] sm:$0xff]  ;;  %v489_v52 = vld [vmem:[%s11053_s0 + $0xed0] sm:$0xff] }
 0x1f0   :  { %6054 = vst [vmem:[#allocation2 + $0x30] sm:$0xff] %v5926_v51  ;;  %v5800_v41 = vadd.f32 %v5672_v14, %v4455_v60  ;;  %v4329_v23 = vmax.f32 %v3731_v57, 0.0  ;;  %v5674_v37 = vmax.f32 %v5076_v7, 0.0  ;;  %v7635_v35 = vpop.f32.mrb[140].mxu0  ;;  %v7829_v21 = vpop.f32.mrb[140].mxu1 }
 0x1f1   :  { %v5929_v16 = vmul.f32 0.25, %v5801_v9  ;;  %v4458_v26 = vadd.f32 %v4330_v4, %v9080_v13  ;;  %v3746_v42 = vadd.f32 %v10598_v24, %v7635_v35  ;;  %v3740_v10 = vpop.f32.mrb[141].mxu0  ;;  %7793 = vmatmul.mubr.msk.f32.gmra.mrb[246].mxu0 %vm535_vm1, %v486_v5  ;;  %v5091_v48 = vadd.f32 %v10598_v24, %v7829_v21  ;;  %v5085_v18 = vpop.f32.mrb[141].mxu1  ;;  %7987 = vmatmul.mubr.msk.f32.gmra.mrb[246].mxu1 %vm535_vm1, %v518_v25  ;;  %v488_v13 = vld [vmem:[%s11053_s0 + $0xec8] sm:$0xff]  ;;  %v522_v21 = vld [vmem:[%s11053_s0 + $0xfd8] sm:$0xff] }
 0x1f2   :  { %v5928_v36 = vmul.f32 0.25, %v5800_v41  ;;  %v4457_v14 = vadd.f32 %v4329_v23, %v9086_v19  ;;  %v3741_v1 = vadd.f32 %v10598_v24, %v3740_v10  ;;  %v5086_v0 = vadd.f32 %v10598_v24, %v5085_v18  ;;  %7795 = vmatprep.mubr.msk.f32.mxu0 %vm535_vm1, %v487_v32  ;;  %7989 = vmatprep.mubr.msk.f32.mxu1 %vm535_vm1, %v519_v11  ;;  %v523_v10 = vld [vmem:[%s11053_s0 + $0xfe0] sm:$0xff] }
 0x1f3   :  { %6057 = vst [vmem:[#allocation2 + $0x48] sm:$0xff] %v5929_v16  ;;  %v5803_v46 = vadd.f32 %v5675_v62, %v4458_v26  ;;  %v4332_v55 = vmax.f32 %v3746_v42, 0.0  ;;  %v5677_v19 = vmax.f32 %v5091_v48, 0.0  ;;  %v491_v42 = vld [vmem:[%s11053_s0 + $0xee0] sm:$0xff] }
 0x1f4   :  { %6056 = vst [vmem:[#allocation2 + $0x40] sm:$0xff] %v5928_v36  ;;  %v5802_v51 = vadd.f32 %v5674_v37, %v4457_v14  ;;  %v4331_v60 = vmax.f32 %v3741_v1, 0.0  ;;  %v5676_v57 = vmax.f32 %v5086_v0, 0.0  ;;  %v7638_v7 = vpop.f32.mrb[142].mxu0  ;;  %v7832_v5 = vpop.f32.mrb[142].mxu1 }
 0x1f5   :  { %v5931_v25 = vmul.f32 0.25, %v5803_v46  ;;  %v4460_v9 = vadd.f32 %v4332_v55, %v9104_v34  ;;  %v3756_v4 = vadd.f32 %v10598_v24, %v7638_v7  ;;  %v3750_v62 = vpop.f32.mrb[143].mxu0  ;;  %7796 = vmatmul.mubr.msk.f32.gmra.mrb[248].mxu0 %vm535_vm1, %v488_v13  ;;  %v5101_v32 = vadd.f32 %v10598_v24, %v7832_v5  ;;  %v5095_v11 = vpop.f32.mrb[143].mxu1  ;;  %7990 = vmatmul.mubr.msk.f32.gmra.mrb[248].mxu1 %vm535_vm1, %v520_v44  ;;  %v490_v34 = vld [vmem:[%s11053_s0 + $0xed8] sm:$0xff] }
 0x1f6   :  { %v5930_v41 = vmul.f32 0.25, %v5802_v51  ;;  %v4459_v23 = vadd.f32 %v4331_v60, %v9110_v40  ;;  %v3751_v37 = vadd.f32 %v10598_v24, %v3750_v62  ;;  %v5096_v35 = vadd.f32 %v10598_v24, %v5095_v11  ;;  %7798 = vmatprep.mubr.msk.f32.mxu0 %vm535_vm1, %v489_v52  ;;  %7992 = vmatprep.mubr.msk.f32.mxu1 %vm535_vm1, %v521_v49 }
 0x1f7   :  { %6059 = vst [vmem:[#allocation2 + $0x58] sm:$0xff] %v5931_v25  ;;  %v5805_v16 = vadd.f32 %v5677_v19, %v4460_v9  ;;  %v4334_v26 = vmax.f32 %v3756_v4, 0.0  ;;  %v5679_v40 = vmax.f32 %v5101_v32, 0.0  ;;  %v493_v25 = vld [vmem:[%s11053_s0 + $0xef0] sm:$0xff] }
 0x1f8   :  { %6058 = vst [vmem:[#allocation2 + $0x50] sm:$0xff] %v5930_v41  ;;  %v5804_v48 = vadd.f32 %v5676_v57, %v4459_v23  ;;  %v4333_v18 = vmax.f32 %v3751_v37, 0.0  ;;  %v5678_v36 = vmax.f32 %v5096_v35, 0.0  ;;  %v7641_v14 = vpop.f32.mrb[144].mxu0  ;;  %v7835_v1 = vpop.f32.mrb[144].mxu1  ;;  %v524_v57 = vld [vmem:[%s11053_s0 + $0xfe8] sm:$0xff] }
 0x1f9   :  { %v5933_v0 = vmul.f32 0.25, %v5805_v16  ;;  %v4462_v13 = vadd.f32 %v4334_v26, %v9128_v56  ;;  %v3766_v44 = vadd.f32 %v10598_v24, %v7641_v14  ;;  %v3760_v46 = vpop.f32.mrb[145].mxu0  ;;  %7799 = vmatmul.mubr.msk.f32.gmra.mrb[250].mxu0 %vm535_vm1, %v490_v34  ;;  %v5111_v55 = vadd.f32 %v10598_v24, %v7835_v1  ;;  %v5105_v19 = vpop.f32.mrb[145].mxu1  ;;  %7993 = vmatmul.mubr.msk.f32.gmra.mrb[250].mxu1 %vm535_vm1, %v522_v21  ;;  %v492_v56 = vld [vmem:[%s11053_s0 + $0xee8] sm:$0xff]  ;;  %v525_v9 = vld [vmem:[%s11053_s0 + $0xff0] sm:$0xff] }
 0x1fa   :  { %v5932_v52 = vmul.f32 0.25, %v5804_v48  ;;  %v4461_v49 = vadd.f32 %v4333_v18, %v9134_v63  ;;  %v3761_v51 = vadd.f32 %v10598_v24, %v3760_v46  ;;  %v5106_v60 = vadd.f32 %v10598_v24, %v5105_v19  ;;  %7801 = vmatprep.mubr.msk.f32.mxu0 %vm535_vm1, %v491_v42  ;;  %7995 = vmatprep.mubr.msk.f32.mxu1 %vm535_vm1, %v523_v10  ;;  %v526_v48 = vld [vmem:[%s11053_s0 + $0xff8] sm:$0xff] }
 0x1fb   :  { %6061 = vst [vmem:[#allocation2 + $0x68] sm:$0xff] %v5933_v0  ;;  %v5807_v7 = vadd.f32 %v5679_v40, %v4462_v13  ;;  %v4336_v5 = vmax.f32 %v3766_v44, 0.0  ;;  %v5681_v63 = vmax.f32 %v5111_v55, 0.0 }
 0x1fc   :  { %6060 = vst [vmem:[#allocation2 + $0x60] sm:$0xff] %v5932_v52  ;;  %v5806_v4 = vadd.f32 %v5678_v36, %v4461_v49  ;;  %v4335_v62 = vmax.f32 %v3761_v51, 0.0  ;;  %v5680_v32 = vmax.f32 %v5106_v60, 0.0  ;;  %v7644_v11 = vpop.f32.mrb[146].mxu0  ;;  %v7838_v41 = vpop.f32.mrb[146].mxu1 }
 0x1fd   :  { %v5935_v23 = vmul.f32 0.25, %v5807_v7  ;;  %v4464_v37 = vadd.f32 %v4336_v5, %v9152_v15  ;;  %v3776_v35 = vadd.f32 %v10598_v24, %v7644_v11  ;;  %v3770_v34 = vpop.f32.mrb[147].mxu0  ;;  %7802 = vmatmul.mubr.msk.f32.gmra.mrb[252].mxu0 %vm535_vm1, %v492_v56  ;;  %v5121_v21 = vadd.f32 %v10598_v24, %v7838_v41  ;;  %v5115_v16 = vpop.f32.mrb[147].mxu1  ;;  %7996 = vmatmul.mubr.msk.f32.gmra.mrb[252].mxu1 %vm535_vm1, %v524_v57  ;;  %v494_v15 = vld [vmem:[%s11053_s0 + $0xef8] sm:$0xff] }
 0x1fe   :  { %v5934_v26 = vmul.f32 0.25, %v5806_v4  ;;  %v4463_v40 = vadd.f32 %v4335_v62, %v9158_v22  ;;  %v3771_v42 = vadd.f32 %v10598_v24, %v3770_v34  ;;  %v5116_v10 = vadd.f32 %v10598_v24, %v5115_v16  ;;  %7804 = vmatprep.mubr.msk.f32.mxu0 %vm535_vm1, %v493_v25  ;;  %7998 = vmatprep.mubr.msk.f32.mxu1 %vm535_vm1, %v525_v9 }
 0x1ff   :  { %6063 = vst [vmem:[#allocation2 + $0x78] sm:$0xff] %v5935_v23  ;;  %v5809_v18 = vadd.f32 %v5681_v63, %v4464_v37  ;;  %v4338_v36 = vmax.f32 %v3776_v35, 0.0  ;;  %v5683_v22 = vmax.f32 %v5121_v21, 0.0 }
 0x200   :  { %6062 = vst [vmem:[#allocation2 + $0x70] sm:$0xff] %v5934_v26  ;;  %v5808_v14 = vadd.f32 %v5680_v32, %v4463_v40  ;;  %v4337_v1 = vmax.f32 %v3771_v42, 0.0  ;;  %v5682_v0 = vmax.f32 %v5116_v10, 0.0  ;;  %v7647_v13 = vpop.f32.mrb[148].mxu0  ;;  %v7841_v44 = vpop.f32.mrb[148].mxu1 }
 0x201   :  { %v5937_v46 = vmul.f32 0.25, %v5809_v18  ;;  %v4466_v55 = vadd.f32 %v4338_v36, %v9176_v39  ;;  %v3786_v19 = vadd.f32 %v10598_v24, %v7647_v13  ;;  %v3780_v52 = vpop.f32.mrb[149].mxu0  ;;  %7805 = vmatmul.mubr.msk.f32.gmra.mrb[254].mxu0 %vm535_vm1, %v494_v15  ;;  %v5131_v49 = vadd.f32 %v10598_v24, %v7841_v44  ;;  %v5125_v51 = vpop.f32.mrb[149].mxu1  ;;  %7999 = vmatmul.mubr.msk.f32.gmra.mrb[254].mxu1 %vm535_vm1, %v526_v48 }
 0x202   :  { %v5936_v60 = vmul.f32 0.25, %v5808_v14  ;;  %v4465_v56 = vadd.f32 %v4337_v1, %v9182_v47  ;;  %v3781_v57 = vadd.f32 %v10598_v24, %v3780_v52  ;;  %v5126_v7 = vadd.f32 %v10598_v24, %v5125_v51 }
 0x203   :  { %6065 = vst [vmem:[#allocation2 + $0x88] sm:$0xff] %v5937_v46  ;;  %v5811_v5 = vadd.f32 %v5683_v22, %v4466_v55  ;;  %v4340_v39 = vmax.f32 %v3786_v19, 0.0  ;;  %v5685_v63 = vmax.f32 %v5131_v49, 0.0 }
 0x204   :  { %6064 = vst [vmem:[#allocation2 + $0x80] sm:$0xff] %v5936_v60  ;;  %v5810_v25 = vadd.f32 %v5682_v0, %v4465_v56  ;;  %v4339_v9 = vmax.f32 %v3781_v57, 0.0  ;;  %v5684_v4 = vmax.f32 %v5126_v7, 0.0  ;;  %v7650_v62 = vpop.f32.mrb[150].mxu0  ;;  %v7844_v32 = vpop.f32.mrb[150].mxu1 }
 0x205   :  { %v5939_v11 = vmul.f32 0.25, %v5811_v5  ;;  %v4468_v41 = vadd.f32 %v4340_v39, %v9200_v2  ;;  %v3796_v23 = vadd.f32 %v10598_v24, %v7650_v62  ;;  %v3790_v47 = vpop.f32.mrb[151].mxu0  ;;  %v5141_v37 = vadd.f32 %v10598_v24, %v7844_v32  ;;  %v5135_v35 = vpop.f32.mrb[151].mxu1 }
 0x206   :  { %v5938_v34 = vmul.f32 0.25, %v5810_v25  ;;  %v4467_v21 = vadd.f32 %v4339_v9, %v9206_v8  ;;  %v3791_v16 = vadd.f32 %v10598_v24, %v3790_v47  ;;  %v5136_v26 = vadd.f32 %v10598_v24, %v5135_v35 }
 0x207   :  { %6067 = vst [vmem:[#allocation2 + $0x98] sm:$0xff] %v5939_v11  ;;  %v5813_v40 = vadd.f32 %v5685_v63, %v4468_v41  ;;  %v4342_v42 = vmax.f32 %v3796_v23, 0.0  ;;  %v5687_v10 = vmax.f32 %v5141_v37, 0.0 }
 0x208   :  { %6066 = vst [vmem:[#allocation2 + $0x90] sm:$0xff] %v5938_v34  ;;  %v5812_v15 = vadd.f32 %v5684_v4, %v4467_v21  ;;  %v4341_v2 = vmax.f32 %v3791_v16, 0.0  ;;  %v5686_v48 = vmax.f32 %v5136_v26, 0.0  ;;  %v7653_v18 = vpop.f32.mrb[152].mxu0  ;;  %v7847_v36 = vpop.f32.mrb[152].mxu1 }
 0x209   :  { %v5941_v22 = vmul.f32 0.25, %v5813_v40  ;;  %v4470_v14 = vadd.f32 %v4342_v42, %v9224_v28  ;;  %v3806_v1 = vadd.f32 %v10598_v24, %v7653_v18  ;;  %v3800_v8 = vpop.f32.mrb[153].mxu0  ;;  %v5151_v0 = vadd.f32 %v10598_v24, %v7847_v36  ;;  %v5145_v13 = vpop.f32.mrb[153].mxu1 }
 0x20a   :  { %v5940_v44 = vmul.f32 0.25, %v5812_v15  ;;  %v4469_v46 = vadd.f32 %v4341_v2, %v9230_v33  ;;  %v3801_v55 = vadd.f32 %v10598_v24, %v3800_v8  ;;  %v5146_v19 = vadd.f32 %v10598_v24, %v5145_v13 }
 0x20b   :  { %6069 = vst [vmem:[#allocation2 + $0xa8] sm:$0xff] %v5941_v22  ;;  %v5815_v52 = vadd.f32 %v5687_v10, %v4470_v14  ;;  %v4344_v49 = vmax.f32 %v3806_v1, 0.0  ;;  %v5689_v51 = vmax.f32 %v5151_v0, 0.0 }
 0x20c   :  { %6068 = vst [vmem:[#allocation2 + $0xa0] sm:$0xff] %v5940_v44  ;;  %v5814_v60 = vadd.f32 %v5686_v48, %v4469_v46  ;;  %v4343_v28 = vmax.f32 %v3801_v55, 0.0  ;;  %v5688_v56 = vmax.f32 %v5146_v19, 0.0  ;;  %v7656_v57 = vpop.f32.mrb[154].mxu0  ;;  %v7850_v7 = vpop.f32.mrb[154].mxu1 }
 0x20d   :  { %v5943_v5 = vmul.f32 0.25, %v5815_v52  ;;  %v4472_v39 = vadd.f32 %v4344_v49, %v9248_v54  ;;  %v3816_v63 = vadd.f32 %v10598_v24, %v7656_v57  ;;  %v3810_v33 = vpop.f32.mrb[155].mxu0  ;;  %v5161_v25 = vadd.f32 %v10598_v24, %v7850_v7  ;;  %v5155_v9 = vpop.f32.mrb[155].mxu1 }
 0x20e   :  { %v5942_v4 = vmul.f32 0.25, %v5814_v60  ;;  %v4471_v62 = vadd.f32 %v4343_v28, %v9254_v61  ;;  %v3811_v32 = vadd.f32 %v10598_v24, %v3810_v33  ;;  %v5156_v11 = vadd.f32 %v10598_v24, %v5155_v9 }
 0x20f   :  { %6071 = vst [vmem:[#allocation2 + $0xb8] sm:$0xff] %v5943_v5  ;;  %v5817_v41 = vadd.f32 %v5689_v51, %v4472_v39  ;;  %v4346_v23 = vmax.f32 %v3816_v63, 0.0  ;;  %v5691_v47 = vmax.f32 %v5161_v25, 0.0 }
 0x210   :  { %6070 = vst [vmem:[#allocation2 + $0xb0] sm:$0xff] %v5942_v4  ;;  %v5816_v37 = vadd.f32 %v5688_v56, %v4471_v62  ;;  %v4345_v54 = vmax.f32 %v3811_v32, 0.0  ;;  %v5690_v35 = vmax.f32 %v5156_v11, 0.0  ;;  %v7659_v34 = vpop.f32.mrb[156].mxu0  ;;  %v7853_v21 = vpop.f32.mrb[156].mxu1 }
 0x211   :  { %v5945_v16 = vmul.f32 0.25, %v5817_v41  ;;  %v4474_v26 = vadd.f32 %v4346_v23, %v9272_v20  ;;  %v3826_v40 = vadd.f32 %v10598_v24, %v7659_v34  ;;  %v3820_v61 = vpop.f32.mrb[157].mxu0  ;;  %v5171_v42 = vadd.f32 %v10598_v24, %v7853_v21  ;;  %v5165_v10 = vpop.f32.mrb[157].mxu1 }
 0x212   :  { %v5944_v15 = vmul.f32 0.25, %v5816_v37  ;;  %v4473_v2 = vadd.f32 %v4345_v54, %v9278_v29  ;;  %v3821_v48 = vadd.f32 %v10598_v24, %v3820_v61  ;;  %v5166_v18 = vadd.f32 %v10598_v24, %v5165_v10 }
 0x213   :  { %6073 = vst [vmem:[#allocation2 + $0xc8] sm:$0xff] %v5945_v16  ;;  %v5819_v36 = vadd.f32 %v5691_v47, %v4474_v26  ;;  %v4348_v22 = vmax.f32 %v3826_v40, 0.0  ;;  %v5693_v14 = vmax.f32 %v5171_v42, 0.0 }
 0x214   :  { %6072 = vst [vmem:[#allocation2 + $0xc0] sm:$0xff] %v5944_v15  ;;  %v5818_v1 = vadd.f32 %v5690_v35, %v4473_v2  ;;  %v4347_v20 = vmax.f32 %v3821_v48, 0.0  ;;  %v5692_v8 = vmax.f32 %v5166_v18, 0.0  ;;  %v7662_v0 = vpop.f32.mrb[158].mxu0  ;;  %v7856_v13 = vpop.f32.mrb[158].mxu1 }
 0x215   :  { %v5947_v44 = vmul.f32 0.25, %v5819_v36  ;;  %v4476_v46 = vadd.f32 %v4348_v22, %v9296_v50  ;;  %v3836_v55 = vadd.f32 %v10598_v24, %v7662_v0  ;;  %v3830_v29 = vpop.f32.mrb[159].mxu0  ;;  %v5181_v19 = vadd.f32 %v10598_v24, %v7856_v13  ;;  %v5175_v52 = vpop.f32.mrb[159].mxu1 }
 0x216   :  { %v5946_v49 = vmul.f32 0.25, %v5818_v1  ;;  %v4475_v51 = vadd.f32 %v4347_v20, %v9302_v59  ;;  %v3831_v60 = vadd.f32 %v10598_v24, %v3830_v29  ;;  %v5176_v28 = vadd.f32 %v10598_v24, %v5175_v52 }
 0x217   :  { %6075 = vst [vmem:[#allocation2 + $0xd8] sm:$0xff] %v5947_v44  ;;  %v5821_v56 = vadd.f32 %v5693_v14, %v4476_v46  ;;  %v4350_v57 = vmax.f32 %v3836_v55, 0.0  ;;  %v5695_v7 = vmax.f32 %v5181_v19, 0.0 }
 0x218   :  { %6074 = vst [vmem:[#allocation2 + $0xd0] sm:$0xff] %v5946_v49  ;;  %v5820_v5 = vadd.f32 %v5692_v8, %v4475_v51  ;;  %v4349_v50 = vmax.f32 %v3831_v60, 0.0  ;;  %v5694_v39 = vmax.f32 %v5176_v28, 0.0  ;;  %v7665_v63 = vpop.f32.mrb[160].mxu0  ;;  %v7859_v33 = vpop.f32.mrb[160].mxu1 }
 0x219   :  { %v5949_v25 = vmul.f32 0.25, %v5821_v56  ;;  %v4478_v9 = vadd.f32 %v4350_v57, %v9320_v17  ;;  %v3846_v4 = vadd.f32 %v10598_v24, %v7665_v63  ;;  %v3840_v59 = vpop.f32.mrb[161].mxu0  ;;  %v5191_v62 = vadd.f32 %v10598_v24, %v7859_v33  ;;  %v5185_v32 = vpop.f32.mrb[161].mxu1 }
 0x21a   :  { %v5948_v11 = vmul.f32 0.25, %v5820_v5  ;;  %v4477_v41 = vadd.f32 %v4349_v50, %v9326_v30  ;;  %v3841_v23 = vadd.f32 %v10598_v24, %v3840_v59  ;;  %v5186_v47 = vadd.f32 %v10598_v24, %v5185_v32 }
 0x21b   :  { %6077 = vst [vmem:[#allocation2 + $0xe8] sm:$0xff] %v5949_v25  ;;  %v5823_v37 = vadd.f32 %v5695_v7, %v4478_v9  ;;  %v4352_v54 = vmax.f32 %v3846_v4, 0.0  ;;  %v5697_v35 = vmax.f32 %v5191_v62, 0.0 }
 0x21c   :  { %6076 = vst [vmem:[#allocation2 + $0xe0] sm:$0xff] %v5948_v11  ;;  %v5822_v34 = vadd.f32 %v5694_v39, %v4477_v41  ;;  %v4351_v17 = vmax.f32 %v3841_v23, 0.0  ;;  %v5696_v21 = vmax.f32 %v5186_v47, 0.0  ;;  %v7668_v16 = vpop.f32.mrb[162].mxu0  ;;  %v7862_v26 = vpop.f32.mrb[162].mxu1 }
 0x21d   :  { %v5951_v40 = vmul.f32 0.25, %v5823_v37  ;;  %v4480_v61 = vadd.f32 %v4352_v54, %v9344_v53  ;;  %v3856_v42 = vadd.f32 %v10598_v24, %v7668_v16  ;;  %v3850_v30 = vpop.f32.mrb[163].mxu0  ;;  %v5201_v10 = vadd.f32 %v10598_v24, %v7862_v26  ;;  %v5195_v15 = vpop.f32.mrb[163].mxu1 }
 0x21e   :  { %v5950_v2 = vmul.f32 0.25, %v5822_v34  ;;  %v4479_v48 = vadd.f32 %v4351_v17, %v9350_v3  ;;  %v3851_v18 = vadd.f32 %v10598_v24, %v3850_v30  ;;  %v5196_v36 = vadd.f32 %v10598_v24, %v5195_v15 }
 0x21f   :  { %6079 = vst [vmem:[#allocation2 + $0xf8] sm:$0xff] %v5951_v40  ;;  %v5825_v22 = vadd.f32 %v5697_v35, %v4480_v61  ;;  %v4354_v14 = vmax.f32 %v3856_v42, 0.0  ;;  %v5699_v1 = vmax.f32 %v5201_v10, 0.0 }
 0x220   :  { %6078 = vst [vmem:[#allocation2 + $0xf0] sm:$0xff] %v5950_v2  ;;  %v5824_v20 = vadd.f32 %v5696_v21, %v4479_v48  ;;  %v4353_v53 = vmax.f32 %v3851_v18, 0.0  ;;  %v5698_v8 = vmax.f32 %v5196_v36, 0.0  ;;  %v7671_v0 = vpop.f32.mrb[164].mxu0  ;;  %v7865_v13 = vpop.f32.mrb[164].mxu1 }
 0x221   :  { %v5953_v44 = vmul.f32 0.25, %v5825_v22  ;;  %v4482_v46 = vadd.f32 %v4354_v14, %v9368_v27  ;;  %v3866_v55 = vadd.f32 %v10598_v24, %v7671_v0  ;;  %v3860_v3 = vpop.f32.mrb[165].mxu0  ;;  %v5211_v29 = vadd.f32 %v10598_v24, %v7865_v13  ;;  %v5205_v19 = vpop.f32.mrb[165].mxu1 }
 0x222   :  { %v5952_v52 = vmul.f32 0.25, %v5824_v20  ;;  %v4481_v49 = vadd.f32 %v4353_v53, %v9374_v38  ;;  %v3861_v51 = vadd.f32 %v10598_v24, %v3860_v3  ;;  %v5206_v60 = vadd.f32 %v10598_v24, %v5205_v19 }
 0x223   :  { %6081 = vst [vmem:[#allocation2 + $0x108] sm:$0xff] %v5953_v44  ;;  %v5827_v28 = vadd.f32 %v5699_v1, %v4482_v46  ;;  %v4356_v56 = vmax.f32 %v3866_v55, 0.0  ;;  %v5701_v57 = vmax.f32 %v5211_v29, 0.0 }
 0x224   :  { %6080 = vst [vmem:[#allocation2 + $0x100] sm:$0xff] %v5952_v52  ;;  %v5826_v7 = vadd.f32 %v5698_v8, %v4481_v49  ;;  %v4355_v27 = vmax.f32 %v3861_v51, 0.0  ;;  %v5700_v5 = vmax.f32 %v5206_v60, 0.0  ;;  %v7674_v50 = vpop.f32.mrb[166].mxu0  ;;  %v7868_v39 = vpop.f32.mrb[166].mxu1 }
 0x225   :  { %v5955_v63 = vmul.f32 0.25, %v5827_v28  ;;  %v4484_v33 = vadd.f32 %v4356_v56, %v9392_v6  ;;  %v3876_v25 = vadd.f32 %v10598_v24, %v7674_v50  ;;  %v3870_v38 = vpop.f32.mrb[167].mxu0  ;;  %v5221_v9 = vadd.f32 %v10598_v24, %v7868_v39  ;;  %v5215_v4 = vpop.f32.mrb[167].mxu1  ;;  %v11143_v56 = vld [vmem:[#allocation5_spill] sm:$0xff]  ;;  %v11144_v39 = vld [vmem:[#allocation6_spill] sm:$0xff] }
 0x226   :  { %v5954_v59 = vmul.f32 0.25, %v5826_v7  ;;  %v4483_v62 = vadd.f32 %v4355_v27, %v9398_v12  ;;  %v3871_v32 = vadd.f32 %v10598_v24, %v3870_v38  ;;  %v5216_v11 = vadd.f32 %v10598_v24, %v5215_v4 }
 0x227   :  { %6083 = vst [vmem:[#allocation2 + $0x118] sm:$0xff] %v5955_v63  ;;  %v5829_v41 = vadd.f32 %v5701_v57, %v4484_v33  ;;  %v4358_v23 = vmax.f32 %v3876_v25, 0.0  ;;  %v5703_v47 = vmax.f32 %v5221_v9, 0.0 }
 0x228   :  { %6082 = vst [vmem:[#allocation2 + $0x110] sm:$0xff] %v5954_v59  ;;  %v5828_v37 = vadd.f32 %v5700_v5, %v4483_v62  ;;  %v4357_v6 = vmax.f32 %v3871_v32, 0.0  ;;  %v5702_v54 = vmax.f32 %v5216_v11, 0.0  ;;  %v7677_v35 = vpop.f32.mrb[168].mxu0  ;;  %v7871_v34 = vpop.f32.mrb[168].mxu1 }
 0x229   :  { %v5957_v17 = vmul.f32 0.25, %v5829_v41  ;;  %v4486_v21 = vadd.f32 %v4358_v23, %v9416_v45  ;;  %v3886_v16 = vadd.f32 %v10598_v24, %v7677_v35  ;;  %v3880_v12 = vpop.f32.mrb[169].mxu0  ;;  %v5231_v26 = vadd.f32 %v10598_v24, %v7871_v34  ;;  %v5225_v40 = vpop.f32.mrb[169].mxu1 }
 0x22a   :  { %v5956_v61 = vmul.f32 0.25, %v5828_v37  ;;  %v4485_v42 = vadd.f32 %v4357_v6, %v9422_v58  ;;  %v3881_v30 = vadd.f32 %v10598_v24, %v3880_v12  ;;  %v5226_v10 = vadd.f32 %v10598_v24, %v5225_v40 }
 0x22b   :  { %6085 = vst [vmem:[#allocation2 + $0x128] sm:$0xff] %v5957_v17  ;;  %v5831_v15 = vadd.f32 %v5703_v47, %v4486_v21  ;;  %v4360_v2 = vmax.f32 %v3886_v16, 0.0  ;;  %v5705_v48 = vmax.f32 %v5231_v26, 0.0  ;;  %v11145_v47 = vld [vmem:[#allocation7_spill] sm:$0xff]  ;;  %v11146_v21 = vld [vmem:[#allocation8_spill] sm:$0xff] }
 0x22c   :  { %6084 = vst [vmem:[#allocation2 + $0x120] sm:$0xff] %v5956_v61  ;;  %v5830_v18 = vadd.f32 %v5702_v54, %v4485_v42  ;;  %v4359_v45 = vmax.f32 %v3881_v30, 0.0  ;;  %v5704_v36 = vmax.f32 %v5226_v10, 0.0  ;;  %v7680_v22 = vpop.f32.mrb[170].mxu0  ;;  %v7874_v14 = vpop.f32.mrb[170].mxu1 }
 0x22d   :  { %v5959_v1 = vmul.f32 0.25, %v5831_v15  ;;  %v4488_v20 = vadd.f32 %v4360_v2, %v9440_v31  ;;  %v3896_v53 = vadd.f32 %v10598_v24, %v7680_v22  ;;  %v3890_v58 = vpop.f32.mrb[171].mxu0  ;;  %v5241_v8 = vadd.f32 %v10598_v24, %v7874_v14  ;;  %v5235_v0 = vpop.f32.mrb[171].mxu1 }
 0x22e   :  { %v5958_v13 = vmul.f32 0.25, %v5830_v18  ;;  %v4487_v44 = vadd.f32 %v4359_v45, %v9446_v43  ;;  %v3891_v46 = vadd.f32 %v10598_v24, %v3890_v58  ;;  %v5236_v55 = vadd.f32 %v10598_v24, %v5235_v0  ;;  %v11147_v45 = vld [vmem:[#allocation9_spill] sm:$0xff]  ;;  %v11148_v58 = vld [vmem:[#allocation10_spill] sm:$0xff] }
 0x22f   :  { %6087 = vst [vmem:[#allocation2 + $0x138] sm:$0xff] %v5959_v1  ;;  %v5833_v3 = vadd.f32 %v5705_v48, %v4488_v20  ;;  %v4362_v29 = vmax.f32 %v3896_v53, 0.0  ;;  %v5707_v19 = vmax.f32 %v5241_v8, 0.0 }
 0x230   :  { %6086 = vst [vmem:[#allocation2 + $0x130] sm:$0xff] %v5958_v13  ;;  %v5832_v52 = vadd.f32 %v5704_v36, %v4487_v44  ;;  %v4361_v31 = vmax.f32 %v3891_v46, 0.0  ;;  %v5706_v49 = vmax.f32 %v5236_v55, 0.0  ;;  %v7683_v51 = vpop.f32.mrb[172].mxu0  ;;  %v7877_v60 = vpop.f32.mrb[172].mxu1 }
 0x231   :  { %v5961_v28 = vmul.f32 0.25, %v5833_v3  ;;  %v4490_v57 = vadd.f32 %v4362_v29, %v11143_v56  ;;  %v3906_v7 = vadd.f32 %v10598_v24, %v7683_v51  ;;  %v3900_v43 = vpop.f32.mrb[173].mxu0  ;;  %v5251_v27 = vadd.f32 %v10598_v24, %v7877_v60  ;;  %v5245_v5 = vpop.f32.mrb[173].mxu1  ;;  %v11149_v51 = vld [vmem:[#allocation11_spill] sm:$0xff] }
 0x232   :  { %v5960_v50 = vmul.f32 0.25, %v5832_v52  ;;  %v4489_v63 = vadd.f32 %v4361_v31, %v11144_v39  ;;  %v3901_v33 = vadd.f32 %v10598_v24, %v3900_v43  ;;  %v5246_v25 = vadd.f32 %v10598_v24, %v5245_v5 }
 0x233   :  { %6089 = vst [vmem:[#allocation2 + $0x148] sm:$0xff] %v5961_v28  ;;  %v5835_v38 = vadd.f32 %v5707_v19, %v4490_v57  ;;  %v4364_v9 = vmax.f32 %v3906_v7, 0.0  ;;  %v5709_v4 = vmax.f32 %v5251_v27, 0.0  ;;  %v11150_v27 = vld [vmem:[#allocation12_spill] sm:$0xff] }
 0x234   :  { %6088 = vst [vmem:[#allocation2 + $0x140] sm:$0xff] %v5960_v50  ;;  %v5834_v59 = vadd.f32 %v5706_v49, %v4489_v63  ;;  %v4363_v62 = vmax.f32 %v3901_v33, 0.0  ;;  %v5708_v32 = vmax.f32 %v5246_v25, 0.0  ;;  %v7686_v11 = vpop.f32.mrb[174].mxu0  ;;  %v7880_v41 = vpop.f32.mrb[174].mxu1 }
 0x235   :  { %v5963_v23 = vmul.f32 0.25, %v5835_v38  ;;  %v4492_v37 = vadd.f32 %v4364_v9, %v11145_v47  ;;  %v3916_v6 = vadd.f32 %v10598_v24, %v7686_v11  ;;  %v3910_v54 = vpop.f32.mrb[175].mxu0  ;;  %v5261_v35 = vadd.f32 %v10598_v24, %v7880_v41  ;;  %v5255_v34 = vpop.f32.mrb[175].mxu1  ;;  %v11151_v11 = vld [vmem:[#allocation13_spill] sm:$0xff] }
 0x236   :  { %v5962_v17 = vmul.f32 0.25, %v5834_v59  ;;  %v4491_v16 = vadd.f32 %v4363_v62, %v11146_v21  ;;  %v3911_v12 = vadd.f32 %v10598_v24, %v3910_v54  ;;  %v5256_v26 = vadd.f32 %v10598_v24, %v5255_v34 }
 0x237   :  { %6091 = vst [vmem:[#allocation2 + $0x158] sm:$0xff] %v5963_v23  ;;  %v5837_v40 = vadd.f32 %v5709_v4, %v4492_v37  ;;  %v4366_v61 = vmax.f32 %v3916_v6, 0.0  ;;  %v5711_v42 = vmax.f32 %v5261_v35, 0.0  ;;  %v11152_v35 = vld [vmem:[#allocation14_spill] sm:$0xff] }
 0x238   :  { %6090 = vst [vmem:[#allocation2 + $0x150] sm:$0xff] %v5962_v17  ;;  %v5836_v30 = vadd.f32 %v5708_v32, %v4491_v16  ;;  %v4365_v10 = vmax.f32 %v3911_v12, 0.0  ;;  %v5710_v15 = vmax.f32 %v5256_v26, 0.0  ;;  %v7689_v2 = vpop.f32.mrb[176].mxu0  ;;  %v7883_v48 = vpop.f32.mrb[176].mxu1 }
 0x239   :  { %v5965_v18 = vmul.f32 0.25, %v5837_v40  ;;  %v4494_v36 = vadd.f32 %v4366_v61, %v11147_v45  ;;  %v3926_v22 = vadd.f32 %v10598_v24, %v7689_v2  ;;  %v3920_v14 = vpop.f32.mrb[177].mxu0  ;;  %v5271_v1 = vadd.f32 %v10598_v24, %v7883_v48  ;;  %v5265_v20 = vpop.f32.mrb[177].mxu1  ;;  %v11153_v2 = vld [vmem:[#allocation15_spill] sm:$0xff] }
 0x23a   :  { %v5964_v53 = vmul.f32 0.25, %v5836_v30  ;;  %v4493_v8 = vadd.f32 %v4365_v10, %v11148_v58  ;;  %v3921_v0 = vadd.f32 %v10598_v24, %v3920_v14  ;;  %v5266_v13 = vadd.f32 %v10598_v24, %v5265_v20 }
 0x23b   :  { %6093 = vst [vmem:[#allocation2 + $0x168] sm:$0xff] %v5965_v18  ;;  %v5839_v44 = vadd.f32 %v5711_v42, %v4494_v36  ;;  %v4368_v46 = vmax.f32 %v3926_v22, 0.0  ;;  %v5713_v55 = vmax.f32 %v5271_v1, 0.0  ;;  %v11154_v1 = vld [vmem:[#allocation16_spill] sm:$0xff] }
 0x23c   :  { %6092 = vst [vmem:[#allocation2 + $0x160] sm:$0xff] %v5964_v53  ;;  %v5838_v3 = vadd.f32 %v5710_v15, %v4493_v8  ;;  %v4367_v29 = vmax.f32 %v3921_v0, 0.0  ;;  %v5712_v19 = vmax.f32 %v5266_v13, 0.0  ;;  %v7692_v52 = vpop.f32.mrb[178].mxu0  ;;  %v7886_v31 = vpop.f32.mrb[178].mxu1 }
 0x23d   :  { %v5967_v49 = vmul.f32 0.25, %v5839_v44  ;;  %v4496_v60 = vadd.f32 %v4368_v46, %v11149_v51  ;;  %v3936_v28 = vadd.f32 %v10598_v24, %v7692_v52  ;;  %v3930_v56 = vpop.f32.mrb[179].mxu0  ;;  %v5281_v57 = vadd.f32 %v10598_v24, %v7886_v31  ;;  %v5275_v7 = vpop.f32.mrb[179].mxu1  ;;  %v11155_v52 = vld [vmem:[#allocation17_spill] sm:$0xff] }
 0x23e   :  { %v5966_v43 = vmul.f32 0.25, %v5838_v3  ;;  %v4495_v5 = vadd.f32 %v4367_v29, %v11150_v27  ;;  %v3931_v50 = vadd.f32 %v10598_v24, %v3930_v56  ;;  %v5276_v39 = vadd.f32 %v10598_v24, %v5275_v7 }
 0x23f   :  { %6095 = vst [vmem:[#allocation2 + $0x178] sm:$0xff] %v5967_v49  ;;  %v5841_v63 = vadd.f32 %v5713_v55, %v4496_v60  ;;  %v4370_v33 = vmax.f32 %v3936_v28, 0.0  ;;  %v5715_v25 = vmax.f32 %v5281_v57, 0.0  ;;  %v11156_v57 = vld [vmem:[#allocation18_spill] sm:$0xff] }
 0x240   :  { %6094 = vst [vmem:[#allocation2 + $0x170] sm:$0xff] %v5966_v43  ;;  %v5840_v38 = vadd.f32 %v5712_v19, %v4495_v5  ;;  %v4369_v9 = vmax.f32 %v3931_v50, 0.0  ;;  %v5714_v4 = vmax.f32 %v5276_v39, 0.0  ;;  %v7695_v59 = vpop.f32.mrb[180].mxu0  ;;  %v7889_v62 = vpop.f32.mrb[180].mxu1 }
 0x241   :  { %v5969_v32 = vmul.f32 0.25, %v5841_v63  ;;  %v4498_v41 = vadd.f32 %v4370_v33, %v11151_v11  ;;  %v3946_v23 = vadd.f32 %v10598_v24, %v7695_v59  ;;  %v3940_v47 = vpop.f32.mrb[181].mxu0  ;;  %v5291_v37 = vadd.f32 %v10598_v24, %v7889_v62  ;;  %v5285_v6 = vpop.f32.mrb[181].mxu1  ;;  %v11157_v59 = vld [vmem:[#allocation19_spill] sm:$0xff] }
 0x242   :  { %v5968_v54 = vmul.f32 0.25, %v5840_v38  ;;  %v4497_v34 = vadd.f32 %v4369_v9, %v11152_v35  ;;  %v3941_v17 = vadd.f32 %v10598_v24, %v3940_v47  ;;  %v5286_v21 = vadd.f32 %v10598_v24, %v5285_v6 }
 0x243   :  { %6097 = vst [vmem:[#allocation2 + $0x188] sm:$0xff] %v5969_v32  ;;  %v5843_v16 = vadd.f32 %v5715_v25, %v4498_v41  ;;  %v4372_v12 = vmax.f32 %v3946_v23, 0.0  ;;  %v5717_v26 = vmax.f32 %v5291_v37, 0.0  ;;  %v10823_v32 = vld [vmem:[%s11055_s2] ss:$0 sm:$0xff]  ;;  %v11158_v37 = vld [vmem:[#allocation20_spill] sm:$0xff] }
 0x244   :  { %6096 = vst [vmem:[#allocation2 + $0x180] sm:$0xff] %v5968_v54  ;;  %v5842_v40 = vadd.f32 %v5714_v4, %v4497_v34  ;;  %v4371_v61 = vmax.f32 %v3941_v17, 0.0  ;;  %v5716_v42 = vmax.f32 %v5286_v21, 0.0  ;;  %v7698_v30 = vpop.f32.mrb[182].mxu0  ;;  %v7892_v10 = vpop.f32.mrb[182].mxu1 }
 0x245   :  { %v5971_v15 = vmul.f32 0.25, %v5843_v16  ;;  %v4500_v48 = vadd.f32 %v4372_v12, %v11153_v2  ;;  %v3956_v18 = vadd.f32 %v10598_v24, %v7698_v30  ;;  %v3950_v45 = vpop.f32.mrb[183].mxu0  ;;  %v5301_v36 = vadd.f32 %v10598_v24, %v7892_v10  ;;  %v5295_v22 = vpop.f32.mrb[183].mxu1  ;;  %v11159_v30 = vld [vmem:[#allocation21_spill] sm:$0xff] }
 0x246   :  { %v5970_v14 = vmul.f32 0.25, %v5842_v40  ;;  %v4499_v20 = vadd.f32 %v4371_v61, %v11154_v1  ;;  %v3951_v53 = vadd.f32 %v10598_v24, %v3950_v45  ;;  %v5296_v58 = vadd.f32 %v10598_v24, %v5295_v22 }
 0x247   :  { %6099 = vst [vmem:[#allocation2 + $0x198] sm:$0xff] %v5971_v15  ;;  %v5845_v8 = vadd.f32 %v5717_v26, %v4500_v48  ;;  %v4374_v0 = vmax.f32 %v3956_v18, 0.0  ;;  %v5719_v13 = vmax.f32 %v5301_v36, 0.0  ;;  %v11160_v36 = vld [vmem:[#allocation22_spill] sm:$0xff] }
 0x248   :  { %6098 = vst [vmem:[#allocation2 + $0x190] sm:$0xff] %v5970_v14  ;;  %v5844_v44 = vadd.f32 %v5716_v42, %v4499_v20  ;;  %v4373_v46 = vmax.f32 %v3951_v53, 0.0  ;;  %v5718_v55 = vmax.f32 %v5296_v58, 0.0  ;;  %v7701_v3 = vpop.f32.mrb[184].mxu0  ;;  %v7895_v29 = vpop.f32.mrb[184].mxu1 }
 0x249   :  { %v5973_v19 = vmul.f32 0.25, %v5845_v8  ;;  %v4502_v31 = vadd.f32 %v4374_v0, %v11155_v52  ;;  %v3966_v49 = vadd.f32 %v10598_v24, %v7701_v3  ;;  %v3960_v51 = vpop.f32.mrb[185].mxu0  ;;  %v5311_v60 = vadd.f32 %v10598_v24, %v7895_v29  ;;  %v5305_v28 = vpop.f32.mrb[185].mxu1  ;;  %v11161_v3 = vld [vmem:[#allocation23_spill] sm:$0xff] }
 0x24a   :  { %v5972_v56 = vmul.f32 0.25, %v5844_v44  ;;  %v4501_v7 = vadd.f32 %v4373_v46, %v11156_v57  ;;  %v3961_v43 = vadd.f32 %v10598_v24, %v3960_v51  ;;  %v5306_v27 = vadd.f32 %v10598_v24, %v5305_v28 }
 0x24b   :  { %6101 = vst [vmem:[#allocation2 + $0x1a8] sm:$0xff] %v5973_v19  ;;  %v5847_v5 = vadd.f32 %v5719_v13, %v4502_v31  ;;  %v4376_v50 = vmax.f32 %v3966_v49, 0.0  ;;  %v5721_v39 = vmax.f32 %v5311_v60, 0.0  ;;  %v11162_v60 = vld [vmem:[#allocation24_spill] sm:$0xff] }
 0x24c   :  { %6100 = vst [vmem:[#allocation2 + $0x1a0] sm:$0xff] %v5972_v56  ;;  %v5846_v63 = vadd.f32 %v5718_v55, %v4501_v7  ;;  %v4375_v33 = vmax.f32 %v3961_v43, 0.0  ;;  %v5720_v25 = vmax.f32 %v5306_v27, 0.0  ;;  %v7704_v38 = vpop.f32.mrb[186].mxu0  ;;  %v7898_v9 = vpop.f32.mrb[186].mxu1 }
 0x24d   :  { %v5975_v4 = vmul.f32 0.25, %v5847_v5  ;;  %v4504_v62 = vadd.f32 %v4376_v50, %v11157_v59  ;;  %v3976_v24 = vadd.f32 %v10823_v32, %v7704_v38  ;;  %v3970_v11 = vpop.f32.mrb[187].mxu0  ;;  %v5321_v41 = vadd.f32 %v10823_v32, %v7898_v9  ;;  %v5315_v23 = vpop.f32.mrb[187].mxu1  ;;  %v11163_v38 = vld [vmem:[#allocation25_spill] sm:$0xff] }
 0x24e   :  { %v5974_v47 = vmul.f32 0.25, %v5846_v63  ;;  %v4503_v6 = vadd.f32 %v4375_v33, %v11158_v37  ;;  %v3971_v54 = vadd.f32 %v10823_v32, %v3970_v11  ;;  %v5316_v35 = vadd.f32 %v10823_v32, %v5315_v23 }
 0x24f   :  { %6103 = vst [vmem:[#allocation2 + $0x1b8] sm:$0xff] %v5975_v4  ;;  %v5849_v34 = vadd.f32 %v5721_v39, %v4504_v62  ;;  %v4378_v17 = vmax.f32 %v3976_v24, 0.0  ;;  %v5723_v21 = vmax.f32 %v5321_v41, 0.0  ;;  %v11164_v41 = vld [vmem:[#allocation26_spill] sm:$0xff] }
 0x250   :  { %6102 = vst [vmem:[#allocation2 + $0x1b0] sm:$0xff] %v5974_v47  ;;  %v5848_v16 = vadd.f32 %v5720_v25, %v4503_v6  ;;  %v4377_v12 = vmax.f32 %v3971_v54, 0.0  ;;  %v5722_v26 = vmax.f32 %v5316_v35, 0.0  ;;  %v7707_v40 = vpop.f32.mrb[188].mxu0  ;;  %v7901_v61 = vpop.f32.mrb[188].mxu1 }
 0x251   :  { %v5977_v42 = vmul.f32 0.25, %v5849_v34  ;;  %v4506_v10 = vadd.f32 %v4378_v17, %v11159_v30  ;;  %v3986_v15 = vadd.f32 %v10823_v32, %v7707_v40  ;;  %v3980_v2 = vpop.f32.mrb[189].mxu0  ;;  %v5331_v48 = vadd.f32 %v10823_v32, %v7901_v61  ;;  %v5325_v18 = vpop.f32.mrb[189].mxu1  ;;  %v11165_v40 = vld [vmem:[#allocation27_spill] sm:$0xff] }
 0x252   :  { %v5976_v45 = vmul.f32 0.25, %v5848_v16  ;;  %v4505_v22 = vadd.f32 %v4377_v12, %v11160_v36  ;;  %v3981_v14 = vadd.f32 %v10823_v32, %v3980_v2  ;;  %v5326_v1 = vadd.f32 %v10823_v32, %v5325_v18 }
 0x253   :  { %6105 = vst [vmem:[#allocation2 + $0x1c8] sm:$0xff] %v5977_v42  ;;  %v5851_v20 = vadd.f32 %v5723_v21, %v4506_v10  ;;  %v4380_v53 = vmax.f32 %v3986_v15, 0.0  ;;  %v5725_v58 = vmax.f32 %v5331_v48, 0.0  ;;  %v11166_v48 = vld [vmem:[#allocation28_spill] sm:$0xff] }
 0x254   :  { %6104 = vst [vmem:[#allocation2 + $0x1c0] sm:$0xff] %v5976_v45  ;;  %v5850_v8 = vadd.f32 %v5722_v26, %v4505_v22  ;;  %v4379_v0 = vmax.f32 %v3981_v14, 0.0  ;;  %v5724_v13 = vmax.f32 %v5326_v1, 0.0  ;;  %v7710_v44 = vpop.f32.mrb[190].mxu0  ;;  %v7904_v46 = vpop.f32.mrb[190].mxu1 }
 0x255   :  { %v5979_v55 = vmul.f32 0.25, %v5851_v20  ;;  %v4508_v29 = vadd.f32 %v4380_v53, %v11161_v3  ;;  %v3996_v19 = vadd.f32 %v10823_v32, %v7710_v44  ;;  %v3990_v52 = vpop.f32.mrb[191].mxu0  ;;  %v5341_v31 = vadd.f32 %v10823_v32, %v7904_v46  ;;  %v5335_v49 = vpop.f32.mrb[191].mxu1  ;;  %v11167_v44 = vld [vmem:[#allocation29_spill] sm:$0xff] }
 0x256   :  { %v5978_v51 = vmul.f32 0.25, %v5850_v8  ;;  %v4507_v28 = vadd.f32 %v4379_v0, %v11162_v60  ;;  %v3991_v56 = vadd.f32 %v10823_v32, %v3990_v52  ;;  %v5336_v57 = vadd.f32 %v10823_v32, %v5335_v49 }
 0x257   :  { %6107 = vst [vmem:[#allocation2 + $0x1d8] sm:$0xff] %v5979_v55  ;;  %v5853_v7 = vadd.f32 %v5725_v58, %v4508_v29  ;;  %v4382_v43 = vmax.f32 %v3996_v19, 0.0  ;;  %v5727_v27 = vmax.f32 %v5341_v31, 0.0  ;;  %v11168_v31 = vld [vmem:[#allocation30_spill] sm:$0xff] }
 0x258   :  { %6106 = vst [vmem:[#allocation2 + $0x1d0] sm:$0xff] %v5978_v51  ;;  %v5852_v5 = vadd.f32 %v5724_v13, %v4507_v28  ;;  %v4381_v50 = vmax.f32 %v3991_v56, 0.0  ;;  %v5726_v39 = vmax.f32 %v5336_v57, 0.0  ;;  %v7713_v63 = vpop.f32.mrb[192].mxu0  ;;  %v7907_v33 = vpop.f32.mrb[192].mxu1 }
 0x259   :  { %v5981_v25 = vmul.f32 0.25, %v5853_v7  ;;  %v4510_v9 = vadd.f32 %v4382_v43, %v11163_v38  ;;  %v4006_v4 = vadd.f32 %v10823_v32, %v7713_v63  ;;  %v4000_v59 = vpop.f32.mrb[193].mxu0  ;;  %v5351_v62 = vadd.f32 %v10823_v32, %v7907_v33  ;;  %v5345_v24 = vpop.f32.mrb[193].mxu1  ;;  %v11169_v63 = vld [vmem:[#allocation31_spill] sm:$0xff] }
 0x25a   :  { %v5980_v11 = vmul.f32 0.25, %v5852_v5  ;;  %v4509_v23 = vadd.f32 %v4381_v50, %v11164_v41  ;;  %v4001_v47 = vadd.f32 %v10823_v32, %v4000_v59  ;;  %v5346_v37 = vadd.f32 %v10823_v32, %v5345_v24 }
 0x25b   :  { %6109 = vst [vmem:[#allocation2 + $0x1e8] sm:$0xff] %v5981_v25  ;;  %v5855_v6 = vadd.f32 %v5727_v27, %v4510_v9  ;;  %v4384_v54 = vmax.f32 %v4006_v4, 0.0  ;;  %v5729_v35 = vmax.f32 %v5351_v62, 0.0  ;;  %v11170_v62 = vld [vmem:[#allocation32_spill] sm:$0xff] }
 0x25c   :  { %6108 = vst [vmem:[#allocation2 + $0x1e0] sm:$0xff] %v5980_v11  ;;  %v5854_v34 = vadd.f32 %v5726_v39, %v4509_v23  ;;  %v4383_v17 = vmax.f32 %v4001_v47, 0.0  ;;  %v5728_v21 = vmax.f32 %v5346_v37, 0.0  ;;  %v7716_v16 = vpop.f32.mrb[194].mxu0  ;;  %v7910_v12 = vpop.f32.mrb[194].mxu1 }
 0x25d   :  { %v5983_v26 = vmul.f32 0.25, %v5855_v6  ;;  %v4512_v61 = vadd.f32 %v4384_v54, %v11165_v40  ;;  %v4016_v42 = vadd.f32 %v10823_v32, %v7716_v16  ;;  %v4010_v30 = vpop.f32.mrb[195].mxu0  ;;  %v5361_v10 = vadd.f32 %v10823_v32, %v7910_v12  ;;  %v5355_v15 = vpop.f32.mrb[195].mxu1  ;;  %v11171_v16 = vld [vmem:[#allocation33_spill] sm:$0xff] }
 0x25e   :  { %v5982_v2 = vmul.f32 0.25, %v5854_v34  ;;  %v4511_v18 = vadd.f32 %v4383_v17, %v11166_v48  ;;  %v4011_v45 = vadd.f32 %v10823_v32, %v4010_v30  ;;  %v5356_v36 = vadd.f32 %v10823_v32, %v5355_v15 }
 0x25f   :  { %6111 = vst [vmem:[#allocation2 + $0x1f8] sm:$0xff] %v5983_v26  ;;  %v5857_v22 = vadd.f32 %v5729_v35, %v4512_v61  ;;  %v4386_v14 = vmax.f32 %v4016_v42, 0.0  ;;  %v5731_v1 = vmax.f32 %v5361_v10, 0.0  ;;  %v11172_v10 = vld [vmem:[#allocation34_spill] sm:$0xff] }
 0x260   :  { %6110 = vst [vmem:[#allocation2 + $0x1f0] sm:$0xff] %v5982_v2  ;;  %v5856_v20 = vadd.f32 %v5728_v21, %v4511_v18  ;;  %v4385_v53 = vmax.f32 %v4011_v45, 0.0  ;;  %v5730_v58 = vmax.f32 %v5356_v36, 0.0  ;;  %v7719_v8 = vpop.f32.mrb[196].mxu0  ;;  %v7913_v0 = vpop.f32.mrb[196].mxu1 }
 0x261   :  { %v5985_v13 = vmul.f32 0.25, %v5857_v22  ;;  %v4514_v46 = vadd.f32 %v4386_v14, %v11167_v44  ;;  %v4026_v55 = vadd.f32 %v10823_v32, %v7719_v8  ;;  %v4020_v3 = vpop.f32.mrb[197].mxu0  ;;  %v5371_v29 = vadd.f32 %v10823_v32, %v7913_v0  ;;  %v5365_v19 = vpop.f32.mrb[197].mxu1  ;;  %v11173_v8 = vld [vmem:[#allocation35_spill] sm:$0xff] }
 0x262   :  { %v5984_v52 = vmul.f32 0.25, %v5856_v20  ;;  %v4513_v49 = vadd.f32 %v4385_v53, %v11168_v31  ;;  %v4021_v51 = vadd.f32 %v10823_v32, %v4020_v3  ;;  %v5366_v60 = vadd.f32 %v10823_v32, %v5365_v19 }
 0x263   :  { %6113 = vst [vmem:[#allocation2 + $0x208] sm:$0xff] %v5985_v13  ;;  %v5859_v28 = vadd.f32 %v5731_v1, %v4514_v46  ;;  %v4388_v56 = vmax.f32 %v4026_v55, 0.0  ;;  %v5733_v57 = vmax.f32 %v5371_v29, 0.0  ;;  %v11174_v29 = vld [vmem:[#allocation36_spill] sm:$0xff] }
 0x264   :  { %6112 = vst [vmem:[#allocation2 + $0x200] sm:$0xff] %v5984_v52  ;;  %v5858_v7 = vadd.f32 %v5730_v58, %v4513_v49  ;;  %v4387_v43 = vmax.f32 %v4021_v51, 0.0  ;;  %v5732_v27 = vmax.f32 %v5366_v60, 0.0  ;;  %v7722_v5 = vpop.f32.mrb[198].mxu0  ;;  %v7916_v50 = vpop.f32.mrb[198].mxu1 }
 0x265   :  { %v5987_v39 = vmul.f32 0.25, %v5859_v28  ;;  %v4516_v33 = vadd.f32 %v4388_v56, %v11169_v63  ;;  %v4036_v25 = vadd.f32 %v10823_v32, %v7722_v5  ;;  %v4030_v38 = vpop.f32.mrb[199].mxu0  ;;  %v5381_v9 = vadd.f32 %v10823_v32, %v7916_v50  ;;  %v5375_v4 = vpop.f32.mrb[199].mxu1  ;;  %v11175_v5 = vld [vmem:[#allocation37_spill] sm:$0xff] }
 0x266   :  { %v5986_v59 = vmul.f32 0.25, %v5858_v7  ;;  %v4515_v24 = vadd.f32 %v4387_v43, %v11170_v62  ;;  %v4031_v11 = vadd.f32 %v10823_v32, %v4030_v38  ;;  %v5376_v41 = vadd.f32 %v10823_v32, %v5375_v4 }
 0x267   :  { %6115 = vst [vmem:[#allocation2 + $0x218] sm:$0xff] %v5987_v39  ;;  %v5861_v23 = vadd.f32 %v5733_v57, %v4516_v33  ;;  %v4390_v47 = vmax.f32 %v4036_v25, 0.0  ;;  %v5735_v37 = vmax.f32 %v5381_v9, 0.0  ;;  %v11176_v9 = vld [vmem:[#allocation38_spill] sm:$0xff] }
 0x268   :  { %6114 = vst [vmem:[#allocation2 + $0x210] sm:$0xff] %v5986_v59  ;;  %v5860_v6 = vadd.f32 %v5732_v27, %v4515_v24  ;;  %v4389_v54 = vmax.f32 %v4031_v11, 0.0  ;;  %v5734_v35 = vmax.f32 %v5376_v41, 0.0  ;;  %v7725_v34 = vpop.f32.mrb[200].mxu0  ;;  %v7919_v17 = vpop.f32.mrb[200].mxu1 }
 0x269   :  { %v5989_v21 = vmul.f32 0.25, %v5861_v23  ;;  %v4518_v12 = vadd.f32 %v4390_v47, %v11171_v16  ;;  %v4046_v26 = vadd.f32 %v10823_v32, %v7725_v34  ;;  %v4040_v40 = vpop.f32.mrb[201].mxu0  ;;  %v5391_v61 = vadd.f32 %v10823_v32, %v7919_v17  ;;  %v5385_v42 = vpop.f32.mrb[201].mxu1  ;;  %v11177_v34 = vld [vmem:[#allocation39_spill] sm:$0xff] }
 0x26a   :  { %v5988_v30 = vmul.f32 0.25, %v5860_v6  ;;  %v4517_v15 = vadd.f32 %v4389_v54, %v11172_v10  ;;  %v4041_v2 = vadd.f32 %v10823_v32, %v4040_v40  ;;  %v5386_v48 = vadd.f32 %v10823_v32, %v5385_v42 }
 0x26b   :  { %6117 = vst [vmem:[#allocation2 + $0x228] sm:$0xff] %v5989_v21  ;;  %v5863_v18 = vadd.f32 %v5735_v37, %v4518_v12  ;;  %v4392_v45 = vmax.f32 %v4046_v26, 0.0  ;;  %v5737_v36 = vmax.f32 %v5391_v61, 0.0  ;;  %v11178_v61 = vld [vmem:[#allocation40_spill] sm:$0xff] }
 0x26c   :  { %6116 = vst [vmem:[#allocation2 + $0x220] sm:$0xff] %v5988_v30  ;;  %v5862_v22 = vadd.f32 %v5734_v35, %v4517_v15  ;;  %v4391_v14 = vmax.f32 %v4041_v2, 0.0  ;;  %v5736_v1 = vmax.f32 %v5386_v48, 0.0  ;;  %v7728_v20 = vpop.f32.mrb[202].mxu0  ;;  %v7922_v53 = vpop.f32.mrb[202].mxu1 }
 0x26d   :  { %v5991_v58 = vmul.f32 0.25, %v5863_v18  ;;  %v4520_v0 = vadd.f32 %v4392_v45, %v11173_v8  ;;  %v4056_v13 = vadd.f32 %v10823_v32, %v7728_v20  ;;  %v4050_v44 = vpop.f32.mrb[203].mxu0  ;;  %v5401_v46 = vadd.f32 %v10823_v32, %v7922_v53  ;;  %v5395_v55 = vpop.f32.mrb[203].mxu1  ;;  %v11179_v20 = vld [vmem:[#allocation41_spill] sm:$0xff] }
 0x26e   :  { %v5990_v3 = vmul.f32 0.25, %v5862_v22  ;;  %v4519_v19 = vadd.f32 %v4391_v14, %v11174_v29  ;;  %v4051_v52 = vadd.f32 %v10823_v32, %v4050_v44  ;;  %v5396_v31 = vadd.f32 %v10823_v32, %v5395_v55 }
 0x26f   :  { %6119 = vst [vmem:[#allocation2 + $0x238] sm:$0xff] %v5991_v58  ;;  %v5865_v49 = vadd.f32 %v5737_v36, %v4520_v0  ;;  %v4394_v51 = vmax.f32 %v4056_v13, 0.0  ;;  %v5739_v60 = vmax.f32 %v5401_v46, 0.0  ;;  %v11180_v46 = vld [vmem:[#allocation42_spill] sm:$0xff] }
 0x270   :  { %6118 = vst [vmem:[#allocation2 + $0x230] sm:$0xff] %v5990_v3  ;;  %v5864_v28 = vadd.f32 %v5736_v1, %v4519_v19  ;;  %v4393_v56 = vmax.f32 %v4051_v52, 0.0  ;;  %v5738_v57 = vmax.f32 %v5396_v31, 0.0  ;;  %v7731_v7 = vpop.f32.mrb[204].mxu0  ;;  %v7925_v43 = vpop.f32.mrb[204].mxu1 }
 0x271   :  { %v5993_v27 = vmul.f32 0.25, %v5865_v49  ;;  %v4522_v50 = vadd.f32 %v4394_v51, %v11175_v5  ;;  %v4066_v39 = vadd.f32 %v10823_v32, %v7731_v7  ;;  %v4060_v63 = vpop.f32.mrb[205].mxu0  ;;  %v5411_v33 = vadd.f32 %v10823_v32, %v7925_v43  ;;  %v5405_v25 = vpop.f32.mrb[205].mxu1  ;;  %v11181_v7 = vld [vmem:[#allocation43_spill] sm:$0xff] }
 0x272   :  { %v5992_v38 = vmul.f32 0.25, %v5864_v28  ;;  %v4521_v4 = vadd.f32 %v4393_v56, %v11176_v9  ;;  %v4061_v59 = vadd.f32 %v10823_v32, %v4060_v63  ;;  %v5406_v62 = vadd.f32 %v10823_v32, %v5405_v25 }
 0x273   :  { %6121 = vst [vmem:[#allocation2 + $0x248] sm:$0xff] %v5993_v27  ;;  %v5867_v24 = vadd.f32 %v5739_v60, %v4522_v50  ;;  %v4396_v11 = vmax.f32 %v4066_v39, 0.0  ;;  %v5741_v41 = vmax.f32 %v5411_v33, 0.0  ;;  %v11182_v33 = vld [vmem:[#allocation44_spill] sm:$0xff] }
 0x274   :  { %6120 = vst [vmem:[#allocation2 + $0x240] sm:$0xff] %v5992_v38  ;;  %v5866_v23 = vadd.f32 %v5738_v57, %v4521_v4  ;;  %v4395_v47 = vmax.f32 %v4061_v59, 0.0  ;;  %v5740_v37 = vmax.f32 %v5406_v62, 0.0  ;;  %v7734_v6 = vpop.f32.mrb[206].mxu0  ;;  %v7928_v54 = vpop.f32.mrb[206].mxu1 }
 0x275   :  { %v5995_v35 = vmul.f32 0.25, %v5867_v24  ;;  %v4524_v17 = vadd.f32 %v4396_v11, %v11177_v34  ;;  %v4076_v21 = vadd.f32 %v10823_v32, %v7734_v6  ;;  %v4070_v16 = vpop.f32.mrb[207].mxu0  ;;  %v5421_v12 = vadd.f32 %v10823_v32, %v7928_v54  ;;  %v5415_v26 = vpop.f32.mrb[207].mxu1  ;;  %v11183_v6 = vld [vmem:[#allocation45_spill] sm:$0xff] }
 0x276   :  { %v5994_v40 = vmul.f32 0.25, %v5866_v23  ;;  %v4523_v42 = vadd.f32 %v4395_v47, %v11178_v61  ;;  %v4071_v30 = vadd.f32 %v10823_v32, %v4070_v16  ;;  %v5416_v10 = vadd.f32 %v10823_v32, %v5415_v26 }
 0x277   :  { %6123 = vst [vmem:[#allocation2 + $0x258] sm:$0xff] %v5995_v35  ;;  %v5869_v15 = vadd.f32 %v5741_v41, %v4524_v17  ;;  %v4398_v2 = vmax.f32 %v4076_v21, 0.0  ;;  %v5743_v48 = vmax.f32 %v5421_v12, 0.0  ;;  %v11184_v12 = vld [vmem:[#allocation46_spill] sm:$0xff] }
 0x278   :  { %6122 = vst [vmem:[#allocation2 + $0x250] sm:$0xff] %v5994_v40  ;;  %v5868_v18 = vadd.f32 %v5740_v37, %v4523_v42  ;;  %v4397_v45 = vmax.f32 %v4071_v30, 0.0  ;;  %v5742_v36 = vmax.f32 %v5416_v10, 0.0  ;;  %v7737_v22 = vpop.f32.mrb[208].mxu0  ;;  %v7931_v14 = vpop.f32.mrb[208].mxu1 }
 0x279   :  { %v5997_v1 = vmul.f32 0.25, %v5869_v15  ;;  %v4526_v53 = vadd.f32 %v4398_v2, %v11179_v20  ;;  %v4086_v58 = vadd.f32 %v10823_v32, %v7737_v22  ;;  %v4080_v8 = vpop.f32.mrb[209].mxu0  ;;  %v5431_v0 = vadd.f32 %v10823_v32, %v7931_v14  ;;  %v5425_v13 = vpop.f32.mrb[209].mxu1  ;;  %v11185_v22 = vld [vmem:[#allocation47_spill] sm:$0xff] }
 0x27a   :  { %v5996_v44 = vmul.f32 0.25, %v5868_v18  ;;  %v4525_v55 = vadd.f32 %v4397_v45, %v11180_v46  ;;  %v4081_v3 = vadd.f32 %v10823_v32, %v4080_v8  ;;  %v5426_v29 = vadd.f32 %v10823_v32, %v5425_v13 }
 0x27b   :  { %6125 = vst [vmem:[#allocation2 + $0x268] sm:$0xff] %v5997_v1  ;;  %v5871_v19 = vadd.f32 %v5743_v48, %v4526_v53  ;;  %v4400_v52 = vmax.f32 %v4086_v58, 0.0  ;;  %v5745_v31 = vmax.f32 %v5431_v0, 0.0  ;;  %v11186_v0 = vld [vmem:[#allocation48_spill] sm:$0xff] }
 0x27c   :  { %6124 = vst [vmem:[#allocation2 + $0x260] sm:$0xff] %v5996_v44  ;;  %v5870_v49 = vadd.f32 %v5742_v36, %v4525_v55  ;;  %v4399_v51 = vmax.f32 %v4081_v3, 0.0  ;;  %v5744_v60 = vmax.f32 %v5426_v29, 0.0  ;;  %v7740_v28 = vpop.f32.mrb[210].mxu0  ;;  %v7934_v56 = vpop.f32.mrb[210].mxu1 }
 0x27d   :  { %v5999_v57 = vmul.f32 0.25, %v5871_v19  ;;  %v4528_v43 = vadd.f32 %v4400_v52, %v11181_v7  ;;  %v4096_v27 = vadd.f32 %v10823_v32, %v7740_v28  ;;  %v4090_v5 = vpop.f32.mrb[211].mxu0  ;;  %v5441_v50 = vadd.f32 %v10823_v32, %v7934_v56  ;;  %v5435_v39 = vpop.f32.mrb[211].mxu1  ;;  %v11187_v28 = vld [vmem:[#allocation49_spill] sm:$0xff] }
 0x27e   :  { %v5998_v63 = vmul.f32 0.25, %v5870_v49  ;;  %v4527_v25 = vadd.f32 %v4399_v51, %v11182_v33  ;;  %v4091_v38 = vadd.f32 %v10823_v32, %v4090_v5  ;;  %v5436_v9 = vadd.f32 %v10823_v32, %v5435_v39 }
 0x27f   :  { %6127 = vst [vmem:[#allocation2 + $0x278] sm:$0xff] %v5999_v57  ;;  %v5873_v4 = vadd.f32 %v5745_v31, %v4528_v43  ;;  %v4402_v59 = vmax.f32 %v4096_v27, 0.0  ;;  %v5747_v62 = vmax.f32 %v5441_v50, 0.0  ;;  %v11188_v50 = vld [vmem:[#allocation50_spill] sm:$0xff] }
 0x280   :  { %6126 = vst [vmem:[#allocation2 + $0x270] sm:$0xff] %v5998_v63  ;;  %v5872_v24 = vadd.f32 %v5744_v60, %v4527_v25  ;;  %v4401_v11 = vmax.f32 %v4091_v38, 0.0  ;;  %v5746_v41 = vmax.f32 %v5436_v9, 0.0  ;;  %v7743_v23 = vpop.f32.mrb[212].mxu0  ;;  %v7937_v47 = vpop.f32.mrb[212].mxu1 }
 0x281   :  { %v6001_v37 = vmul.f32 0.25, %v5873_v4  ;;  %v4530_v54 = vadd.f32 %v4402_v59, %v11183_v6  ;;  %v4106_v35 = vadd.f32 %v10823_v32, %v7743_v23  ;;  %v4100_v34 = vpop.f32.mrb[213].mxu0  ;;  %v5451_v17 = vadd.f32 %v10823_v32, %v7937_v47  ;;  %v5445_v21 = vpop.f32.mrb[213].mxu1  ;;  %v11189_v23 = vld [vmem:[#allocation51_spill] sm:$0xff] }
 0x282   :  { %v6000_v16 = vmul.f32 0.25, %v5872_v24  ;;  %v4529_v26 = vadd.f32 %v4401_v11, %v11184_v12  ;;  %v4101_v40 = vadd.f32 %v10823_v32, %v4100_v34  ;;  %v5446_v61 = vadd.f32 %v10823_v32, %v5445_v21 }
 0x283   :  { %6129 = vst [vmem:[#allocation2 + $0x288] sm:$0xff] %v6001_v37  ;;  %v5875_v42 = vadd.f32 %v5747_v62, %v4530_v54  ;;  %v4404_v30 = vmax.f32 %v4106_v35, 0.0  ;;  %v5749_v10 = vmax.f32 %v5451_v17, 0.0  ;;  %v11190_v17 = vld [vmem:[#allocation52_spill] sm:$0xff] }
 0x284   :  { %6128 = vst [vmem:[#allocation2 + $0x280] sm:$0xff] %v6000_v16  ;;  %v5874_v15 = vadd.f32 %v5746_v41, %v4529_v26  ;;  %v4403_v2 = vmax.f32 %v4101_v40, 0.0  ;;  %v5748_v48 = vmax.f32 %v5446_v61, 0.0  ;;  %v7746_v18 = vpop.f32.mrb[214].mxu0  ;;  %v7940_v45 = vpop.f32.mrb[214].mxu1 }
 0x285   :  { %v6003_v36 = vmul.f32 0.25, %v5875_v42  ;;  %v4532_v14 = vadd.f32 %v4404_v30, %v11185_v22  ;;  %v4116_v1 = vadd.f32 %v10823_v32, %v7746_v18  ;;  %v4110_v20 = vpop.f32.mrb[215].mxu0  ;;  %v5461_v53 = vadd.f32 %v10823_v32, %v7940_v45  ;;  %v5455_v58 = vpop.f32.mrb[215].mxu1  ;;  %v11191_v18 = vld [vmem:[#allocation53_spill] sm:$0xff] }
 0x286   :  { %v6002_v8 = vmul.f32 0.25, %v5874_v15  ;;  %v4531_v13 = vadd.f32 %v4403_v2, %v11186_v0  ;;  %v4111_v44 = vadd.f32 %v10823_v32, %v4110_v20  ;;  %v5456_v46 = vadd.f32 %v10823_v32, %v5455_v58 }
 0x287   :  { %6131 = vst [vmem:[#allocation2 + $0x298] sm:$0xff] %v6003_v36  ;;  %v5877_v55 = vadd.f32 %v5749_v10, %v4532_v14  ;;  %v4406_v3 = vmax.f32 %v4116_v1, 0.0  ;;  %v5751_v29 = vmax.f32 %v5461_v53, 0.0  ;;  %v11192_v53 = vld [vmem:[#allocation54_spill] sm:$0xff] }
 0x288   :  { %6130 = vst [vmem:[#allocation2 + $0x290] sm:$0xff] %v6002_v8  ;;  %v5876_v19 = vadd.f32 %v5748_v48, %v4531_v13  ;;  %v4405_v52 = vmax.f32 %v4111_v44, 0.0  ;;  %v5750_v31 = vmax.f32 %v5456_v46, 0.0  ;;  %v7749_v49 = vpop.f32.mrb[216].mxu0  ;;  %v7943_v51 = vpop.f32.mrb[216].mxu1 }
 0x289   :  { %v6005_v60 = vmul.f32 0.25, %v5877_v55  ;;  %v4534_v56 = vadd.f32 %v4406_v3, %v11187_v28  ;;  %v4126_v57 = vadd.f32 %v10823_v32, %v7749_v49  ;;  %v4120_v7 = vpop.f32.mrb[217].mxu0  ;;  %v5471_v43 = vadd.f32 %v10823_v32, %v7943_v51  ;;  %v5465_v27 = vpop.f32.mrb[217].mxu1  ;;  %v11193_v49 = vld [vmem:[#allocation55_spill] sm:$0xff] }
 0x28a   :  { %v6004_v5 = vmul.f32 0.25, %v5876_v19  ;;  %v4533_v39 = vadd.f32 %v4405_v52, %v11188_v50  ;;  %v4121_v63 = vadd.f32 %v10823_v32, %v4120_v7  ;;  %v5466_v33 = vadd.f32 %v10823_v32, %v5465_v27 }
 0x28b   :  { %6133 = vst [vmem:[#allocation2 + $0x2a8] sm:$0xff] %v6005_v60  ;;  %v5879_v25 = vadd.f32 %v5751_v29, %v4534_v56  ;;  %v4408_v38 = vmax.f32 %v4126_v57, 0.0  ;;  %v5753_v9 = vmax.f32 %v5471_v43, 0.0  ;;  %v11194_v43 = vld [vmem:[#allocation56_spill] sm:$0xff] }
 0x28c   :  { %6132 = vst [vmem:[#allocation2 + $0x2a0] sm:$0xff] %v6004_v5  ;;  %v5878_v4 = vadd.f32 %v5750_v31, %v4533_v39  ;;  %v4407_v59 = vmax.f32 %v4121_v63, 0.0  ;;  %v5752_v62 = vmax.f32 %v5466_v33, 0.0  ;;  %v7752_v24 = vpop.f32.mrb[218].mxu0  ;;  %v7946_v11 = vpop.f32.mrb[218].mxu1 }
 0x28d   :  { %v6007_v41 = vmul.f32 0.25, %v5879_v25  ;;  %v4536_v47 = vadd.f32 %v4408_v38, %v11189_v23  ;;  %v4136_v37 = vadd.f32 %v10823_v32, %v7752_v24  ;;  %v4130_v6 = vpop.f32.mrb[219].mxu0  ;;  %v5481_v54 = vadd.f32 %v10823_v32, %v7946_v11  ;;  %v5475_v35 = vpop.f32.mrb[219].mxu1  ;;  %v11195_v24 = vld [vmem:[#allocation57_spill] sm:$0xff] }
 0x28e   :  { %v6006_v34 = vmul.f32 0.25, %v5878_v4  ;;  %v4535_v21 = vadd.f32 %v4407_v59, %v11190_v17  ;;  %v4131_v16 = vadd.f32 %v10823_v32, %v4130_v6  ;;  %v5476_v12 = vadd.f32 %v10823_v32, %v5475_v35 }
 0x28f   :  { %6135 = vst [vmem:[#allocation2 + $0x2b8] sm:$0xff] %v6007_v41  ;;  %v5881_v26 = vadd.f32 %v5753_v9, %v4536_v47  ;;  %v4410_v40 = vmax.f32 %v4136_v37, 0.0  ;;  %v5755_v61 = vmax.f32 %v5481_v54, 0.0  ;;  %v11196_v54 = vld [vmem:[#allocation58_spill] sm:$0xff] }
 0x290   :  { %6134 = vst [vmem:[#allocation2 + $0x2b0] sm:$0xff] %v6006_v34  ;;  %v5880_v42 = vadd.f32 %v5752_v62, %v4535_v21  ;;  %v4409_v30 = vmax.f32 %v4131_v16, 0.0  ;;  %v5754_v10 = vmax.f32 %v5476_v12, 0.0  ;;  %v7755_v15 = vpop.f32.mrb[220].mxu0  ;;  %v7949_v2 = vpop.f32.mrb[220].mxu1 }
 0x291   :  { %v6009_v48 = vmul.f32 0.25, %v5881_v26  ;;  %v4538_v45 = vadd.f32 %v4410_v40, %v11191_v18  ;;  %v4146_v36 = vadd.f32 %v10823_v32, %v7755_v15  ;;  %v4140_v22 = vpop.f32.mrb[221].mxu0  ;;  %v5491_v14 = vadd.f32 %v10823_v32, %v7949_v2  ;;  %v5485_v1 = vpop.f32.mrb[221].mxu1  ;;  %v11197_v15 = vld [vmem:[#allocation59_spill] sm:$0xff] }
 0x292   :  { %v6008_v20 = vmul.f32 0.25, %v5880_v42  ;;  %v4537_v58 = vadd.f32 %v4409_v30, %v11192_v53  ;;  %v4141_v8 = vadd.f32 %v10823_v32, %v4140_v22  ;;  %v5486_v0 = vadd.f32 %v10823_v32, %v5485_v1 }
 0x293   :  { %6137 = vst [vmem:[#allocation2 + $0x2c8] sm:$0xff] %v6009_v48  ;;  %v5883_v13 = vadd.f32 %v5755_v61, %v4538_v45  ;;  %v4412_v44 = vmax.f32 %v4146_v36, 0.0  ;;  %v5757_v46 = vmax.f32 %v5491_v14, 0.0  ;;  %v11198_v14 = vld [vmem:[#allocation60_spill] sm:$0xff] }
 0x294   :  { %6136 = vst [vmem:[#allocation2 + $0x2c0] sm:$0xff] %v6008_v20  ;;  %v5882_v55 = vadd.f32 %v5754_v10, %v4537_v58  ;;  %v4411_v3 = vmax.f32 %v4141_v8, 0.0  ;;  %v5756_v29 = vmax.f32 %v5486_v0, 0.0  ;;  %v7758_v19 = vpop.f32.mrb[222].mxu0  ;;  %v7952_v52 = vpop.f32.mrb[222].mxu1 }
 0x295   :  { %v6011_v31 = vmul.f32 0.25, %v5883_v13  ;;  %v4540_v51 = vadd.f32 %v4412_v44, %v11193_v49  ;;  %v4156_v60 = vadd.f32 %v10823_v32, %v7758_v19  ;;  %v4150_v28 = vpop.f32.mrb[223].mxu0  ;;  %v5501_v56 = vadd.f32 %v10823_v32, %v7952_v52  ;;  %v5495_v57 = vpop.f32.mrb[223].mxu1  ;;  %v11199_v19 = vld [vmem:[#allocation61_spill] sm:$0xff] }
 0x296   :  { %v6010_v7 = vmul.f32 0.25, %v5882_v55  ;;  %v4539_v27 = vadd.f32 %v4411_v3, %v11194_v43  ;;  %v4151_v5 = vadd.f32 %v10823_v32, %v4150_v28  ;;  %v5496_v50 = vadd.f32 %v10823_v32, %v5495_v57 }
 0x297   :  { %6139 = vst [vmem:[#allocation2 + $0x2d8] sm:$0xff] %v6011_v31  ;;  %v5885_v39 = vadd.f32 %v5757_v46, %v4540_v51  ;;  %v4414_v63 = vmax.f32 %v4156_v60, 0.0  ;;  %v5759_v33 = vmax.f32 %v5501_v56, 0.0  ;;  %v11200_v56 = vld [vmem:[#allocation62_spill] sm:$0xff] }
 0x298   :  { %6138 = vst [vmem:[#allocation2 + $0x2d0] sm:$0xff] %v6010_v7  ;;  %v5884_v25 = vadd.f32 %v5756_v29, %v4539_v27  ;;  %v4413_v38 = vmax.f32 %v4151_v5, 0.0  ;;  %v5758_v9 = vmax.f32 %v5496_v50, 0.0  ;;  %v7761_v4 = vpop.f32.mrb[224].mxu0  ;;  %v7955_v59 = vpop.f32.mrb[224].mxu1 }
 0x299   :  { %v6013_v62 = vmul.f32 0.25, %v5885_v39  ;;  %v4542_v11 = vadd.f32 %v4414_v63, %v11195_v24  ;;  %v4166_v41 = vadd.f32 %v10823_v32, %v7761_v4  ;;  %v4160_v23 = vpop.f32.mrb[225].mxu0  ;;  %v5511_v47 = vadd.f32 %v10823_v32, %v7955_v59  ;;  %v5505_v37 = vpop.f32.mrb[225].mxu1  ;;  %v11201_v4 = vld [vmem:[#allocation63_spill] sm:$0xff] }
 0x29a   :  { %v6012_v6 = vmul.f32 0.25, %v5884_v25  ;;  %v4541_v35 = vadd.f32 %v4413_v38, %v11196_v54  ;;  %v4161_v34 = vadd.f32 %v10823_v32, %v4160_v23  ;;  %v5506_v17 = vadd.f32 %v10823_v32, %v5505_v37 }
 0x29b   :  { %6141 = vst [vmem:[#allocation2 + $0x2e8] sm:$0xff] %v6013_v62  ;;  %v5887_v21 = vadd.f32 %v5759_v33, %v4542_v11  ;;  %v4416_v16 = vmax.f32 %v4166_v41, 0.0  ;;  %v5761_v12 = vmax.f32 %v5511_v47, 0.0  ;;  %v11202_v47 = vld [vmem:[#allocation64_spill] sm:$0xff] }
 0x29c   :  { %6140 = vst [vmem:[#allocation2 + $0x2e0] sm:$0xff] %v6012_v6  ;;  %v5886_v26 = vadd.f32 %v5758_v9, %v4541_v35  ;;  %v4415_v40 = vmax.f32 %v4161_v34, 0.0  ;;  %v5760_v61 = vmax.f32 %v5506_v17, 0.0  ;;  %v7764_v42 = vpop.f32.mrb[226].mxu0  ;;  %v7958_v30 = vpop.f32.mrb[226].mxu1 }
 0x29d   :  { %v6015_v10 = vmul.f32 0.25, %v5887_v21  ;;  %v4544_v2 = vadd.f32 %v4416_v16, %v11197_v15  ;;  %v4176_v48 = vadd.f32 %v10823_v32, %v7764_v42  ;;  %v4170_v18 = vpop.f32.mrb[227].mxu0  ;;  %v5521_v45 = vadd.f32 %v10823_v32, %v7958_v30  ;;  %v5515_v36 = vpop.f32.mrb[227].mxu1  ;;  %v11203_v42 = vld [vmem:[#allocation65_spill] sm:$0xff] }
 0x29e   :  { %v6014_v22 = vmul.f32 0.25, %v5886_v26  ;;  %v4543_v1 = vadd.f32 %v4415_v40, %v11198_v14  ;;  %v4171_v20 = vadd.f32 %v10823_v32, %v4170_v18  ;;  %v5516_v53 = vadd.f32 %v10823_v32, %v5515_v36 }
 0x29f   :  { %6143 = vst [vmem:[#allocation2 + $0x2f8] sm:$0xff] %v6015_v10  ;;  %v5889_v58 = vadd.f32 %v5761_v12, %v4544_v2  ;;  %v4418_v8 = vmax.f32 %v4176_v48, 0.0  ;;  %v5763_v0 = vmax.f32 %v5521_v45, 0.0  ;;  %v11204_v45 = vld [vmem:[#allocation66_spill] sm:$0xff] }
 0x2a0   :  { %6142 = vst [vmem:[#allocation2 + $0x2f0] sm:$0xff] %v6014_v22  ;;  %v5888_v13 = vadd.f32 %v5760_v61, %v4543_v1  ;;  %v4417_v44 = vmax.f32 %v4171_v20, 0.0  ;;  %v5762_v46 = vmax.f32 %v5516_v53, 0.0  ;;  %v7767_v55 = vpop.f32.mrb[228].mxu0  ;;  %v7961_v3 = vpop.f32.mrb[228].mxu1 }
 0x2a1   :  { %v6017_v29 = vmul.f32 0.25, %v5889_v58  ;;  %v4546_v52 = vadd.f32 %v4418_v8, %v11199_v19  ;;  %v4186_v31 = vadd.f32 %v10823_v32, %v7767_v55  ;;  %v4180_v49 = vpop.f32.mrb[229].mxu0  ;;  %v5531_v51 = vadd.f32 %v10823_v32, %v7961_v3  ;;  %v5525_v60 = vpop.f32.mrb[229].mxu1  ;;  %v11205_v55 = vld [vmem:[#allocation67_spill] sm:$0xff] }
 0x2a2   :  { %v6016_v28 = vmul.f32 0.25, %v5888_v13  ;;  %v4545_v57 = vadd.f32 %v4417_v44, %v11200_v56  ;;  %v4181_v7 = vadd.f32 %v10823_v32, %v4180_v49  ;;  %v5526_v43 = vadd.f32 %v10823_v32, %v5525_v60 }
 0x2a3   :  { %6145 = vst [vmem:[#allocation2 + $0x308] sm:$0xff] %v6017_v29  ;;  %v5891_v27 = vadd.f32 %v5763_v0, %v4546_v52  ;;  %v4420_v5 = vmax.f32 %v4186_v31, 0.0  ;;  %v5765_v50 = vmax.f32 %v5531_v51, 0.0  ;;  %v11206_v51 = vld [vmem:[#allocation68_spill] sm:$0xff] }
 0x2a4   :  { %6144 = vst [vmem:[#allocation2 + $0x300] sm:$0xff] %v6016_v28  ;;  %v5890_v39 = vadd.f32 %v5762_v46, %v4545_v57  ;;  %v4419_v63 = vmax.f32 %v4181_v7, 0.0  ;;  %v5764_v33 = vmax.f32 %v5526_v43, 0.0  ;;  %v7770_v25 = vpop.f32.mrb[230].mxu0  ;;  %v7964_v38 = vpop.f32.mrb[230].mxu1 }
 0x2a5   :  { %v6019_v9 = vmul.f32 0.25, %v5891_v27  ;;  %v4548_v59 = vadd.f32 %v4420_v5, %v11201_v4  ;;  %v4196_v62 = vadd.f32 %v10823_v32, %v7770_v25  ;;  %v4190_v24 = vpop.f32.mrb[231].mxu0  ;;  %v5541_v11 = vadd.f32 %v10823_v32, %v7964_v38  ;;  %v5535_v41 = vpop.f32.mrb[231].mxu1  ;;  %v11207_v25 = vld [vmem:[#allocation69_spill] sm:$0xff] }
 0x2a6   :  { %v6018_v23 = vmul.f32 0.25, %v5890_v39  ;;  %v4547_v37 = vadd.f32 %v4419_v63, %v11202_v47  ;;  %v4191_v6 = vadd.f32 %v10823_v32, %v4190_v24  ;;  %v5536_v54 = vadd.f32 %v10823_v32, %v5535_v41 }
 0x2a7   :  { %6147 = vst [vmem:[#allocation2 + $0x318] sm:$0xff] %v6019_v9  ;;  %v5893_v35 = vadd.f32 %v5765_v50, %v4548_v59  ;;  %v4422_v34 = vmax.f32 %v4196_v62, 0.0  ;;  %v5767_v17 = vmax.f32 %v5541_v11, 0.0  ;;  %v11208_v11 = vld [vmem:[#allocation70_spill] sm:$0xff] }
 0x2a8   :  { %6146 = vst [vmem:[#allocation2 + $0x310] sm:$0xff] %v6018_v23  ;;  %v5892_v21 = vadd.f32 %v5764_v33, %v4547_v37  ;;  %v4421_v16 = vmax.f32 %v4191_v6, 0.0  ;;  %v5766_v12 = vmax.f32 %v5536_v54, 0.0  ;;  %v7773_v26 = vpop.f32.mrb[232].mxu0  ;;  %v7967_v40 = vpop.f32.mrb[232].mxu1 }
 0x2a9   :  { %v6021_v61 = vmul.f32 0.25, %v5893_v35  ;;  %v4550_v30 = vadd.f32 %v4422_v34, %v11203_v42  ;;  %v4206_v10 = vadd.f32 %v10823_v32, %v7773_v26  ;;  %v4200_v15 = vpop.f32.mrb[233].mxu0  ;;  %v5551_v2 = vadd.f32 %v10823_v32, %v7967_v40  ;;  %v5545_v48 = vpop.f32.mrb[233].mxu1  ;;  %v11209_v26 = vld [vmem:[#allocation71_spill] sm:$0xff] }
 0x2aa   :  { %v6020_v18 = vmul.f32 0.25, %v5892_v21  ;;  %v4549_v36 = vadd.f32 %v4421_v16, %v11204_v45  ;;  %v4201_v22 = vadd.f32 %v10823_v32, %v4200_v15  ;;  %v5546_v14 = vadd.f32 %v10823_v32, %v5545_v48 }
 0x2ab   :  { %6149 = vst [vmem:[#allocation2 + $0x328] sm:$0xff] %v6021_v61  ;;  %v5895_v1 = vadd.f32 %v5767_v17, %v4550_v30  ;;  %v4424_v20 = vmax.f32 %v4206_v10, 0.0  ;;  %v5769_v53 = vmax.f32 %v5551_v2, 0.0  ;;  %v10984_v61 = vld [vmem:[%s11055_s2] ss:$0 sm:$0xff]  ;;  %v11210_v2 = vld [vmem:[#allocation72_spill] sm:$0xff] }
 0x2ac   :  { %6148 = vst [vmem:[#allocation2 + $0x320] sm:$0xff] %v6020_v18  ;;  %v5894_v58 = vadd.f32 %v5766_v12, %v4549_v36  ;;  %v4423_v8 = vmax.f32 %v4201_v22, 0.0  ;;  %v5768_v0 = vmax.f32 %v5546_v14, 0.0  ;;  %v7776_v13 = vpop.f32.mrb[234].mxu0  ;;  %v7970_v44 = vpop.f32.mrb[234].mxu1  ;;  %s8033_s2 = smov [#allocation2]  }
 0x2ad   :  { %v6023_v46 = vmul.f32 0.25, %v5895_v1  ;;  %v4552_v3 = vadd.f32 %v4424_v20, %v11205_v55  ;;  %v4216_v29 = vadd.f32 %v10823_v32, %v7776_v13  ;;  %v4210_v19 = vpop.f32.mrb[235].mxu0  ;;  %v5561_v52 = vadd.f32 %v10823_v32, %v7970_v44  ;;  %v5555_v31 = vpop.f32.mrb[235].mxu1  ;;  %v11211_v13 = vld [vmem:[#allocation73_spill] sm:$0xff]  ;;  %s6181_s13 = sshll.u32 %s8033_s2, 4  ;;  %s6182_s13 = int_to_ptr.vmem [resolvable:$true] %s6181_s13 }
 0x2ae   :  { %v6022_v49 = vmul.f32 0.25, %v5894_v58  ;;  %v4551_v60 = vadd.f32 %v4423_v8, %v11206_v51  ;;  %v4211_v28 = vadd.f32 %v10823_v32, %v4210_v19  ;;  %v5556_v56 = vadd.f32 %v10823_v32, %v5555_v31  ;;  %s8009_s14 = scalar_lea.vmem %s6182_s13, 16384  ;;  %p8014_p1 = scmp.lt.s32.totalorder %s6182_s13, %s6182_s13 }
 0x2af   :  { %6151 = vst [vmem:[#allocation2 + $0x338] sm:$0xff] %v6023_v46  ;;  %v5897_v57 = vadd.f32 %v5769_v53, %v4552_v3  ;;  %v4426_v7 = vmax.f32 %v4216_v29, 0.0  ;;  %v5771_v43 = vmax.f32 %v5561_v52, 0.0  ;;  %v11212_v52 = vld [vmem:[#allocation74_spill] sm:$0xff]  ;;  %p8010_p0 = scmp.ne.s32.totalorder %s6182_s13, %s8009_s14  ;;  %p8015_p2 = scmp.lt.s32.totalorder %s8009_s14, %s8009_s14 }
 0x2b0   :  { %6150 = vst [vmem:[#allocation2 + $0x330] sm:$0xff] %v6022_v49  ;;  %v5896_v27 = vadd.f32 %v5768_v0, %v4551_v60  ;;  %v4425_v5 = vmax.f32 %v4211_v28, 0.0  ;;  %v5770_v50 = vmax.f32 %v5556_v56, 0.0  ;;  %v7779_v39 = vpop.f32.mrb[236].mxu0  ;;  %v7973_v63 = vpop.f32.mrb[236].mxu1 }
 0x2b1   :  { %v6025_v33 = vmul.f32 0.25, %v5897_v57  ;;  %v4554_v38 = vadd.f32 %v4426_v7, %v11207_v25  ;;  %v4226_v9 = vadd.f32 %v10823_v32, %v7779_v39  ;;  %v4220_v4 = vpop.f32.mrb[237].mxu0  ;;  %v5571_v59 = vadd.f32 %v10823_v32, %v7973_v63  ;;  %v5565_v62 = vpop.f32.mrb[237].mxu1  ;;  %v11213_v39 = vld [vmem:[#allocation75_spill] sm:$0xff]  ;;  %p8016_p3 = por %p8015_p2, %p8014_p1 }
 0x2b2   :  { %v6024_v24 = vmul.f32 0.25, %v5896_v27  ;;  %v4553_v41 = vadd.f32 %v4425_v5, %v11208_v11  ;;  %v4221_v23 = vadd.f32 %v10823_v32, %v4220_v4  ;;  %v5566_v47 = vadd.f32 %v10823_v32, %v5565_v62 }
 0x2b3   :  { %6153 = vst [vmem:[#allocation2 + $0x348] sm:$0xff] %v6025_v33  ;;  %v5899_v37 = vadd.f32 %v5771_v43, %v4554_v38  ;;  %v4428_v6 = vmax.f32 %v4226_v9, 0.0  ;;  %v5773_v54 = vmax.f32 %v5571_v59, 0.0  ;;  %v11214_v59 = vld [vmem:[#allocation76_spill] sm:$0xff]  ;;  %p8017_p4 = pnand %p8016_p3, %p8010_p0 }
 0x2b4   :  { %6152 = vst [vmem:[#allocation2 + $0x340] sm:$0xff] %v6024_v24  ;;  %v5898_v35 = vadd.f32 %v5770_v50, %v4553_v41  ;;  %v4427_v34 = vmax.f32 %v4221_v23, 0.0  ;;  %v5772_v17 = vmax.f32 %v5566_v47, 0.0  ;;  %v7782_v21 = vpop.f32.mrb[238].mxu0  ;;  %v7976_v16 = vpop.f32.mrb[238].mxu1 }
 0x2b5   :  { %v6027_v12 = vmul.f32 0.25, %v5899_v37  ;;  %v4556_v40 = vadd.f32 %v4428_v6, %v11209_v26  ;;  %v4236_v32 = vadd.f32 %v10984_v61, %v7782_v21  ;;  %v4230_v42 = vpop.f32.mrb[239].mxu0  ;;  %v5581_v30 = vadd.f32 %v10984_v61, %v7976_v16  ;;  %v5575_v10 = vpop.f32.mrb[239].mxu1  ;;  %v11215_v21 = vld [vmem:[#allocation77_spill] sm:$0xff] }
 0x2b6   :  { %v6026_v15 = vmul.f32 0.25, %v5898_v35  ;;  %v4555_v48 = vadd.f32 %v4427_v34, %v11210_v2  ;;  %v4231_v18 = vadd.f32 %v10984_v61, %v4230_v42  ;;  %v5576_v45 = vadd.f32 %v10984_v61, %v5575_v10 }
 0x2b7   :  { %6155 = vst [vmem:[#allocation2 + $0x358] sm:$0xff] %v6027_v12  ;;  %v5901_v36 = vadd.f32 %v5773_v54, %v4556_v40  ;;  %v4430_v22 = vmax.f32 %v4236_v32, 0.0  ;;  %v5775_v14 = vmax.f32 %v5581_v30, 0.0  ;;  %v11216_v30 = vld [vmem:[#allocation78_spill] sm:$0xff] }
 0x2b8   :  { %6154 = vst [vmem:[#allocation2 + $0x350] sm:$0xff] %v6026_v15  ;;  %v5900_v1 = vadd.f32 %v5772_v17, %v4555_v48  ;;  %v4429_v20 = vmax.f32 %v4231_v18, 0.0  ;;  %v5774_v53 = vmax.f32 %v5576_v45, 0.0  ;;  %v7785_v58 = vpop.f32.mrb[240].mxu0  ;;  %v7979_v8 = vpop.f32.mrb[240].mxu1 }
 0x2b9   :  { %v6029_v0 = vmul.f32 0.25, %v5901_v36  ;;  %v4558_v44 = vadd.f32 %v4430_v22, %v11211_v13  ;;  %v4246_v46 = vadd.f32 %v10984_v61, %v7785_v58  ;;  %v4240_v55 = vpop.f32.mrb[241].mxu0  ;;  %v5591_v3 = vadd.f32 %v10984_v61, %v7979_v8  ;;  %v5585_v29 = vpop.f32.mrb[241].mxu1  ;;  %v11217_v58 = vld [vmem:[#allocation79_spill] sm:$0xff] }
 0x2ba   :  { %v6028_v19 = vmul.f32 0.25, %v5900_v1  ;;  %v4557_v31 = vadd.f32 %v4429_v20, %v11212_v52  ;;  %v4241_v49 = vadd.f32 %v10984_v61, %v4240_v55  ;;  %v5586_v51 = vadd.f32 %v10984_v61, %v5585_v29 }
 0x2bb   :  { %6157 = vst [vmem:[#allocation2 + $0x368] sm:$0xff] %v6029_v0  ;;  %v5903_v60 = vadd.f32 %v5775_v14, %v4558_v44  ;;  %v4432_v28 = vmax.f32 %v4246_v46, 0.0  ;;  %v5777_v56 = vmax.f32 %v5591_v3, 0.0  ;;  %v11218_v3 = vld [vmem:[#allocation80_spill] sm:$0xff] }
 0x2bc   :  { %6156 = vst [vmem:[#allocation2 + $0x360] sm:$0xff] %v6028_v19  ;;  %v5902_v57 = vadd.f32 %v5774_v53, %v4557_v31  ;;  %v4431_v7 = vmax.f32 %v4241_v49, 0.0  ;;  %v5776_v43 = vmax.f32 %v5586_v51, 0.0  ;;  %v7788_v27 = vpop.f32.mrb[242].mxu0  ;;  %v7982_v5 = vpop.f32.mrb[242].mxu1 }
 0x2bd   :  { %v6031_v50 = vmul.f32 0.25, %v5903_v60  ;;  %v4560_v63 = vadd.f32 %v4432_v28, %v11213_v39  ;;  %v4256_v33 = vadd.f32 %v10984_v61, %v7788_v27  ;;  %v4250_v25 = vpop.f32.mrb[243].mxu0  ;;  %v5601_v38 = vadd.f32 %v10984_v61, %v7982_v5  ;;  %v5595_v9 = vpop.f32.mrb[243].mxu1  ;;  %v11219_v27 = vld [vmem:[#allocation81_spill] sm:$0xff] }
 0x2be   :  { %v6030_v4 = vmul.f32 0.25, %v5902_v57  ;;  %v4559_v62 = vadd.f32 %v4431_v7, %v11214_v59  ;;  %v4251_v24 = vadd.f32 %v10984_v61, %v4250_v25  ;;  %v5596_v11 = vadd.f32 %v10984_v61, %v5595_v9 }
 0x2bf   :  { %6159 = vst [vmem:[#allocation2 + $0x378] sm:$0xff] %v6031_v50  ;;  %v5905_v41 = vadd.f32 %v5777_v56, %v4560_v63  ;;  %v4434_v23 = vmax.f32 %v4256_v33, 0.0  ;;  %v5779_v47 = vmax.f32 %v5601_v38, 0.0  ;;  %v11220_v38 = vld [vmem:[#allocation82_spill] sm:$0xff] }
 0x2c0   :  { %6158 = vst [vmem:[#allocation2 + $0x370] sm:$0xff] %v6030_v4  ;;  %v5904_v37 = vadd.f32 %v5776_v43, %v4559_v62  ;;  %v4433_v6 = vmax.f32 %v4251_v24, 0.0  ;;  %v5778_v54 = vmax.f32 %v5596_v11, 0.0  ;;  %v7791_v35 = vpop.f32.mrb[244].mxu0  ;;  %v7985_v34 = vpop.f32.mrb[244].mxu1 }
 0x2c1   :  { %v6033_v17 = vmul.f32 0.25, %v5905_v41  ;;  %v4562_v16 = vadd.f32 %v4434_v23, %v11215_v21  ;;  %v4266_v12 = vadd.f32 %v10984_v61, %v7791_v35  ;;  %v4260_v26 = vpop.f32.mrb[245].mxu0  ;;  %v5611_v40 = vadd.f32 %v10984_v61, %v7985_v34  ;;  %v5605_v32 = vpop.f32.mrb[245].mxu1  ;;  %v11221_v35 = vld [vmem:[#allocation83_spill] sm:$0xff] }
 0x2c2   :  { %v6032_v42 = vmul.f32 0.25, %v5904_v37  ;;  %v4561_v10 = vadd.f32 %v4433_v6, %v11216_v30  ;;  %v4261_v15 = vadd.f32 %v10984_v61, %v4260_v26  ;;  %v5606_v2 = vadd.f32 %v10984_v61, %v5605_v32 }
 0x2c3   :  { %6161 = vst [vmem:[#allocation2 + $0x388] sm:$0xff] %v6033_v17  ;;  %v5907_v48 = vadd.f32 %v5779_v47, %v4562_v16  ;;  %v4436_v18 = vmax.f32 %v4266_v12, 0.0  ;;  %v5781_v45 = vmax.f32 %v5611_v40, 0.0  ;;  %v11222_v40 = vld [vmem:[#allocation84_spill] sm:$0xff] }
 0x2c4   :  { %6160 = vst [vmem:[#allocation2 + $0x380] sm:$0xff] %v6032_v42  ;;  %v5906_v36 = vadd.f32 %v5778_v54, %v4561_v10  ;;  %v4435_v22 = vmax.f32 %v4261_v15, 0.0  ;;  %v5780_v14 = vmax.f32 %v5606_v2, 0.0  ;;  %v7794_v1 = vpop.f32.mrb[246].mxu0  ;;  %v7988_v20 = vpop.f32.mrb[246].mxu1 }
 0x2c5   :  { %v6035_v53 = vmul.f32 0.25, %v5907_v48  ;;  %v4564_v8 = vadd.f32 %v4436_v18, %v11217_v58  ;;  %v4276_v0 = vadd.f32 %v10984_v61, %v7794_v1  ;;  %v4270_v13 = vpop.f32.mrb[247].mxu0  ;;  %v5621_v44 = vadd.f32 %v10984_v61, %v7988_v20  ;;  %v5615_v46 = vpop.f32.mrb[247].mxu1  ;;  %v11223_v1 = vld [vmem:[#allocation85_spill] sm:$0xff] }
 0x2c6   :  { %v6034_v55 = vmul.f32 0.25, %v5906_v36  ;;  %v4563_v29 = vadd.f32 %v4435_v22, %v11218_v3  ;;  %v4271_v19 = vadd.f32 %v10984_v61, %v4270_v13  ;;  %v5616_v52 = vadd.f32 %v10984_v61, %v5615_v46 }
 0x2c7   :  { %6163 = vst [vmem:[#allocation2 + $0x398] sm:$0xff] %v6035_v53  ;;  %v5909_v31 = vadd.f32 %v5781_v45, %v4564_v8  ;;  %v4438_v49 = vmax.f32 %v4276_v0, 0.0  ;;  %v5783_v51 = vmax.f32 %v5621_v44, 0.0  ;;  %v11224_v44 = vld [vmem:[#allocation86_spill] sm:$0xff] }
 0x2c8   :  { %6162 = vst [vmem:[#allocation2 + $0x390] sm:$0xff] %v6034_v55  ;;  %v5908_v60 = vadd.f32 %v5780_v14, %v4563_v29  ;;  %v4437_v28 = vmax.f32 %v4271_v19, 0.0  ;;  %v5782_v56 = vmax.f32 %v5616_v52, 0.0  ;;  %v7797_v57 = vpop.f32.mrb[248].mxu0  ;;  %v7991_v7 = vpop.f32.mrb[248].mxu1 }
 0x2c9   :  { %v6037_v43 = vmul.f32 0.25, %v5909_v31  ;;  %v4566_v5 = vadd.f32 %v4438_v49, %v11219_v27  ;;  %v4286_v50 = vadd.f32 %v10984_v61, %v7797_v57  ;;  %v4280_v39 = vpop.f32.mrb[249].mxu0  ;;  %v5631_v63 = vadd.f32 %v10984_v61, %v7991_v7  ;;  %v5625_v33 = vpop.f32.mrb[249].mxu1  ;;  %v11225_v57 = vld [vmem:[#allocation87_spill] sm:$0xff] }
 0x2ca   :  { %v6036_v25 = vmul.f32 0.25, %v5908_v60  ;;  %v4565_v9 = vadd.f32 %v4437_v28, %v11220_v38  ;;  %v4281_v4 = vadd.f32 %v10984_v61, %v4280_v39  ;;  %v5626_v59 = vadd.f32 %v10984_v61, %v5625_v33 }
 0x2cb   :  { %6165 = vst [vmem:[#allocation2 + $0x3a8] sm:$0xff] %v6037_v43  ;;  %v5911_v62 = vadd.f32 %v5783_v51, %v4566_v5  ;;  %v4440_v24 = vmax.f32 %v4286_v50, 0.0  ;;  %v5785_v11 = vmax.f32 %v5631_v63, 0.0  ;;  %v11226_v63 = vld [vmem:[#allocation88_spill] sm:$0xff] }
 0x2cc   :  { %6164 = vst [vmem:[#allocation2 + $0x3a0] sm:$0xff] %v6036_v25  ;;  %v5910_v41 = vadd.f32 %v5782_v56, %v4565_v9  ;;  %v4439_v23 = vmax.f32 %v4281_v4, 0.0  ;;  %v5784_v47 = vmax.f32 %v5626_v59, 0.0  ;;  %v7800_v37 = vpop.f32.mrb[250].mxu0  ;;  %v7994_v6 = vpop.f32.mrb[250].mxu1 }
 0x2cd   :  { %v6039_v54 = vmul.f32 0.25, %v5911_v62  ;;  %v4568_v34 = vadd.f32 %v4440_v24, %v11221_v35  ;;  %v4296_v17 = vadd.f32 %v10984_v61, %v7800_v37  ;;  %v4290_v21 = vpop.f32.mrb[251].mxu0  ;;  %v5641_v16 = vadd.f32 %v10984_v61, %v7994_v6  ;;  %v5635_v12 = vpop.f32.mrb[251].mxu1  ;;  %v11228_v6 = vld [vmem:[#allocation90_spill] sm:$0xff] }
 0x2ce   :  { %v6038_v26 = vmul.f32 0.25, %v5910_v41  ;;  %v4567_v32 = vadd.f32 %v4439_v23, %v11222_v40  ;;  %v4291_v42 = vadd.f32 %v10984_v61, %v4290_v21  ;;  %v5636_v30 = vadd.f32 %v10984_v61, %v5635_v12  ;;  %v11227_v23 = vld [vmem:[#allocation89_spill] sm:$0xff] }
 0x2cf   :  { %6167 = vst [vmem:[#allocation2 + $0x3b8] sm:$0xff] %v6039_v54  ;;  %v5913_v10 = vadd.f32 %v5785_v11, %v4568_v34  ;;  %v4442_v15 = vmax.f32 %v4296_v17, 0.0  ;;  %v5787_v2 = vmax.f32 %v5641_v16, 0.0 }
 0x2d0   :  { %6166 = vst [vmem:[#allocation2 + $0x3b0] sm:$0xff] %v6038_v26  ;;  %v5912_v48 = vadd.f32 %v5784_v47, %v4567_v32  ;;  %v4441_v18 = vmax.f32 %v4291_v42, 0.0  ;;  %v5786_v45 = vmax.f32 %v5636_v30, 0.0  ;;  %v7803_v36 = vpop.f32.mrb[252].mxu0  ;;  %v7997_v22 = vpop.f32.mrb[252].mxu1 }
 0x2d1   :  { %v6041_v14 = vmul.f32 0.25, %v5913_v10  ;;  %v4570_v20 = vadd.f32 %v4442_v15, %v11223_v1  ;;  %v4306_v53 = vadd.f32 %v10984_v61, %v7803_v36  ;;  %v4300_v58 = vpop.f32.mrb[253].mxu0  ;;  %v5651_v8 = vadd.f32 %v10984_v61, %v7997_v22  ;;  %v5645_v0 = vpop.f32.mrb[253].mxu1 }
 0x2d2   :  { %v6040_v13 = vmul.f32 0.25, %v5912_v48  ;;  %v4569_v46 = vadd.f32 %v4441_v18, %v11224_v44  ;;  %v4301_v55 = vadd.f32 %v10984_v61, %v4300_v58  ;;  %v5646_v3 = vadd.f32 %v10984_v61, %v5645_v0 }
 0x2d3   :  { %6169 = vst [vmem:[#allocation2 + $0x3c8] sm:$0xff] %v6041_v14  ;;  %v5915_v29 = vadd.f32 %v5787_v2, %v4570_v20  ;;  %v4444_v19 = vmax.f32 %v4306_v53, 0.0  ;;  %v5789_v52 = vmax.f32 %v5651_v8, 0.0 }
 0x2d4   :  { %6168 = vst [vmem:[#allocation2 + $0x3c0] sm:$0xff] %v6040_v13  ;;  %v5914_v31 = vadd.f32 %v5786_v45, %v4569_v46  ;;  %v4443_v49 = vmax.f32 %v4301_v55, 0.0  ;;  %v5788_v51 = vmax.f32 %v5646_v3, 0.0  ;;  %v7806_v60 = vpop.f32.mrb[254].mxu0  ;;  %v8000_v28 = vpop.f32.mrb[254].mxu1 }
 0x2d5   :  { %v6043_v56 = vmul.f32 0.25, %v5915_v29  ;;  %v4572_v7 = vadd.f32 %v4444_v19, %v11225_v57  ;;  %v4316_v43 = vadd.f32 %v10984_v61, %v7806_v60  ;;  %v4310_v27 = vpop.f32.mrb[255].mxu0  ;;  %v5661_v5 = vadd.f32 %v10984_v61, %v8000_v28  ;;  %v5655_v50 = vpop.f32.mrb[255].mxu1 }
 0x2d6   :  { %v6042_v39 = vmul.f32 0.25, %v5914_v31  ;;  %v4571_v33 = vadd.f32 %v4443_v49, %v11226_v63  ;;  %v4311_v25 = vadd.f32 %v10984_v61, %v4310_v27  ;;  %v5656_v38 = vadd.f32 %v10984_v61, %v5655_v50 }
 0x2d7   :  { %6171 = vst [vmem:[#allocation2 + $0x3d8] sm:$0xff] %v6043_v56  ;;  %v5917_v9 = vadd.f32 %v5789_v52, %v4572_v7  ;;  %v4446_v4 = vmax.f32 %v4316_v43, 0.0  ;;  %v5791_v59 = vmax.f32 %v5661_v5, 0.0 }
 0x2d8   :  { %6170 = vst [vmem:[#allocation2 + $0x3d0] sm:$0xff] %v6042_v39  ;;  %v5916_v62 = vadd.f32 %v5788_v51, %v4571_v33  ;;  %v4445_v24 = vmax.f32 %v4311_v25, 0.0  ;;  %v5790_v11 = vmax.f32 %v5656_v38, 0.0 }
 0x2d9   :  { %v6045_v41 = vmul.f32 0.25, %v5917_v9  ;;  %v4574_v47 = vadd.f32 %v4446_v4, %v11227_v23 }
 0x2da   :  { %v6044_v37 = vmul.f32 0.25, %v5916_v62  ;;  %v4573_v54 = vadd.f32 %v4445_v24, %v11228_v6 }
 0x2db   :  { %6173 = vst [vmem:[#allocation2 + $0x3e8] sm:$0xff] %v6045_v41  ;;  %v5919_v35 = vadd.f32 %v5791_v59, %v4574_v47 }
 0x2dc   :  { %6172 = vst [vmem:[#allocation2 + $0x3e0] sm:$0xff] %v6044_v37  ;;  %v5918_v61 = vadd.f32 %v5790_v11, %v4573_v54 }
 0x2dd   :  { %v6047_v34 = vmul.f32 0.25, %v5919_v35 }
 0x2de   :  { %v6046_v17 = vmul.f32 0.25, %v5918_v61 }
 0x2df   :  { %6175 = vst [vmem:[#allocation2 + $0x3f8] sm:$0xff] %v6047_v34 }
 0x2e0   :  { %6174 = vst [vmem:[#allocation2 + $0x3f0] sm:$0xff] %v6046_v17 }
 0x2e1   :  { %8020 = shalt.err (!%p8017_p4)
}
 0x2e2   :  { %s8021_s17 = scalar_lea.hbm %s11056_s3, 16384 }
 0x2e3   :  { %p8022_p5 = scmp.ne.s32.totalorder %s11056_s3, %s8021_s17  ;;  %p8025_p6 = scmp.lt.u32.totalorder %s8021_s17, %s11056_s3 }
 0x2e5   :  { %p8027_p7 = pnand %p8025_p6, %p8022_p5 }
 0x2e7   :  { %8030 = shalt.err (!%p8027_p7)
}
 0x2e8   :  { %s8034_s21 = smov 128   ;;  %s8035_s22 = smov 8  }
 0x2e9   :  { %6187 = dma.vmem_to_hbm [thread:$0]  %s6182_s13, 16384, %s11056_s3, [#allocation3], %s8034_s21, %s8034_s21, %s8035_s22  }
 0x2ea   :  { %8031 = dma.done.wait [#allocation3], 16384  }
 0x2eb   :  { %8032 = vsyncadd [#allocation3], 4294950912 }
 0x2ec   :  { %6191 = vsyncpa [#allocation3], 1 }

</bundles_post_ra>
